<compile_context>
chip_gen: v7x
topology: tpu7x:2x2x1
jax: 0.10.0
libtpu: 0.0.40
codegen_flags: <defaults>
</compile_context>

<pallas_src>
import functools

import jax
import jax.numpy as jnp
from jax import lax
from jax.experimental import pallas as pl
from jax.experimental.pallas import tpu as pltpu


LANES = 128


def _conv_end_kernel(x_ref, w_ref, b_ref, o_ref, acc_ref, *, K, Wp):
    # x_ref:   (rows, Cin)          bf16  flattened padded image (+ guard rows)
    # w_ref:   (K, K, Cin, Cout_p)  bf16  resident weights (lane-padded Cout)
    # b_ref:   (1, Cout_p)          f32
    # o_ref:   (H*Wp, Cout_p)       f32   lane-dense output tile (junk cols w>=W)
    # acc_ref: (H*Wp, Cout_p)       f32   VMEM accumulator
    M = o_ref.shape[0]  # H * Wp

    acc_ref[...] = jnp.zeros_like(acc_ref)
    # Fused im2col: K*K shifted contiguous slices, each a small MXU matmul,
    # accumulated in f32. Static unroll (K*K = 25).
    for kh in range(K):
        for kw in range(K):
            s = kh * Wp + kw
            acc_ref[...] += jnp.dot(
                x_ref[s:s + M, :],            # (M, Cin)   bf16
                w_ref[kh, kw],                # (Cin, Cp)  bf16
                preferred_element_type=jnp.float32,
            )
    o_ref[...] = acc_ref[...] + b_ref[...]    # f32 bias add, full-lane store


def conv_end_forward(x_nchw, weight_oihw, bias, *, kernel_size=5, ratio=2):
    """conv_end forward: Conv2d(k, 'same', bias) + PixelShuffle(ratio). NCHW in/out."""
    N, Cin, H, W = x_nchw.shape
    Cout = weight_oihw.shape[0]
    K = kernel_size
    P = K // 2
    r = ratio
    assert Cout % (r * r) == 0, "PixelShuffle needs Cout divisible by ratio**2"

    Hp, Wp = H + 2 * P, W + 2 * P
    Cout_p = ((Cout + LANES - 1) // LANES) * LANES      # lane-dense output channels
    M_out = H * Wp                                      # output rows per image (junk cols sliced later)

    # ---- host-side layout glue (no data inflation) ----
    # NCHW -> NHWC (channel-minor), bf16 MXU operand, 'same' spatial halo pad.
    x_nhwc = jnp.transpose(x_nchw, (0, 2, 3, 1)).astype(jnp.bfloat16)
    xp = jnp.pad(x_nhwc, ((0, 0), (P, P), (P, P), (0, 0)))          # (N, Hp, Wp, Cin)
    xf = xp.reshape(N, Hp * Wp, Cin)
    # Guard rows so every shifted slice of length H*Wp stays in-bounds; round
    # the row count up to a multiple of 8 for clean sublane tiles.
    rows = ((Hp * Wp + (K - 1) + 7) // 8) * 8
    xf = jnp.pad(xf, ((0, 0), (0, rows - Hp * Wp), (0, 0)))         # (N, rows, Cin)

    # Weights (O, I, Kh, Kw) -> (Kh, Kw, I, O_pad) bf16; bias -> (1, O_pad) f32.
    w = jnp.transpose(weight_oihw, (2, 3, 1, 0)).astype(jnp.bfloat16)
    w = jnp.pad(w, ((0, 0), (0, 0), (0, 0), (0, Cout_p - Cout)))
    b = jnp.pad(bias.astype(jnp.float32), (0, Cout_p - Cout)).reshape(1, Cout_p)

    # ---- fused conv kernel ----
    out_flat = pl.pallas_call(
        functools.partial(_conv_end_kernel, K=K, Wp=Wp),
        out_shape=jax.ShapeDtypeStruct((N, M_out, Cout_p), jnp.float32),
        grid_spec=pltpu.PrefetchScalarGridSpec(
            num_scalar_prefetch=0,
            grid=(N,),
            in_specs=[
                pl.BlockSpec((None, rows, Cin), lambda n: (n, 0, 0)),
                pl.BlockSpec((K, K, Cin, Cout_p), lambda n: (0, 0, 0, 0)),
                pl.BlockSpec((1, Cout_p), lambda n: (0, 0)),
            ],
            out_specs=pl.BlockSpec((None, M_out, Cout_p), lambda n: (n, 0, 0)),
            scratch_shapes=[pltpu.VMEM((M_out, Cout_p), jnp.float32)],
        ),
        compiler_params=pltpu.CompilerParams(
            dimension_semantics=("parallel",),
            vmem_limit_bytes=32 * 1024 * 1024,
        ),
    )(xf, w, b)                                          # (N, H*Wp, Cout_p) f32

    # Strip junk columns (w >= W) and lane padding; PixelShuffle in NHWC.
    conv_nhwc = out_flat.reshape(N, H, Wp, Cout_p)[:, :, :W, :Cout]  # (N, H, W, Cout)
    C = Cout // (r * r)
    y = conv_nhwc.reshape(N, H, W, C, r, r)
    y = jnp.transpose(y, (0, 1, 4, 2, 5, 3)).reshape(N, H * r, W * r, C)
    # Single final layout cut back to the PyTorch NCHW output layout.
    return jnp.transpose(y, (0, 3, 1, 2))


if __name__ == "__main__":
    # Small shapes consistent with the module; out_channels divisible by ratio**2.
    N, Cin, H, W = 2, 4, 16, 16
    Cout, K, ratio = 8, 5, 2

    key = jax.random.PRNGKey(0)
    kx, kw, kb = jax.random.split(key, 3)
    x = jax.random.normal(kx, (N, Cin, H, W), dtype=jnp.float32)
    weight = jax.random.normal(kw, (Cout, Cin, K, K), dtype=jnp.float32) * 0.1
    bias = jax.random.normal(kb, (Cout,), dtype=jnp.float32) * 0.1

    out = conv_end_forward(x, weight, bias, kernel_size=K, ratio=ratio)
    out = jax.block_until_ready(out)

    # Reference: same bf16 operands / f32 accumulation as the kernel (intentional
    # bf16 MXU inputs), then torch-style PixelShuffle in NCHW.
    conv_ref = lax.conv_general_dilated(
        x.astype(jnp.bfloat16), weight.astype(jnp.bfloat16),
        window_strides=(1, 1), padding="SAME",
        dimension_numbers=("NCHW", "OIHW", "NCHW"),
        preferred_element_type=jnp.float32,
    ) + bias[None, :, None, None]
    C = Cout // (ratio * ratio)
    ref = conv_ref.reshape(N, C, ratio, ratio, H, W)
    ref = jnp.transpose(ref, (0, 1, 4, 2, 5, 3)).reshape(N, C, H * ratio, W * ratio)

    assert out.shape == (N, C, H * ratio, W * ratio)
    assert jnp.allclose(out, ref, atol=1e-2, rtol=1e-2), "mismatch vs reference"

    print("KERNEL_OK")
</pallas_src>

<mosaic_0001>
module attributes {stable_mosaic.version = 11 : i64} {
  func.func @_conv_end_kernel(%arg0: i32, %arg1: memref<1x408x4xbf16, #tpu.memory_space<vmem>>, %arg2: memref<5x5x4x128xbf16, #tpu.memory_space<vmem>>, %arg3: memref<1x128xf32, #tpu.memory_space<vmem>>, %arg4: memref<1x320x128xf32, #tpu.memory_space<vmem>>, %arg5: memref<320x128xf32, #tpu.memory_space<vmem>>) attributes {dimension_semantics = [#tpu.dimension_semantics<parallel>], iteration_bounds = array<i64: 2>, scalar_prefetch = 0 : i64, scratch_operands = 1 : i64, tpu.core_type = #tpu.core_type<tc>, window_params = [{transform_indices = @transform_0, window_bounds = array<i64: 1, 408, 4>}, {pipeline_mode = #tpu.pipeline_mode<synchronous>, transform_indices = @transform_1, window_bounds = array<i64: 5, 5, 4, 128>}, {pipeline_mode = #tpu.pipeline_mode<synchronous>, transform_indices = @transform_2, window_bounds = array<i64: 1, 128>}, {transform_indices = @transform_3, window_bounds = array<i64: 1, 320, 128>}]} {
    %cst = arith.constant 0.000000e+00 : f32
    %0 = vector.broadcast %cst : f32 to vector<320x128xf32>
    %c0 = arith.constant 0 : index
    %c0_0 = arith.constant 0 : index
    %1 = vector.load %arg5[%c0, %c0_0] : memref<320x128xf32, #tpu.memory_space<vmem>>, vector<320x128xf32>
    tpu.vector_store %arg5[%c0, %c0_0], %0 {strides = array<i32>} : memref<320x128xf32, #tpu.memory_space<vmem>>, vector<320x128xf32>,
    %c0_1 = arith.constant 0 : index
    %c0_2 = arith.constant 0 : index
    %2 = vector.load %arg5[%c0_1, %c0_2] : memref<320x128xf32, #tpu.memory_space<vmem>>, vector<320x128xf32>
    %c0_3 = arith.constant 0 : index
    %c0_4 = arith.constant 0 : index
    %c0_5 = arith.constant 0 : index
    %3 = vector.load %arg1[%c0_3, %c0_4, %c0_5] : memref<1x408x4xbf16, #tpu.memory_space<vmem>>, vector<1x320x4xbf16>
    %4 = vector.shape_cast %3 : vector<1x320x4xbf16> to vector<320x4xbf16>
    %c0_6 = arith.constant 0 : index
    %c0_7 = arith.constant 0 : index
    %c0_8 = arith.constant 0 : index
    %c0_9 = arith.constant 0 : index
    %5 = vector.load %arg2[%c0_6, %c0_7, %c0_8, %c0_9] : memref<5x5x4x128xbf16, #tpu.memory_space<vmem>>, vector<1x1x4x128xbf16>
    %6 = vector.shape_cast %5 : vector<1x1x4x128xbf16> to vector<4x128xbf16>
    %cst_10 = arith.constant dense<0.000000e+00> : vector<320x128xf32>
    %7 = tpu.matmul %4, %6, %cst_10 {dimension_numbers = #tpu.dot_dimension_numbers<[1], [0], [0], [1], [0, 0, 1, 1], [], []>} : vector<320x4xbf16>, vector<4x128xbf16>, vector<320x128xf32> -> vector<320x128xf32>
    %8 = arith.addf %2, %7 : vector<320x128xf32>
    %c0_11 = arith.constant 0 : index
    %c0_12 = arith.constant 0 : index
    %9 = vector.load %arg5[%c0_11, %c0_12] : memref<320x128xf32, #tpu.memory_space<vmem>>, vector<320x128xf32>
    tpu.vector_store %arg5[%c0_11, %c0_12], %8 {strides = array<i32>} : memref<320x128xf32, #tpu.memory_space<vmem>>, vector<320x128xf32>,
    %c0_13 = arith.constant 0 : index
    %c0_14 = arith.constant 0 : index
    %10 = vector.load %arg5[%c0_13, %c0_14] : memref<320x128xf32, #tpu.memory_space<vmem>>, vector<320x128xf32>
    %c0_15 = arith.constant 0 : index
    %c1 = arith.constant 1 : index
    %c0_16 = arith.constant 0 : index
    %11 = vector.load %arg1[%c0_15, %c1, %c0_16] : memref<1x408x4xbf16, #tpu.memory_space<vmem>>, vector<1x320x4xbf16>
    %12 = vector.shape_cast %11 : vector<1x320x4xbf16> to vector<320x4xbf16>
    %c0_17 = arith.constant 0 : index
    %c1_18 = arith.constant 1 : index
    %c0_19 = arith.constant 0 : index
    %c0_20 = arith.constant 0 : index
    %13 = vector.load %arg2[%c0_17, %c1_18, %c0_19, %c0_20] : memref<5x5x4x128xbf16, #tpu.memory_space<vmem>>, vector<1x1x4x128xbf16>
    %14 = vector.shape_cast %13 : vector<1x1x4x128xbf16> to vector<4x128xbf16>
    %cst_21 = arith.constant dense<0.000000e+00> : vector<320x128xf32>
    %15 = tpu.matmul %12, %14, %cst_21 {dimension_numbers = #tpu.dot_dimension_numbers<[1], [0], [0], [1], [0, 0, 1, 1], [], []>} : vector<320x4xbf16>, vector<4x128xbf16>, vector<320x128xf32> -> vector<320x128xf32>
    %16 = arith.addf %10, %15 : vector<320x128xf32>
    %c0_22 = arith.constant 0 : index
    %c0_23 = arith.constant 0 : index
    %17 = vector.load %arg5[%c0_22, %c0_23] : memref<320x128xf32, #tpu.memory_space<vmem>>, vector<320x128xf32>
    tpu.vector_store %arg5[%c0_22, %c0_23], %16 {strides = array<i32>} : memref<320x128xf32, #tpu.memory_space<vmem>>, vector<320x128xf32>,
    %c0_24 = arith.constant 0 : index
    %c0_25 = arith.constant 0 : index
    %18 = vector.load %arg5[%c0_24, %c0_25] : memref<320x128xf32, #tpu.memory_space<vmem>>, vector<320x128xf32>
    %c0_26 = arith.constant 0 : index
    %c2 = arith.constant 2 : index
    %c0_27 = arith.constant 0 : index
    %19 = vector.load %arg1[%c0_26, %c2, %c0_27] : memref<1x408x4xbf16, #tpu.memory_space<vmem>>, vector<1x320x4xbf16>
    %20 = vector.shape_cast %19 : vector<1x320x4xbf16> to vector<320x4xbf16>
    %c0_28 = arith.constant 0 : index
    %c2_29 = arith.constant 2 : index
    %c0_30 = arith.constant 0 : index
    %c0_31 = arith.constant 0 : index
    %21 = vector.load %arg2[%c0_28, %c2_29, %c0_30, %c0_31] : memref<5x5x4x128xbf16, #tpu.memory_space<vmem>>, vector<1x1x4x128xbf16>
    %22 = vector.shape_cast %21 : vector<1x1x4x128xbf16> to vector<4x128xbf16>
    %cst_32 = arith.constant dense<0.000000e+00> : vector<320x128xf32>
    %23 = tpu.matmul %20, %22, %cst_32 {dimension_numbers = #tpu.dot_dimension_numbers<[1], [0], [0], [1], [0, 0, 1, 1], [], []>} : vector<320x4xbf16>, vector<4x128xbf16>, vector<320x128xf32> -> vector<320x128xf32>
    %24 = arith.addf %18, %23 : vector<320x128xf32>
    %c0_33 = arith.constant 0 : index
    %c0_34 = arith.constant 0 : index
    %25 = vector.load %arg5[%c0_33, %c0_34] : memref<320x128xf32, #tpu.memory_space<vmem>>, vector<320x128xf32>
    tpu.vector_store %arg5[%c0_33, %c0_34], %24 {strides = array<i32>} : memref<320x128xf32, #tpu.memory_space<vmem>>, vector<320x128xf32>,
    %c0_35 = arith.constant 0 : index
    %c0_36 = arith.constant 0 : index
    %26 = vector.load %arg5[%c0_35, %c0_36] : memref<320x128xf32, #tpu.memory_space<vmem>>, vector<320x128xf32>
    %c0_37 = arith.constant 0 : index
    %c3 = arith.constant 3 : index
    %c0_38 = arith.constant 0 : index
    %27 = vector.load %arg1[%c0_37, %c3, %c0_38] : memref<1x408x4xbf16, #tpu.memory_space<vmem>>, vector<1x320x4xbf16>
    %28 = vector.shape_cast %27 : vector<1x320x4xbf16> to vector<320x4xbf16>
    %c0_39 = arith.constant 0 : index
    %c3_40 = arith.constant 3 : index
    %c0_41 = arith.constant 0 : index
    %c0_42 = arith.constant 0 : index
    %29 = vector.load %arg2[%c0_39, %c3_40, %c0_41, %c0_42] : memref<5x5x4x128xbf16, #tpu.memory_space<vmem>>, vector<1x1x4x128xbf16>
    %30 = vector.shape_cast %29 : vector<1x1x4x128xbf16> to vector<4x128xbf16>
    %cst_43 = arith.constant dense<0.000000e+00> : vector<320x128xf32>
    %31 = tpu.matmul %28, %30, %cst_43 {dimension_numbers = #tpu.dot_dimension_numbers<[1], [0], [0], [1], [0, 0, 1, 1], [], []>} : vector<320x4xbf16>, vector<4x128xbf16>, vector<320x128xf32> -> vector<320x128xf32>
    %32 = arith.addf %26, %31 : vector<320x128xf32>
    %c0_44 = arith.constant 0 : index
    %c0_45 = arith.constant 0 : index
    %33 = vector.load %arg5[%c0_44, %c0_45] : memref<320x128xf32, #tpu.memory_space<vmem>>, vector<320x128xf32>
    tpu.vector_store %arg5[%c0_44, %c0_45], %32 {strides = array<i32>} : memref<320x128xf32, #tpu.memory_space<vmem>>, vector<320x128xf32>,
    %c0_46 = arith.constant 0 : index
    %c0_47 = arith.constant 0 : index
    %34 = vector.load %arg5[%c0_46, %c0_47] : memref<320x128xf32, #tpu.memory_space<vmem>>, vector<320x128xf32>
    %c0_48 = arith.constant 0 : index
    %c4 = arith.constant 4 : index
    %c0_49 = arith.constant 0 : index
    %35 = vector.load %arg1[%c0_48, %c4, %c0_49] : memref<1x408x4xbf16, #tpu.memory_space<vmem>>, vector<1x320x4xbf16>
    %36 = vector.shape_cast %35 : vector<1x320x4xbf16> to vector<320x4xbf16>
    %c0_50 = arith.constant 0 : index
    %c4_51 = arith.constant 4 : index
    %c0_52 = arith.constant 0 : index
    %c0_53 = arith.constant 0 : index
    %37 = vector.load %arg2[%c0_50, %c4_51, %c0_52, %c0_53] : memref<5x5x4x128xbf16, #tpu.memory_space<vmem>>, vector<1x1x4x128xbf16>
    %38 = vector.shape_cast %37 : vector<1x1x4x128xbf16> to vector<4x128xbf16>
    %cst_54 = arith.constant dense<0.000000e+00> : vector<320x128xf32>
    %39 = tpu.matmul %36, %38, %cst_54 {dimension_numbers = #tpu.dot_dimension_numbers<[1], [0], [0], [1], [0, 0, 1, 1], [], []>} : vector<320x4xbf16>, vector<4x128xbf16>, vector<320x128xf32> -> vector<320x128xf32>
    %40 = arith.addf %34, %39 : vector<320x128xf32>
    %c0_55 = arith.constant 0 : index
    %c0_56 = arith.constant 0 : index
    %41 = vector.load %arg5[%c0_55, %c0_56] : memref<320x128xf32, #tpu.memory_space<vmem>>, vector<320x128xf32>
    tpu.vector_store %arg5[%c0_55, %c0_56], %40 {strides = array<i32>} : memref<320x128xf32, #tpu.memory_space<vmem>>, vector<320x128xf32>,
    %c0_57 = arith.constant 0 : index
    %c0_58 = arith.constant 0 : index
    %42 = vector.load %arg5[%c0_57, %c0_58] : memref<320x128xf32, #tpu.memory_space<vmem>>, vector<320x128xf32>
    %c0_59 = arith.constant 0 : index
    %c20 = arith.constant 20 : index
    %c0_60 = arith.constant 0 : index
    %43 = vector.load %arg1[%c0_59, %c20, %c0_60] : memref<1x408x4xbf16, #tpu.memory_space<vmem>>, vector<1x320x4xbf16>
    %44 = vector.shape_cast %43 : vector<1x320x4xbf16> to vector<320x4xbf16>
    %c1_61 = arith.constant 1 : index
    %c0_62 = arith.constant 0 : index
    %c0_63 = arith.constant 0 : index
    %c0_64 = arith.constant 0 : index
    %45 = vector.load %arg2[%c1_61, %c0_62, %c0_63, %c0_64] : memref<5x5x4x128xbf16, #tpu.memory_space<vmem>>, vector<1x1x4x128xbf16>
    %46 = vector.shape_cast %45 : vector<1x1x4x128xbf16> to vector<4x128xbf16>
    %cst_65 = arith.constant dense<0.000000e+00> : vector<320x128xf32>
    %47 = tpu.matmul %44, %46, %cst_65 {dimension_numbers = #tpu.dot_dimension_numbers<[1], [0], [0], [1], [0, 0, 1, 1], [], []>} : vector<320x4xbf16>, vector<4x128xbf16>, vector<320x128xf32> -> vector<320x128xf32>
    %48 = arith.addf %42, %47 : vector<320x128xf32>
    %c0_66 = arith.constant 0 : index
    %c0_67 = arith.constant 0 : index
    %49 = vector.load %arg5[%c0_66, %c0_67] : memref<320x128xf32, #tpu.memory_space<vmem>>, vector<320x128xf32>
    tpu.vector_store %arg5[%c0_66, %c0_67], %48 {strides = array<i32>} : memref<320x128xf32, #tpu.memory_space<vmem>>, vector<320x128xf32>,
    %c0_68 = arith.constant 0 : index
    %c0_69 = arith.constant 0 : index
    %50 = vector.load %arg5[%c0_68, %c0_69] : memref<320x128xf32, #tpu.memory_space<vmem>>, vector<320x128xf32>
    %c0_70 = arith.constant 0 : index
    %c21 = arith.constant 21 : index
    %c0_71 = arith.constant 0 : index
    %51 = vector.load %arg1[%c0_70, %c21, %c0_71] : memref<1x408x4xbf16, #tpu.memory_space<vmem>>, vector<1x320x4xbf16>
    %52 = vector.shape_cast %51 : vector<1x320x4xbf16> to vector<320x4xbf16>
    %c1_72 = arith.constant 1 : index
    %c1_73 = arith.constant 1 : index
    %c0_74 = arith.constant 0 : index
    %c0_75 = arith.constant 0 : index
    %53 = vector.load %arg2[%c1_72, %c1_73, %c0_74, %c0_75] : memref<5x5x4x128xbf16, #tpu.memory_space<vmem>>, vector<1x1x4x128xbf16>
    %54 = vector.shape_cast %53 : vector<1x1x4x128xbf16> to vector<4x128xbf16>
    %cst_76 = arith.constant dense<0.000000e+00> : vector<320x128xf32>
    %55 = tpu.matmul %52, %54, %cst_76 {dimension_numbers = #tpu.dot_dimension_numbers<[1], [0], [0], [1], [0, 0, 1, 1], [], []>} : vector<320x4xbf16>, vector<4x128xbf16>, vector<320x128xf32> -> vector<320x128xf32>
    %56 = arith.addf %50, %55 : vector<320x128xf32>
    %c0_77 = arith.constant 0 : index
    %c0_78 = arith.constant 0 : index
    %57 = vector.load %arg5[%c0_77, %c0_78] : memref<320x128xf32, #tpu.memory_space<vmem>>, vector<320x128xf32>
    tpu.vector_store %arg5[%c0_77, %c0_78], %56 {strides = array<i32>} : memref<320x128xf32, #tpu.memory_space<vmem>>, vector<320x128xf32>,
    %c0_79 = arith.constant 0 : index
    %c0_80 = arith.constant 0 : index
    %58 = vector.load %arg5[%c0_79, %c0_80] : memref<320x128xf32, #tpu.memory_space<vmem>>, vector<320x128xf32>
    %c0_81 = arith.constant 0 : index
    %c22 = arith.constant 22 : index
    %c0_82 = arith.constant 0 : index
    %59 = vector.load %arg1[%c0_81, %c22, %c0_82] : memref<1x408x4xbf16, #tpu.memory_space<vmem>>, vector<1x320x4xbf16>
    %60 = vector.shape_cast %59 : vector<1x320x4xbf16> to vector<320x4xbf16>
    %c1_83 = arith.constant 1 : index
    %c2_84 = arith.constant 2 : index
    %c0_85 = arith.constant 0 : index
    %c0_86 = arith.constant 0 : index
    %61 = vector.load %arg2[%c1_83, %c2_84, %c0_85, %c0_86] : memref<5x5x4x128xbf16, #tpu.memory_space<vmem>>, vector<1x1x4x128xbf16>
    %62 = vector.shape_cast %61 : vector<1x1x4x128xbf16> to vector<4x128xbf16>
    %cst_87 = arith.constant dense<0.000000e+00> : vector<320x128xf32>
    %63 = tpu.matmul %60, %62, %cst_87 {dimension_numbers = #tpu.dot_dimension_numbers<[1], [0], [0], [1], [0, 0, 1, 1], [], []>} : vector<320x4xbf16>, vector<4x128xbf16>, vector<320x128xf32> -> vector<320x128xf32>
    %64 = arith.addf %58, %63 : vector<320x128xf32>
    %c0_88 = arith.constant 0 : index
    %c0_89 = arith.constant 0 : index
    %65 = vector.load %arg5[%c0_88, %c0_89] : memref<320x128xf32, #tpu.memory_space<vmem>>, vector<320x128xf32>
    tpu.vector_store %arg5[%c0_88, %c0_89], %64 {strides = array<i32>} : memref<320x128xf32, #tpu.memory_space<vmem>>, vector<320x128xf32>,
    %c0_90 = arith.constant 0 : index
    %c0_91 = arith.constant 0 : index
    %66 = vector.load %arg5[%c0_90, %c0_91] : memref<320x128xf32, #tpu.memory_space<vmem>>, vector<320x128xf32>
    %c0_92 = arith.constant 0 : index
    %c23 = arith.constant 23 : index
    %c0_93 = arith.constant 0 : index
    %67 = vector.load %arg1[%c0_92, %c23, %c0_93] : memref<1x408x4xbf16, #tpu.memory_space<vmem>>, vector<1x320x4xbf16>
    %68 = vector.shape_cast %67 : vector<1x320x4xbf16> to vector<320x4xbf16>
    %c1_94 = arith.constant 1 : index
    %c3_95 = arith.constant 3 : index
    %c0_96 = arith.constant 0 : index
    %c0_97 = arith.constant 0 : index
    %69 = vector.load %arg2[%c1_94, %c3_95, %c0_96, %c0_97] : memref<5x5x4x128xbf16, #tpu.memory_space<vmem>>, vector<1x1x4x128xbf16>
    %70 = vector.shape_cast %69 : vector<1x1x4x128xbf16> to vector<4x128xbf16>
    %cst_98 = arith.constant dense<0.000000e+00> : vector<320x128xf32>
    %71 = tpu.matmul %68, %70, %cst_98 {dimension_numbers = #tpu.dot_dimension_numbers<[1], [0], [0], [1], [0, 0, 1, 1], [], []>} : vector<320x4xbf16>, vector<4x128xbf16>, vector<320x128xf32> -> vector<320x128xf32>
    %72 = arith.addf %66, %71 : vector<320x128xf32>
    %c0_99 = arith.constant 0 : index
    %c0_100 = arith.constant 0 : index
    %73 = vector.load %arg5[%c0_99, %c0_100] : memref<320x128xf32, #tpu.memory_space<vmem>>, vector<320x128xf32>
    tpu.vector_store %arg5[%c0_99, %c0_100], %72 {strides = array<i32>} : memref<320x128xf32, #tpu.memory_space<vmem>>, vector<320x128xf32>,
    %c0_101 = arith.constant 0 : index
    %c0_102 = arith.constant 0 : index
    %74 = vector.load %arg5[%c0_101, %c0_102] : memref<320x128xf32, #tpu.memory_space<vmem>>, vector<320x128xf32>
    %c0_103 = arith.constant 0 : index
    %c24 = arith.constant 24 : index
    %c0_104 = arith.constant 0 : index
    %75 = vector.load %arg1[%c0_103, %c24, %c0_104] : memref<1x408x4xbf16, #tpu.memory_space<vmem>>, vector<1x320x4xbf16>
    %76 = vector.shape_cast %75 : vector<1x320x4xbf16> to vector<320x4xbf16>
    %c1_105 = arith.constant 1 : index
    %c4_106 = arith.constant 4 : index
    %c0_107 = arith.constant 0 : index
    %c0_108 = arith.constant 0 : index
    %77 = vector.load %arg2[%c1_105, %c4_106, %c0_107, %c0_108] : memref<5x5x4x128xbf16, #tpu.memory_space<vmem>>, vector<1x1x4x128xbf16>
    %78 = vector.shape_cast %77 : vector<1x1x4x128xbf16> to vector<4x128xbf16>
    %cst_109 = arith.constant dense<0.000000e+00> : vector<320x128xf32>
    %79 = tpu.matmul %76, %78, %cst_109 {dimension_numbers = #tpu.dot_dimension_numbers<[1], [0], [0], [1], [0, 0, 1, 1], [], []>} : vector<320x4xbf16>, vector<4x128xbf16>, vector<320x128xf32> -> vector<320x128xf32>
    %80 = arith.addf %74, %79 : vector<320x128xf32>
    %c0_110 = arith.constant 0 : index
    %c0_111 = arith.constant 0 : index
    %81 = vector.load %arg5[%c0_110, %c0_111] : memref<320x128xf32, #tpu.memory_space<vmem>>, vector<320x128xf32>
    tpu.vector_store %arg5[%c0_110, %c0_111], %80 {strides = array<i32>} : memref<320x128xf32, #tpu.memory_space<vmem>>, vector<320x128xf32>,
    %c0_112 = arith.constant 0 : index
    %c0_113 = arith.constant 0 : index
    %82 = vector.load %arg5[%c0_112, %c0_113] : memref<320x128xf32, #tpu.memory_space<vmem>>, vector<320x128xf32>
    %c0_114 = arith.constant 0 : index
    %c40 = arith.constant 40 : index
    %c0_115 = arith.constant 0 : index
    %83 = vector.load %arg1[%c0_114, %c40, %c0_115] : memref<1x408x4xbf16, #tpu.memory_space<vmem>>, vector<1x320x4xbf16>
    %84 = vector.shape_cast %83 : vector<1x320x4xbf16> to vector<320x4xbf16>
    %c2_116 = arith.constant 2 : index
    %c0_117 = arith.constant 0 : index
    %c0_118 = arith.constant 0 : index
    %c0_119 = arith.constant 0 : index
    %85 = vector.load %arg2[%c2_116, %c0_117, %c0_118, %c0_119] : memref<5x5x4x128xbf16, #tpu.memory_space<vmem>>, vector<1x1x4x128xbf16>
    %86 = vector.shape_cast %85 : vector<1x1x4x128xbf16> to vector<4x128xbf16>
    %cst_120 = arith.constant dense<0.000000e+00> : vector<320x128xf32>
    %87 = tpu.matmul %84, %86, %cst_120 {dimension_numbers = #tpu.dot_dimension_numbers<[1], [0], [0], [1], [0, 0, 1, 1], [], []>} : vector<320x4xbf16>, vector<4x128xbf16>, vector<320x128xf32> -> vector<320x128xf32>
    %88 = arith.addf %82, %87 : vector<320x128xf32>
    %c0_121 = arith.constant 0 : index
    %c0_122 = arith.constant 0 : index
    %89 = vector.load %arg5[%c0_121, %c0_122] : memref<320x128xf32, #tpu.memory_space<vmem>>, vector<320x128xf32>
    tpu.vector_store %arg5[%c0_121, %c0_122], %88 {strides = array<i32>} : memref<320x128xf32, #tpu.memory_space<vmem>>, vector<320x128xf32>,
    %c0_123 = arith.constant 0 : index
    %c0_124 = arith.constant 0 : index
    %90 = vector.load %arg5[%c0_123, %c0_124] : memref<320x128xf32, #tpu.memory_space<vmem>>, vector<320x128xf32>
    %c0_125 = arith.constant 0 : index
    %c41 = arith.constant 41 : index
    %c0_126 = arith.constant 0 : index
    %91 = vector.load %arg1[%c0_125, %c41, %c0_126] : memref<1x408x4xbf16, #tpu.memory_space<vmem>>, vector<1x320x4xbf16>
    %92 = vector.shape_cast %91 : vector<1x320x4xbf16> to vector<320x4xbf16>
    %c2_127 = arith.constant 2 : index
    %c1_128 = arith.constant 1 : index
    %c0_129 = arith.constant 0 : index
    %c0_130 = arith.constant 0 : index
    %93 = vector.load %arg2[%c2_127, %c1_128, %c0_129, %c0_130] : memref<5x5x4x128xbf16, #tpu.memory_space<vmem>>, vector<1x1x4x128xbf16>
    %94 = vector.shape_cast %93 : vector<1x1x4x128xbf16> to vector<4x128xbf16>
    %cst_131 = arith.constant dense<0.000000e+00> : vector<320x128xf32>
    %95 = tpu.matmul %92, %94, %cst_131 {dimension_numbers = #tpu.dot_dimension_numbers<[1], [0], [0], [1], [0, 0, 1, 1], [], []>} : vector<320x4xbf16>, vector<4x128xbf16>, vector<320x128xf32> -> vector<320x128xf32>
    %96 = arith.addf %90, %95 : vector<320x128xf32>
    %c0_132 = arith.constant 0 : index
    %c0_133 = arith.constant 0 : index
    %97 = vector.load %arg5[%c0_132, %c0_133] : memref<320x128xf32, #tpu.memory_space<vmem>>, vector<320x128xf32>
    tpu.vector_store %arg5[%c0_132, %c0_133], %96 {strides = array<i32>} : memref<320x128xf32, #tpu.memory_space<vmem>>, vector<320x128xf32>,
    %c0_134 = arith.constant 0 : index
    %c0_135 = arith.constant 0 : index
    %98 = vector.load %arg5[%c0_134, %c0_135] : memref<320x128xf32, #tpu.memory_space<vmem>>, vector<320x128xf32>
    %c0_136 = arith.constant 0 : index
    %c42 = arith.constant 42 : index
    %c0_137 = arith.constant 0 : index
    %99 = vector.load %arg1[%c0_136, %c42, %c0_137] : memref<1x408x4xbf16, #tpu.memory_space<vmem>>, vector<1x320x4xbf16>
    %100 = vector.shape_cast %99 : vector<1x320x4xbf16> to vector<320x4xbf16>
    %c2_138 = arith.constant 2 : index
    %c2_139 = arith.constant 2 : index
    %c0_140 = arith.constant 0 : index
    %c0_141 = arith.constant 0 : index
    %101 = vector.load %arg2[%c2_138, %c2_139, %c0_140, %c0_141] : memref<5x5x4x128xbf16, #tpu.memory_space<vmem>>, vector<1x1x4x128xbf16>
    %102 = vector.shape_cast %101 : vector<1x1x4x128xbf16> to vector<4x128xbf16>
    %cst_142 = arith.constant dense<0.000000e+00> : vector<320x128xf32>
    %103 = tpu.matmul %100, %102, %cst_142 {dimension_numbers = #tpu.dot_dimension_numbers<[1], [0], [0], [1], [0, 0, 1, 1], [], []>} : vector<320x4xbf16>, vector<4x128xbf16>, vector<320x128xf32> -> vector<320x128xf32>
    %104 = arith.addf %98, %103 : vector<320x128xf32>
    %c0_143 = arith.constant 0 : index
    %c0_144 = arith.constant 0 : index
    %105 = vector.load %arg5[%c0_143, %c0_144] : memref<320x128xf32, #tpu.memory_space<vmem>>, vector<320x128xf32>
    tpu.vector_store %arg5[%c0_143, %c0_144], %104 {strides = array<i32>} : memref<320x128xf32, #tpu.memory_space<vmem>>, vector<320x128xf32>,
    %c0_145 = arith.constant 0 : index
    %c0_146 = arith.constant 0 : index
    %106 = vector.load %arg5[%c0_145, %c0_146] : memref<320x128xf32, #tpu.memory_space<vmem>>, vector<320x128xf32>
    %c0_147 = arith.constant 0 : index
    %c43 = arith.constant 43 : index
    %c0_148 = arith.constant 0 : index
    %107 = vector.load %arg1[%c0_147, %c43, %c0_148] : memref<1x408x4xbf16, #tpu.memory_space<vmem>>, vector<1x320x4xbf16>
    %108 = vector.shape_cast %107 : vector<1x320x4xbf16> to vector<320x4xbf16>
    %c2_149 = arith.constant 2 : index
    %c3_150 = arith.constant 3 : index
    %c0_151 = arith.constant 0 : index
    %c0_152 = arith.constant 0 : index
    %109 = vector.load %arg2[%c2_149, %c3_150, %c0_151, %c0_152] : memref<5x5x4x128xbf16, #tpu.memory_space<vmem>>, vector<1x1x4x128xbf16>
    %110 = vector.shape_cast %109 : vector<1x1x4x128xbf16> to vector<4x128xbf16>
    %cst_153 = arith.constant dense<0.000000e+00> : vector<320x128xf32>
    %111 = tpu.matmul %108, %110, %cst_153 {dimension_numbers = #tpu.dot_dimension_numbers<[1], [0], [0], [1], [0, 0, 1, 1], [], []>} : vector<320x4xbf16>, vector<4x128xbf16>, vector<320x128xf32> -> vector<320x128xf32>
    %112 = arith.addf %106, %111 : vector<320x128xf32>
    %c0_154 = arith.constant 0 : index
    %c0_155 = arith.constant 0 : index
    %113 = vector.load %arg5[%c0_154, %c0_155] : memref<320x128xf32, #tpu.memory_space<vmem>>, vector<320x128xf32>
    tpu.vector_store %arg5[%c0_154, %c0_155], %112 {strides = array<i32>} : memref<320x128xf32, #tpu.memory_space<vmem>>, vector<320x128xf32>,
    %c0_156 = arith.constant 0 : index
    %c0_157 = arith.constant 0 : index
    %114 = vector.load %arg5[%c0_156, %c0_157] : memref<320x128xf32, #tpu.memory_space<vmem>>, vector<320x128xf32>
    %c0_158 = arith.constant 0 : index
    %c44 = arith.constant 44 : index
    %c0_159 = arith.constant 0 : index
    %115 = vector.load %arg1[%c0_158, %c44, %c0_159] : memref<1x408x4xbf16, #tpu.memory_space<vmem>>, vector<1x320x4xbf16>
    %116 = vector.shape_cast %115 : vector<1x320x4xbf16> to vector<320x4xbf16>
    %c2_160 = arith.constant 2 : index
    %c4_161 = arith.constant 4 : index
    %c0_162 = arith.constant 0 : index
    %c0_163 = arith.constant 0 : index
    %117 = vector.load %arg2[%c2_160, %c4_161, %c0_162, %c0_163] : memref<5x5x4x128xbf16, #tpu.memory_space<vmem>>, vector<1x1x4x128xbf16>
    %118 = vector.shape_cast %117 : vector<1x1x4x128xbf16> to vector<4x128xbf16>
    %cst_164 = arith.constant dense<0.000000e+00> : vector<320x128xf32>
    %119 = tpu.matmul %116, %118, %cst_164 {dimension_numbers = #tpu.dot_dimension_numbers<[1], [0], [0], [1], [0, 0, 1, 1], [], []>} : vector<320x4xbf16>, vector<4x128xbf16>, vector<320x128xf32> -> vector<320x128xf32>
    %120 = arith.addf %114, %119 : vector<320x128xf32>
    %c0_165 = arith.constant 0 : index
    %c0_166 = arith.constant 0 : index
    %121 = vector.load %arg5[%c0_165, %c0_166] : memref<320x128xf32, #tpu.memory_space<vmem>>, vector<320x128xf32>
    tpu.vector_store %arg5[%c0_165, %c0_166], %120 {strides = array<i32>} : memref<320x128xf32, #tpu.memory_space<vmem>>, vector<320x128xf32>,
    %c0_167 = arith.constant 0 : index
    %c0_168 = arith.constant 0 : index
    %122 = vector.load %arg5[%c0_167, %c0_168] : memref<320x128xf32, #tpu.memory_space<vmem>>, vector<320x128xf32>
    %c0_169 = arith.constant 0 : index
    %c60 = arith.constant 60 : index
    %c0_170 = arith.constant 0 : index
    %123 = vector.load %arg1[%c0_169, %c60, %c0_170] : memref<1x408x4xbf16, #tpu.memory_space<vmem>>, vector<1x320x4xbf16>
    %124 = vector.shape_cast %123 : vector<1x320x4xbf16> to vector<320x4xbf16>
    %c3_171 = arith.constant 3 : index
    %c0_172 = arith.constant 0 : index
    %c0_173 = arith.constant 0 : index
    %c0_174 = arith.constant 0 : index
    %125 = vector.load %arg2[%c3_171, %c0_172, %c0_173, %c0_174] : memref<5x5x4x128xbf16, #tpu.memory_space<vmem>>, vector<1x1x4x128xbf16>
    %126 = vector.shape_cast %125 : vector<1x1x4x128xbf16> to vector<4x128xbf16>
    %cst_175 = arith.constant dense<0.000000e+00> : vector<320x128xf32>
    %127 = tpu.matmul %124, %126, %cst_175 {dimension_numbers = #tpu.dot_dimension_numbers<[1], [0], [0], [1], [0, 0, 1, 1], [], []>} : vector<320x4xbf16>, vector<4x128xbf16>, vector<320x128xf32> -> vector<320x128xf32>
    %128 = arith.addf %122, %127 : vector<320x128xf32>
    %c0_176 = arith.constant 0 : index
    %c0_177 = arith.constant 0 : index
    %129 = vector.load %arg5[%c0_176, %c0_177] : memref<320x128xf32, #tpu.memory_space<vmem>>, vector<320x128xf32>
    tpu.vector_store %arg5[%c0_176, %c0_177], %128 {strides = array<i32>} : memref<320x128xf32, #tpu.memory_space<vmem>>, vector<320x128xf32>,
    %c0_178 = arith.constant 0 : index
    %c0_179 = arith.constant 0 : index
    %130 = vector.load %arg5[%c0_178, %c0_179] : memref<320x128xf32, #tpu.memory_space<vmem>>, vector<320x128xf32>
    %c0_180 = arith.constant 0 : index
    %c61 = arith.constant 61 : index
    %c0_181 = arith.constant 0 : index
    %131 = vector.load %arg1[%c0_180, %c61, %c0_181] : memref<1x408x4xbf16, #tpu.memory_space<vmem>>, vector<1x320x4xbf16>
    %132 = vector.shape_cast %131 : vector<1x320x4xbf16> to vector<320x4xbf16>
    %c3_182 = arith.constant 3 : index
    %c1_183 = arith.constant 1 : index
    %c0_184 = arith.constant 0 : index
    %c0_185 = arith.constant 0 : index
    %133 = vector.load %arg2[%c3_182, %c1_183, %c0_184, %c0_185] : memref<5x5x4x128xbf16, #tpu.memory_space<vmem>>, vector<1x1x4x128xbf16>
    %134 = vector.shape_cast %133 : vector<1x1x4x128xbf16> to vector<4x128xbf16>
    %cst_186 = arith.constant dense<0.000000e+00> : vector<320x128xf32>
    %135 = tpu.matmul %132, %134, %cst_186 {dimension_numbers = #tpu.dot_dimension_numbers<[1], [0], [0], [1], [0, 0, 1, 1], [], []>} : vector<320x4xbf16>, vector<4x128xbf16>, vector<320x128xf32> -> vector<320x128xf32>
    %136 = arith.addf %130, %135 : vector<320x128xf32>
    %c0_187 = arith.constant 0 : index
    %c0_188 = arith.constant 0 : index
    %137 = vector.load %arg5[%c0_187, %c0_188] : memref<320x128xf32, #tpu.memory_space<vmem>>, vector<320x128xf32>
    tpu.vector_store %arg5[%c0_187, %c0_188], %136 {strides = array<i32>} : memref<320x128xf32, #tpu.memory_space<vmem>>, vector<320x128xf32>,
    %c0_189 = arith.constant 0 : index
    %c0_190 = arith.constant 0 : index
    %138 = vector.load %arg5[%c0_189, %c0_190] : memref<320x128xf32, #tpu.memory_space<vmem>>, vector<320x128xf32>
    %c0_191 = arith.constant 0 : index
    %c62 = arith.constant 62 : index
    %c0_192 = arith.constant 0 : index
    %139 = vector.load %arg1[%c0_191, %c62, %c0_192] : memref<1x408x4xbf16, #tpu.memory_space<vmem>>, vector<1x320x4xbf16>
    %140 = vector.shape_cast %139 : vector<1x320x4xbf16> to vector<320x4xbf16>
    %c3_193 = arith.constant 3 : index
    %c2_194 = arith.constant 2 : index
    %c0_195 = arith.constant 0 : index
    %c0_196 = arith.constant 0 : index
    %141 = vector.load %arg2[%c3_193, %c2_194, %c0_195, %c0_196] : memref<5x5x4x128xbf16, #tpu.memory_space<vmem>>, vector<1x1x4x128xbf16>
    %142 = vector.shape_cast %141 : vector<1x1x4x128xbf16> to vector<4x128xbf16>
    %cst_197 = arith.constant dense<0.000000e+00> : vector<320x128xf32>
    %143 = tpu.matmul %140, %142, %cst_197 {dimension_numbers = #tpu.dot_dimension_numbers<[1], [0], [0], [1], [0, 0, 1, 1], [], []>} : vector<320x4xbf16>, vector<4x128xbf16>, vector<320x128xf32> -> vector<320x128xf32>
    %144 = arith.addf %138, %143 : vector<320x128xf32>
    %c0_198 = arith.constant 0 : index
    %c0_199 = arith.constant 0 : index
    %145 = vector.load %arg5[%c0_198, %c0_199] : memref<320x128xf32, #tpu.memory_space<vmem>>, vector<320x128xf32>
    tpu.vector_store %arg5[%c0_198, %c0_199], %144 {strides = array<i32>} : memref<320x128xf32, #tpu.memory_space<vmem>>, vector<320x128xf32>,
    %c0_200 = arith.constant 0 : index
    %c0_201 = arith.constant 0 : index
    %146 = vector.load %arg5[%c0_200, %c0_201] : memref<320x128xf32, #tpu.memory_space<vmem>>, vector<320x128xf32>
    %c0_202 = arith.constant 0 : index
    %c63 = arith.constant 63 : index
    %c0_203 = arith.constant 0 : index
    %147 = vector.load %arg1[%c0_202, %c63, %c0_203] : memref<1x408x4xbf16, #tpu.memory_space<vmem>>, vector<1x320x4xbf16>
    %148 = vector.shape_cast %147 : vector<1x320x4xbf16> to vector<320x4xbf16>
    %c3_204 = arith.constant 3 : index
    %c3_205 = arith.constant 3 : index
    %c0_206 = arith.constant 0 : index
    %c0_207 = arith.constant 0 : index
    %149 = vector.load %arg2[%c3_204, %c3_205, %c0_206, %c0_207] : memref<5x5x4x128xbf16, #tpu.memory_space<vmem>>, vector<1x1x4x128xbf16>
    %150 = vector.shape_cast %149 : vector<1x1x4x128xbf16> to vector<4x128xbf16>
    %cst_208 = arith.constant dense<0.000000e+00> : vector<320x128xf32>
    %151 = tpu.matmul %148, %150, %cst_208 {dimension_numbers = #tpu.dot_dimension_numbers<[1], [0], [0], [1], [0, 0, 1, 1], [], []>} : vector<320x4xbf16>, vector<4x128xbf16>, vector<320x128xf32> -> vector<320x128xf32>
    %152 = arith.addf %146, %151 : vector<320x128xf32>
    %c0_209 = arith.constant 0 : index
    %c0_210 = arith.constant 0 : index
    %153 = vector.load %arg5[%c0_209, %c0_210] : memref<320x128xf32, #tpu.memory_space<vmem>>, vector<320x128xf32>
    tpu.vector_store %arg5[%c0_209, %c0_210], %152 {strides = array<i32>} : memref<320x128xf32, #tpu.memory_space<vmem>>, vector<320x128xf32>,
    %c0_211 = arith.constant 0 : index
    %c0_212 = arith.constant 0 : index
    %154 = vector.load %arg5[%c0_211, %c0_212] : memref<320x128xf32, #tpu.memory_space<vmem>>, vector<320x128xf32>
    %c0_213 = arith.constant 0 : index
    %c64 = arith.constant 64 : index
    %c0_214 = arith.constant 0 : index
    %155 = vector.load %arg1[%c0_213, %c64, %c0_214] : memref<1x408x4xbf16, #tpu.memory_space<vmem>>, vector<1x320x4xbf16>
    %156 = vector.shape_cast %155 : vector<1x320x4xbf16> to vector<320x4xbf16>
    %c3_215 = arith.constant 3 : index
    %c4_216 = arith.constant 4 : index
    %c0_217 = arith.constant 0 : index
    %c0_218 = arith.constant 0 : index
    %157 = vector.load %arg2[%c3_215, %c4_216, %c0_217, %c0_218] : memref<5x5x4x128xbf16, #tpu.memory_space<vmem>>, vector<1x1x4x128xbf16>
    %158 = vector.shape_cast %157 : vector<1x1x4x128xbf16> to vector<4x128xbf16>
    %cst_219 = arith.constant dense<0.000000e+00> : vector<320x128xf32>
    %159 = tpu.matmul %156, %158, %cst_219 {dimension_numbers = #tpu.dot_dimension_numbers<[1], [0], [0], [1], [0, 0, 1, 1], [], []>} : vector<320x4xbf16>, vector<4x128xbf16>, vector<320x128xf32> -> vector<320x128xf32>
    %160 = arith.addf %154, %159 : vector<320x128xf32>
    %c0_220 = arith.constant 0 : index
    %c0_221 = arith.constant 0 : index
    %161 = vector.load %arg5[%c0_220, %c0_221] : memref<320x128xf32, #tpu.memory_space<vmem>>, vector<320x128xf32>
    tpu.vector_store %arg5[%c0_220, %c0_221], %160 {strides = array<i32>} : memref<320x128xf32, #tpu.memory_space<vmem>>, vector<320x128xf32>,
    %c0_222 = arith.constant 0 : index
    %c0_223 = arith.constant 0 : index
    %162 = vector.load %arg5[%c0_222, %c0_223] : memref<320x128xf32, #tpu.memory_space<vmem>>, vector<320x128xf32>
    %c0_224 = arith.constant 0 : index
    %c80 = arith.constant 80 : index
    %c0_225 = arith.constant 0 : index
    %163 = vector.load %arg1[%c0_224, %c80, %c0_225] : memref<1x408x4xbf16, #tpu.memory_space<vmem>>, vector<1x320x4xbf16>
    %164 = vector.shape_cast %163 : vector<1x320x4xbf16> to vector<320x4xbf16>
    %c4_226 = arith.constant 4 : index
    %c0_227 = arith.constant 0 : index
    %c0_228 = arith.constant 0 : index
    %c0_229 = arith.constant 0 : index
    %165 = vector.load %arg2[%c4_226, %c0_227, %c0_228, %c0_229] : memref<5x5x4x128xbf16, #tpu.memory_space<vmem>>, vector<1x1x4x128xbf16>
    %166 = vector.shape_cast %165 : vector<1x1x4x128xbf16> to vector<4x128xbf16>
    %cst_230 = arith.constant dense<0.000000e+00> : vector<320x128xf32>
    %167 = tpu.matmul %164, %166, %cst_230 {dimension_numbers = #tpu.dot_dimension_numbers<[1], [0], [0], [1], [0, 0, 1, 1], [], []>} : vector<320x4xbf16>, vector<4x128xbf16>, vector<320x128xf32> -> vector<320x128xf32>
    %168 = arith.addf %162, %167 : vector<320x128xf32>
    %c0_231 = arith.constant 0 : index
    %c0_232 = arith.constant 0 : index
    %169 = vector.load %arg5[%c0_231, %c0_232] : memref<320x128xf32, #tpu.memory_space<vmem>>, vector<320x128xf32>
    tpu.vector_store %arg5[%c0_231, %c0_232], %168 {strides = array<i32>} : memref<320x128xf32, #tpu.memory_space<vmem>>, vector<320x128xf32>,
    %c0_233 = arith.constant 0 : index
    %c0_234 = arith.constant 0 : index
    %170 = vector.load %arg5[%c0_233, %c0_234] : memref<320x128xf32, #tpu.memory_space<vmem>>, vector<320x128xf32>
    %c0_235 = arith.constant 0 : index
    %c81 = arith.constant 81 : index
    %c0_236 = arith.constant 0 : index
    %171 = vector.load %arg1[%c0_235, %c81, %c0_236] : memref<1x408x4xbf16, #tpu.memory_space<vmem>>, vector<1x320x4xbf16>
    %172 = vector.shape_cast %171 : vector<1x320x4xbf16> to vector<320x4xbf16>
    %c4_237 = arith.constant 4 : index
    %c1_238 = arith.constant 1 : index
    %c0_239 = arith.constant 0 : index
    %c0_240 = arith.constant 0 : index
    %173 = vector.load %arg2[%c4_237, %c1_238, %c0_239, %c0_240] : memref<5x5x4x128xbf16, #tpu.memory_space<vmem>>, vector<1x1x4x128xbf16>
    %174 = vector.shape_cast %173 : vector<1x1x4x128xbf16> to vector<4x128xbf16>
    %cst_241 = arith.constant dense<0.000000e+00> : vector<320x128xf32>
    %175 = tpu.matmul %172, %174, %cst_241 {dimension_numbers = #tpu.dot_dimension_numbers<[1], [0], [0], [1], [0, 0, 1, 1], [], []>} : vector<320x4xbf16>, vector<4x128xbf16>, vector<320x128xf32> -> vector<320x128xf32>
    %176 = arith.addf %170, %175 : vector<320x128xf32>
    %c0_242 = arith.constant 0 : index
    %c0_243 = arith.constant 0 : index
    %177 = vector.load %arg5[%c0_242, %c0_243] : memref<320x128xf32, #tpu.memory_space<vmem>>, vector<320x128xf32>
    tpu.vector_store %arg5[%c0_242, %c0_243], %176 {strides = array<i32>} : memref<320x128xf32, #tpu.memory_space<vmem>>, vector<320x128xf32>,
    %c0_244 = arith.constant 0 : index
    %c0_245 = arith.constant 0 : index
    %178 = vector.load %arg5[%c0_244, %c0_245] : memref<320x128xf32, #tpu.memory_space<vmem>>, vector<320x128xf32>
    %c0_246 = arith.constant 0 : index
    %c82 = arith.constant 82 : index
    %c0_247 = arith.constant 0 : index
    %179 = vector.load %arg1[%c0_246, %c82, %c0_247] : memref<1x408x4xbf16, #tpu.memory_space<vmem>>, vector<1x320x4xbf16>
    %180 = vector.shape_cast %179 : vector<1x320x4xbf16> to vector<320x4xbf16>
    %c4_248 = arith.constant 4 : index
    %c2_249 = arith.constant 2 : index
    %c0_250 = arith.constant 0 : index
    %c0_251 = arith.constant 0 : index
    %181 = vector.load %arg2[%c4_248, %c2_249, %c0_250, %c0_251] : memref<5x5x4x128xbf16, #tpu.memory_space<vmem>>, vector<1x1x4x128xbf16>
    %182 = vector.shape_cast %181 : vector<1x1x4x128xbf16> to vector<4x128xbf16>
    %cst_252 = arith.constant dense<0.000000e+00> : vector<320x128xf32>
    %183 = tpu.matmul %180, %182, %cst_252 {dimension_numbers = #tpu.dot_dimension_numbers<[1], [0], [0], [1], [0, 0, 1, 1], [], []>} : vector<320x4xbf16>, vector<4x128xbf16>, vector<320x128xf32> -> vector<320x128xf32>
    %184 = arith.addf %178, %183 : vector<320x128xf32>
    %c0_253 = arith.constant 0 : index
    %c0_254 = arith.constant 0 : index
    %185 = vector.load %arg5[%c0_253, %c0_254] : memref<320x128xf32, #tpu.memory_space<vmem>>, vector<320x128xf32>
    tpu.vector_store %arg5[%c0_253, %c0_254], %184 {strides = array<i32>} : memref<320x128xf32, #tpu.memory_space<vmem>>, vector<320x128xf32>,
    %c0_255 = arith.constant 0 : index
    %c0_256 = arith.constant 0 : index
    %186 = vector.load %arg5[%c0_255, %c0_256] : memref<320x128xf32, #tpu.memory_space<vmem>>, vector<320x128xf32>
    %c0_257 = arith.constant 0 : index
    %c83 = arith.constant 83 : index
    %c0_258 = arith.constant 0 : index
    %187 = vector.load %arg1[%c0_257, %c83, %c0_258] : memref<1x408x4xbf16, #tpu.memory_space<vmem>>, vector<1x320x4xbf16>
    %188 = vector.shape_cast %187 : vector<1x320x4xbf16> to vector<320x4xbf16>
    %c4_259 = arith.constant 4 : index
    %c3_260 = arith.constant 3 : index
    %c0_261 = arith.constant 0 : index
    %c0_262 = arith.constant 0 : index
    %189 = vector.load %arg2[%c4_259, %c3_260, %c0_261, %c0_262] : memref<5x5x4x128xbf16, #tpu.memory_space<vmem>>, vector<1x1x4x128xbf16>
    %190 = vector.shape_cast %189 : vector<1x1x4x128xbf16> to vector<4x128xbf16>
    %cst_263 = arith.constant dense<0.000000e+00> : vector<320x128xf32>
    %191 = tpu.matmul %188, %190, %cst_263 {dimension_numbers = #tpu.dot_dimension_numbers<[1], [0], [0], [1], [0, 0, 1, 1], [], []>} : vector<320x4xbf16>, vector<4x128xbf16>, vector<320x128xf32> -> vector<320x128xf32>
    %192 = arith.addf %186, %191 : vector<320x128xf32>
    %c0_264 = arith.constant 0 : index
    %c0_265 = arith.constant 0 : index
    %193 = vector.load %arg5[%c0_264, %c0_265] : memref<320x128xf32, #tpu.memory_space<vmem>>, vector<320x128xf32>
    tpu.vector_store %arg5[%c0_264, %c0_265], %192 {strides = array<i32>} : memref<320x128xf32, #tpu.memory_space<vmem>>, vector<320x128xf32>,
    %c0_266 = arith.constant 0 : index
    %c0_267 = arith.constant 0 : index
    %194 = vector.load %arg5[%c0_266, %c0_267] : memref<320x128xf32, #tpu.memory_space<vmem>>, vector<320x128xf32>
    %c0_268 = arith.constant 0 : index
    %c84 = arith.constant 84 : index
    %c0_269 = arith.constant 0 : index
    %195 = vector.load %arg1[%c0_268, %c84, %c0_269] : memref<1x408x4xbf16, #tpu.memory_space<vmem>>, vector<1x320x4xbf16>
    %196 = vector.shape_cast %195 : vector<1x320x4xbf16> to vector<320x4xbf16>
    %c4_270 = arith.constant 4 : index
    %c4_271 = arith.constant 4 : index
    %c0_272 = arith.constant 0 : index
    %c0_273 = arith.constant 0 : index
    %197 = vector.load %arg2[%c4_270, %c4_271, %c0_272, %c0_273] : memref<5x5x4x128xbf16, #tpu.memory_space<vmem>>, vector<1x1x4x128xbf16>
    %198 = vector.shape_cast %197 : vector<1x1x4x128xbf16> to vector<4x128xbf16>
    %cst_274 = arith.constant dense<0.000000e+00> : vector<320x128xf32>
    %199 = tpu.matmul %196, %198, %cst_274 {dimension_numbers = #tpu.dot_dimension_numbers<[1], [0], [0], [1], [0, 0, 1, 1], [], []>} : vector<320x4xbf16>, vector<4x128xbf16>, vector<320x128xf32> -> vector<320x128xf32>
    %200 = arith.addf %194, %199 : vector<320x128xf32>
    %c0_275 = arith.constant 0 : index
    %c0_276 = arith.constant 0 : index
    %201 = vector.load %arg5[%c0_275, %c0_276] : memref<320x128xf32, #tpu.memory_space<vmem>>, vector<320x128xf32>
    tpu.vector_store %arg5[%c0_275, %c0_276], %200 {strides = array<i32>} : memref<320x128xf32, #tpu.memory_space<vmem>>, vector<320x128xf32>,
    %c0_277 = arith.constant 0 : index
    %c0_278 = arith.constant 0 : index
    %202 = vector.load %arg5[%c0_277, %c0_278] : memref<320x128xf32, #tpu.memory_space<vmem>>, vector<320x128xf32>
    %c0_279 = arith.constant 0 : index
    %c0_280 = arith.constant 0 : index
    %203 = vector.load %arg3[%c0_279, %c0_280] : memref<1x128xf32, #tpu.memory_space<vmem>>, vector<1x128xf32>
    %204 = vector.broadcast %203 : vector<1x128xf32> to vector<320x128xf32>
    %205 = arith.addf %202, %204 : vector<320x128xf32>
    %c0_281 = arith.constant 0 : index
    %c0_282 = arith.constant 0 : index
    %c0_283 = arith.constant 0 : index
    %206 = vector.load %arg4[%c0_281, %c0_282, %c0_283] : memref<1x320x128xf32, #tpu.memory_space<vmem>>, vector<1x320x128xf32>
    %207 = vector.shape_cast %206 : vector<1x320x128xf32> to vector<320x128xf32>
    %208 = vector.shape_cast %205 : vector<320x128xf32> to vector<1x320x128xf32>
    tpu.vector_store %arg4[%c0_281, %c0_282, %c0_283], %208 {strides = array<i32>} : memref<1x320x128xf32, #tpu.memory_space<vmem>>, vector<1x320x128xf32>,
    return
  }
  func.func @transform_0(%arg0: i32) -> (i32, i32, i32) {
    %c0_i32 = arith.constant 0 : i32
    %c0_i32_0 = arith.constant 0 : i32
    %c0_i32_1 = arith.constant 0 : i32
    return %arg0, %c0_i32, %c0_i32_0 : i32, i32, i32
  }
  func.func @transform_1(%arg0: i32) -> (i32, i32, i32, i32) {
    %c0_i32 = arith.constant 0 : i32
    %c0_i32_0 = arith.constant 0 : i32
    %c0_i32_1 = arith.constant 0 : i32
    %c0_i32_2 = arith.constant 0 : i32
    %c0_i32_3 = arith.constant 0 : i32
    return %c0_i32, %c0_i32_0, %c0_i32_1, %c0_i32_2 : i32, i32, i32, i32
  }
  func.func @transform_2(%arg0: i32) -> (i32, i32) {
    %c0_i32 = arith.constant 0 : i32
    %c0_i32_0 = arith.constant 0 : i32
    %c0_i32_1 = arith.constant 0 : i32
    return %c0_i32, %c0_i32_0 : i32, i32
  }
  func.func @transform_3(%arg0: i32) -> (i32, i32, i32) {
    %c0_i32 = arith.constant 0 : i32
    %c0_i32_0 = arith.constant 0 : i32
    %c0_i32_1 = arith.constant 0 : i32
    return %arg0, %c0_i32, %c0_i32_0 : i32, i32, i32
  }
}

</mosaic_0001>

<bundles_post_ra>
// kernel: tpu_custom_call.1
= control target key start
LH: loop header
LB: loop body
LE: loop exit
PB: predicated region body
PF: predicated region fallthrough
CT: control target
= control target key end

     0   :  { %8 = vsyncpa [#allocation4], 0  ;;  %s22339_s0 = inlined_call_operand.vmem [shape: bf16[2,408,4], index: 0, kind: input, shape index: {}]   ;;  %s22340_s1 = inlined_call_operand.vmem [shape: bf16[5,5,4,128], index: 1, kind: input, shape index: {}]   ;;  %s22341_s2 = inlined_call_operand.vmem [shape: f32[1,128], index: 2, kind: input, shape index: {}]   ;;  %s22342_s3 = inlined_call_operand.hbm [shape: f32[2,320,128], index: 3, kind: output, shape index: {}]  }
   0x1   :  { %10 = vsyncpa [#allocation4 + $0x1], 0  ;;  %s19937_s12 = smov 0   ;;  %s19939_s13 = smov 0  }
   0x2   :  { %s19941_s14 = smov 0   ;;  %s19943_s15 = smov 0  }
   0x3 LB: > { %s19958_s16 = sadd.s32 4294967295, %s19912_s15   ;;  %s15669_s17 = sadd.s32 4294967294, %s19912_s15   ;;  %s19912_s15 = sphi %s19943_s15, %s22359_s15   ;;  %s19908_s14 = sphi %s19941_s14, %s22358_s14   ;;  %s19904_s13 = sphi %s19939_s13, %s22357_s13   ;;  %s19900_s12 = sphi %s19937_s12, %s22356_s12  }
   0x4   : > { %s19962_s18 = sadd.s32 1, %s19912_s15   ;;  %s91_s19 = sadd.s32 1, %s19908_s14 }
   0x5   : > { %s88_s20 = ssub.s32 %s19912_s15, %s19962_s18  ;;  %p101_p0 = scmp.ne.s32.totalorder %s19908_s14, %s19904_s13 }
   0x6   : > { %p89_p1 = scmp.eq.s32.totalorder %s88_s20, 0  ;;  %p102_p2 = scmp.eq.s32.totalorder %s19958_s16, 1 }
   0x7   : > { %p107_p3 = scmp.ne.s32.totalorder %s19904_s13, %s19900_s12  ;;  %p108_p4 = scmp.eq.s32.totalorder %s15669_s17, 1 }
   0x8   : > { %s19973_s21 = scalar_select %p89_p1, %s19908_s14, %s91_s19  }
   0x9   : > { %p19975_p5 = por %p102_p2, %p101_p0  ;;  %p19979_p6 = por %p108_p4, %p107_p3 }
   0xa   : > { %p15672_p7 = scmp.ge.s32.totalorder %s19912_s15, 1  ;;  %p140_p8 = scmp.lt.s32.totalorder %s19912_s15, 3 }
   0xc   : > { %p141_p9 = pnand %p15672_p7, %p140_p8 }
   0xd   : > { %v290_v0 = vld [vmem:[%s22340_s1] sm:$0x3] (!%p141_p9)  ;;  %vm452_vm0 = vcmask (!%p141_p9), 1041408   ;;  %v16174_v1 = vld [vmem:[%s22340_s1 + $0x18] sm:$0x3] (!%p141_p9)  ;;  %p164_p10 = scmp.lt.s32.totalorder (!%p141_p9), %s19958_s16, 1 }
   0xe   : > { %144 = sbr.rel (%p141_p9) target bundleno = 1258 (0x4ea), region = 32  ;;  %19259 = vmatprep.subr.msk.bf16.mxu1 (!%p141_p9), %vm452_vm0, %v290_v0  ;;  %v454_v2 = vsel (!%p141_p9), %vm452_vm0, %v290_v0, 0  ;;  %19271 = vmatprep.subr.msk.bf16.mxu0 (!%p141_p9), %vm452_vm0, %v16174_v1  ;;  %v19996_v3 = vsel (!%p141_p9), %vm452_vm0, %v16174_v1, 0  ;;  %v15714_v4 = vld [vmem:[%s22340_s1 + $0x2] sm:$0x3] (!%p141_p9)  ;;  %vm391_vm1 = vcmask (!%p141_p9), 31744  }
   0xf   : > { %17248 = vmatpush3.bf16.msra.mxu1 (!%p141_p9), %v454_v2  ;;  %17752 = vmatpush3.bf16.msra.mxu0 (!%p141_p9), %v19996_v3  ;;  %v16216_v5 = vld [vmem:[%s22340_s1 + $0x1a] sm:$0x3] (!%p141_p9)  ;;  %v20017_v7 = vld [vmem:[%s22340_s1 + $0x4] sm:$0x3] (!%p141_p9)  ;;  %v1141_v9 = vsel (!%p141_p9), %vm452_vm0, %v15714_v4, 0  ;;  %vm1602_vm2 = vcmask (!%p141_p9), 1046528  }
  0x10   : > { %19260 = vmatprep.subr.msk.bf16.mxu1 (!%p141_p9), %vm452_vm0, %v15714_v4  ;;  %19273 = vmatprep.subr.msk.bf16.mxu0 (!%p141_p9), %vm452_vm0, %v16216_v5  ;;  %v20032_v17 = vld [vmem:[%s22340_s1 + $0x1c] sm:$0x3] (!%p141_p9)  ;;  %v8524_v19 = vsel (!%p141_p9), %vm452_vm0, %v16216_v5, 0  ;;  %vm2166_vm3 = vsmask.f32 (!%p141_p9), 6400  ;;  %vm2877_vm5 = vcmask (!%p141_p9), 1045504  }
  0x11   : > { %vm915_vm4 = vsmask.f32 (!%p141_p9), 7424  ;;  %vm4004_vm6 = vsmask.f32 (!%p141_p9), 5376  ;;  %vm4715_vm7 = vcmask (!%p141_p9), 1044480   ;;  %s19914_s19 = smov (!%p141_p9), [#allocation3]  }
  0x12   : > { %vm5279_vm8 = vsmask.f32 (!%p141_p9), 4352  ;;  %s19854_s20 = sshll.u32 (!%p141_p9), %s19914_s19, 4  ;;  %s19855_s20 = int_to_ptr.vmem [resolvable:$false] %s19854_s20 }
  0x13   : > { %s19856_s24 = scalar_lea.vmem (!%p141_p9), %s19855_s20, 10240 }
  0x15   : > { %s165_s30 = scalar_select %p164_p10, %s19958_s16, 1 }
  0x17   : > { %s19286_s6 = smul.u32 204, %s165_s30 }
  0x19   : > { %s20011_s9 = scalar_lea.vmem %s22339_s0, %s19286_s6  ;;  %s19287_s6 = smul.u32 5120, %s19958_s16 }
  0x1a   : > { %v19329_v6 = vld [vmem:[%s20011_s9] sm:$0xff]   ;;  %v19330_v8 = vld [vmem:[%s20011_s9 + $0x8] sm:$0xff]   ;;  %v19331_v10 = vld [vmem:[%s20011_s9 + $0x14] sm:$0xfe]  }
  0x1b   : > { %17249 = vmatprep.mubr.msk.bf16.mxu1 %vm391_vm1, %v19329_v6  ;;  %v19332_v11 = vld [vmem:[%s20011_s9 + $0x1c] sm:$0xff]   ;;  %v19333_v12 = vld [vmem:[%s20011_s9 + $0x24] sm:$0xff]   ;;  %v7712_v13 = vrot.slane %v19331_v10, 1  ;;  %v19334_v16 = vld [vmem:[%s20011_s9 + $0x10] sm:$0xff]   ;;  %s22288_s16 = scalar_lea.hbm %s22342_s3, %s19287_s6 }
  0x1c   : > { %17250 = vmatmul.mubr.msk.bf16.vlgmr.msra.gmra.mrb[0].mxu1 %vm391_vm1, %v19330_v8  ;;  %v7713_v14 = vrot.slane %v19332_v11, 1  ;;  %v7715_v15 = vrot.slane %v19333_v12, 1  ;;  %v19335_v20 = vld [vmem:[%s20011_s9 + $0x18] sm:$0xff]   ;;  %v19336_v22 = vld [vmem:[%s20011_s9 + $0x2c] sm:$0xff]   ;;  %v19338_v25 = vld [vmem:[%s20011_s9 + $0x20] sm:$0xff]  }
  0x1d   : > { %17290 = vmatpush3.bf16.msra.mxu1 %v1141_v9  ;;  %17253 = vmatprep.mubr.msk.bf16.mxu1 %vm391_vm1, %v19334_v16  ;;  %v19337_v23 = vld [vmem:[%s20011_s9 + $0x34] sm:$0xff]   ;;  %v7717_v24 = vrot.slane %v19336_v22, 1  ;;  %v19340_v28 = vld [vmem:[%s20011_s9 + $0x3c] sm:$0xff]   ;;  %v19339_v29 = vld [vmem:[%s20011_s9 + $0x28] sm:$0xff]  }
  0x1e   : > { %19261 = vmatprep.subr.msk.bf16.mxu1 %vm452_vm0, %v20017_v7  ;;  %v7714_v18 = vsel %vm1602_vm2, %v7712_v13, %v7713_v14  ;;  %v7716_v21 = vsel %vm1602_vm2, %v7713_v14, %v7715_v15  ;;  %v7719_v26 = vrot.slane %v19337_v23, 1  ;;  %v7721_v31 = vrot.slane %v19340_v28, 1  ;;  %v19341_v32 = vld [vmem:[%s20011_s9 + $0x44] sm:$0xff]   ;;  %v19342_v33 = vld [vmem:[%s20011_s9 + $0x30] sm:$0xff]   ;;  %v19343_v38 = vld [vmem:[%s20011_s9 + $0x38] sm:$0xff]  }
  0x1f   : > { %17753 = vmatprep.mubr.msk.bf16.mxu0 %vm391_vm1, %v7714_v18  ;;  %v7718_v27 = vsel %vm1602_vm2, %v7715_v15, %v7717_v24  ;;  %v19344_v35 = vld [vmem:[%s20011_s9 + $0x4c] sm:$0xff]   ;;  %v7723_v36 = vrot.slane %v19341_v32, 1  ;;  %v19345_v39 = vld [vmem:[%s20011_s9 + $0x54] sm:$0xff]   ;;  %v19348_v41 = vld [vmem:[%s20011_s9 + $0x5c] sm:$0xff]  }
  0x20   : > { %17754 = vmatmul.mubr.msk.bf16.vlgmr.msra.gmra.mrb[0].mxu0 %vm391_vm1, %v7716_v21  ;;  %v7720_v30 = vsel %vm1602_vm2, %v7717_v24, %v7719_v26  ;;  %v7722_v34 = vsel %vm1602_vm2, %v7719_v26, %v7721_v31  ;;  %v7725_v37 = vrot.slane %v19344_v35, 1  ;;  %v19346_v43 = vld [vmem:[%s20011_s9 + $0x40] sm:$0xff]   ;;  %v19352_v44 = vld [vmem:[%s20011_s9 + $0x14] sm:$0xfe]   ;;  %v7727_v46 = vrot.slane %v19345_v39, 1  ;;  %v19347_v52 = vld [vmem:[%s20011_s9 + $0x48] sm:$0xff]  }
  0x21   : > { %17794 = vmatpush3.bf16.msra.mxu0 %v8524_v19  ;;  %17757 = vmatprep.mubr.msk.bf16.mxu0 %vm391_vm1, %v7718_v27  ;;  %v7724_v40 = vsel %vm1602_vm2, %v7721_v31, %v7723_v36  ;;  %v19353_v45 = vld [vmem:[%s20011_s9 + $0x1c] sm:$0xff]   ;;  %v7729_v47 = vrot.slane %v19348_v41, 1  ;;  %v8276_v48 = vshrl.u32 %v19352_v44, 16  ;;  %v8279_v49 = vshll.u32 %v19352_v44, 16  ;;  %v20075_v53 = vld [vmem:[%s20011_s9 + $0x64] sm:$0xff]   ;;  %v19350_v55 = vld [vmem:[%s20011_s9 + $0x50] sm:$0xff]  }
  0x22   : > { %19274 = vmatprep.subr.msk.bf16.mxu0 %vm452_vm0, %v20032_v17  ;;  %v7726_v42 = vsel %vm1602_vm2, %v7723_v36, %v7725_v37  ;;  %v8284_v50 = vshrl.u32 %v19353_v45, 16  ;;  %v8287_v51 = vshll.u32 %v19353_v45, 16  ;;  %v7728_v54 = vsel %vm1602_vm2, %v7725_v37, %v7727_v46  ;;  %v19354_v57 = vld [vmem:[%s20011_s9 + $0x24] sm:$0xff]   ;;  %v19357_v62 = vld [vmem:[%s20011_s9 + $0x2c] sm:$0xff]   ;;  %v19358_v8 = vld [vmem:[%s20011_s9 + $0x34] sm:$0xff]  }
  0x23   : > { %v8278_v56 = vrot.slane %v8276_v48, 1  ;;  %v7730_v58 = vsel %vm1602_vm2, %v7727_v46, %v7729_v47  ;;  %v8281_v59 = vrot.slane %v8279_v49, 2  ;;  %v22343_v63 = vrot.slane %v20075_v53, 1  ;;  %v19351_v10 = vld [vmem:[%s20011_s9 + $0x58] sm:$0xff]   ;;  %v19355_v18 = vld [vmem:[%s20011_s9 + $0x60] sm:$0xff]   ;;  %v19356_v26 = vld [vmem:[%s20011_s9 + $0x68] sm:$0xff]  }
  0x24   : > { %17254 = vmatmul.mubr.msk.bf16.gmra.mrb[4].mxu1 %vm391_vm1, %v19335_v20  ;;  %v8286_v60 = vrot.slane %v8284_v50, 1  ;;  %v8289_v61 = vrot.slane %v8287_v51, 2  ;;  %v8293_v0 = vshrl.u32 %v19354_v57, 16  ;;  %v8296_v1 = vshll.u32 %v19354_v57, 16  ;;  %v19361_v13 = vld [vmem:[%s20011_s9 + $0x3c] sm:$0xff]   ;;  %v19362_v28 = vld [vmem:[%s20011_s9 + $0x44] sm:$0xff]  }
  0x25   : > { %17257 = vmatprep.mubr.msk.bf16.mxu1 %vm391_vm1, %v19338_v25  ;;  %v8282_v2 = vor.u32 %v8281_v59, %v8278_v56  ;;  %v8302_v5 = vshrl.u32 %v19357_v62, 16  ;;  %v8305_v6 = vshll.u32 %v19357_v62, 16  ;;  %v7732_v9 = vsel %vm1602_vm2, %v7729_v47, %v22343_v63  ;;  %v19359_v35 = vld [vmem:[%s20011_s9 + $0x70] sm:$0xff]   ;;  %v20110_v36 = vld [vmem:[%s22340_s1 + $0x1e] sm:$0x3]  ;;  %v19363_v51 = vld [vmem:[%s20011_s9 + $0x80] sm:$0xff]  }
  0x26   : > { %v8290_v4 = vor.u32 %v8289_v61, %v8286_v60  ;;  %v8295_v11 = vrot.slane %v8293_v0, 1  ;;  %v8298_v12 = vrot.slane %v8296_v1, 2  ;;  %v8311_v19 = vshrl.u32 %v19358_v8, 16  ;;  %v19366_v45 = vld [vmem:[%s20011_s9 + $0x54] sm:$0xff]   ;;  %v19369_v50 = vld [vmem:[%s20011_s9 + $0x5c] sm:$0xff]   ;;  %v19370_v60 = vld [vmem:[%s20011_s9 + $0x64] sm:$0xff]  }
  0x27   : > { %v8304_v15 = vrot.slane %v8302_v5, 1  ;;  %v8307_v16 = vrot.slane %v8305_v6, 2  ;;  %v8314_v21 = vshll.u32 %v19358_v8, 16  ;;  %v8320_v22 = vshrl.u32 %v19361_v13, 16  ;;  %v19360_v46 = vld [vmem:[%s20011_s9 + $0x78] sm:$0xff]   ;;  %v19372_v61 = vld [vmem:[%s20011_s9 + $0x8] sm:$0xff]  }
  0x28   : > { %17758 = vmatmul.mubr.msk.bf16.gmra.mrb[4].mxu0 %vm391_vm1, %v7720_v30  ;;  %v8291_v14 = vsel %vm2166_vm3, %v8282_v2, %v8290_v4  ;;  %v8299_v20 = vor.u32 %v8298_v12, %v8295_v11  ;;  %v8323_v24 = vshll.u32 %v19361_v13, 16  ;;  %v9087_v25 = vsel %vm452_vm0, %v20032_v17, 0  ;;  %v21023_v63 = vld [vmem:[%s20011_s9 + $0x70] sm:$0xff]  }
  0x29   : > { %17761 = vmatprep.mubr.msk.bf16.mxu0 %vm391_vm1, %v7722_v34  ;;  %v8308_v23 = vor.u32 %v8307_v16, %v8304_v15  ;;  %v8313_v27 = vrot.slane %v8311_v19, 1  ;;  %v8316_v30 = vrot.slane %v8314_v21, 2  ;;  %v8322_v31 = vrot.slane %v8320_v22, 1  ;;  %v19365_v34 = vld [vmem:[%s20011_s9 + $0x4c] sm:$0xff]   ;;  %v19375_v22 = vld [vmem:[%s20011_s9 + $0x74] sm:$0xff]  }
  0x2a   : > { %v8329_v17 = vshrl.u32 %v19362_v28, 16  ;;  %v8341_v41 = vshll.u32 %v19365_v34, 16  ;;  %v8350_v56 = vshll.u32 %v19366_v45, 16  ;;  %v8359_v59 = vshll.u32 %v19369_v50, 16 }
  0x2b   : > { %v8309_v32 = vsel %vm2166_vm3, %v8299_v20, %v8308_v23  ;;  %v8317_v37 = vor.u32 %v8316_v30, %v8313_v27  ;;  %v8365_v11 = vshrl.u32 %v19370_v60, 16  ;;  %v8368_v16 = vshll.u32 %v19370_v60, 16  ;;  %v19368_v30 = vld [vmem:[%s20011_s9 + $0x98] sm:$0xff]  }
  0x2c   : > { %17258 = vmatmul.mubr.msk.bf16.gmra.mrb[8].mxu1 %vm391_vm1, %v19339_v29  ;;  %v8300_v29 = vsel %vm2166_vm3, %v8290_v4, %v8299_v20  ;;  %v8343_v49 = vrot.slane %v8341_v41, 2  ;;  %v8352_v2 = vrot.slane %v8350_v56, 2  ;;  %v19364_v4 = vld [vmem:[%s20011_s9 + $0x88] sm:$0xff]   ;;  %v8361_v8 = vrot.slane %v8359_v59, 2 }
  0x2d   : > { %17261 = vmatprep.mubr.msk.bf16.mxu1 %vm391_vm1, %v19342_v33  ;;  %v8325_v33 = vrot.slane %v8323_v24, 2 }
  0x2f   : > { %v8326_v39 = vor.u32 %v8325_v33, %v8322_v31 }
  0x30   : > { %17762 = vmatmul.mubr.msk.bf16.gmra.mrb[8].mxu0 %vm391_vm1, %v7724_v40  ;;  %v8338_v40 = vshrl.u32 %v19365_v34, 16 }
  0x31   : > { %17765 = vmatprep.mubr.msk.bf16.mxu0 %vm391_vm1, %v7726_v42  ;;  %v8331_v42 = vrot.slane %v8329_v17, 1  ;;  %v8327_v47 = vsel %vm2166_vm3, %v8317_v37, %v8326_v39  ;;  %v8383_v17 = vshrl.u32 %v19375_v22, 16 }
  0x32   : > { %v8340_v48 = vrot.slane %v8338_v40, 1 }
  0x33   : > { %v8385_v56 = vrot.slane %v8383_v17, 1 }
  0x34   : > { %17262 = vmatmul.mubr.msk.bf16.gmra.mrb[12].mxu1 %vm391_vm1, %v19343_v38  ;;  %v8332_v38 = vshll.u32 %v19362_v28, 16  ;;  %v8344_v57 = vor.u32 %v8343_v49, %v8340_v48  ;;  %v8370_v28 = vrot.slane %v8368_v16, 2  ;;  %v1705_v48 = vsel %vm452_vm0, %v20017_v7, 0 }
  0x35   : > { %17265 = vmatprep.mubr.msk.bf16.mxu1 %vm391_vm1, %v19346_v43  ;;  %v8318_v43 = vsel %vm2166_vm3, %v8308_v23, %v8317_v37  ;;  %v8367_v23 = vrot.slane %v8365_v11, 1  ;;  %v19377_v37 = vld [vmem:[%s20011_s9 + $0x20] sm:$0xff]  }
  0x36   : > { %v8334_v44 = vrot.slane %v8332_v38, 2  ;;  %v948_v49 = vshll.u32 %v19377_v37, 16 }
  0x37   : > { %v8371_v41 = vor.u32 %v8370_v28, %v8367_v23  ;;  %v19386_v23 = vld [vmem:[%s20011_s9 + $0x9c] sm:$0xff]  }
  0x38   : > { %17766 = vmatmul.mubr.msk.bf16.gmra.mrb[12].mxu0 %vm391_vm1, %v7728_v54  ;;  %v8335_v54 = vor.u32 %v8334_v44, %v8331_v42  ;;  %v8386_v42 = vshll.u32 %v19375_v22, 16  ;;  %v8428_v17 = vshrl.u32 %v19386_v23, 16 }
  0x39   : > { %17769 = vmatprep.mubr.msk.bf16.mxu0 %vm391_vm1, %v7730_v58  ;;  %v8356_v58 = vshrl.u32 %v19369_v50, 16  ;;  %v19379_v50 = vld [vmem:[%s20011_s9 + $0x84] sm:$0xff]  }
  0x3a   : > { %v8336_v0 = vsel %vm2166_vm3, %v8326_v39, %v8335_v54  ;;  %v8345_v5 = vsel %vm2166_vm3, %v8335_v54, %v8344_v57  ;;  %v19380_v54 = vld [vmem:[%s20011_s9 + $0x28] sm:$0xff]   ;;  %v8401_v7 = vshrl.u32 %v19379_v50, 16 }
  0x3b   : > { %v8358_v6 = vrot.slane %v8356_v58, 1 }
  0x3c   : > { %17266 = vmatmul.mubr.msk.bf16.gmra.mrb[16].mxu1 %vm391_vm1, %v19347_v52  ;;  %v19371_v52 = vld [vmem:[%s20011_s9] sm:$0xff]  }
  0x3d   : > { %17269 = vmatprep.mubr.msk.bf16.mxu1 %vm391_vm1, %v19350_v55  ;;  %v8347_v55 = vshrl.u32 %v19366_v45, 16  ;;  %v919_v62 = vshll.u32 %v19371_v52, 16  ;;  %v917_v12 = vshrl.u32 %v19371_v52, 16  ;;  %v8362_v19 = vor.u32 %v8361_v8, %v8358_v6 }
  0x3e   : > { %v8404_v8 = vshll.u32 %v19379_v50, 16  ;;  %v8430_v50 = vrot.slane %v8428_v17, 1  ;;  %v19397_v17 = vld [vmem:[%s20011_s9 + $0x68] sm:$0xff]  }
  0x3f   : > { %v8349_v1 = vrot.slane %v8347_v55, 1  ;;  %v921_v13 = vrot.slane %v919_v62, 1  ;;  %v8372_v55 = vsel %vm2166_vm3, %v8362_v19, %v8371_v41 }
  0x40   : > { %17770 = vmatmul.mubr.msk.bf16.gmra.mrb[16].mxu0 %vm391_vm1, %v7732_v9  ;;  %v19374_v9 = vld [vmem:[%s20011_s9 + $0x6c] sm:$0xff]   ;;  %v8406_v22 = vrot.slane %v8404_v8, 2 }
  0x41   : > { %17795 = vmatprep.mubr.msk.bf16.mxu0 %vm391_vm1, %v8291_v14  ;;  %v924_v14 = vshll.u32 %v19372_v61, 16  ;;  %v8353_v15 = vor.u32 %v8352_v2, %v8349_v1  ;;  %v8374_v20 = vshrl.u32 %v19374_v9, 16  ;;  %v8377_v21 = vshll.u32 %v19374_v9, 16  ;;  %v19381_v9 = vld [vmem:[%s20011_s9 + $0x30] sm:$0xff]  }
  0x42   : > { %v922_v24 = vor.u32 %v921_v13, %v917_v12  ;;  %v950_v1 = vrot.slane %v948_v49, 1 }
  0x43   : > { %v8354_v27 = vsel %vm2166_vm3, %v8344_v57, %v8353_v15  ;;  %v8363_v31 = vsel %vm2166_vm3, %v8353_v15, %v8362_v19  ;;  %v8376_v33 = vrot.slane %v8374_v20, 1  ;;  %v8379_v34 = vrot.slane %v8377_v21, 2  ;;  %v19384_v20 = vld [vmem:[%s20011_s9 + $0x38] sm:$0xff]  }
  0x44   : > { %17270 = vmatmul.mubr.msk.bf16.gmra.mrb[20].mxu1 %vm391_vm1, %v19351_v10  ;;  %v19367_v10 = vld [vmem:[%s20011_s9 + $0x90] sm:$0xff]   ;;  %v8388_v57 = vrot.slane %v8386_v42, 2  ;;  %v8403_v15 = vrot.slane %v8401_v7, 1  ;;  %v960_v19 = vshrl.u32 %v19380_v54, 16  ;;  %v19387_v42 = vld [vmem:[%s20011_s9 + $0xa4] sm:$0xff]  }
  0x45   : > { %17273 = vmatprep.mubr.msk.bf16.mxu1 %vm391_vm1, %v19355_v18  ;;  %v19373_v18 = vld [vmem:[%s20011_s9 + $0x10] sm:$0xff]   ;;  %v8380_v45 = vor.u32 %v8379_v34, %v8376_v33  ;;  %v972_v33 = vshll.u32 %v19384_v20, 16 }
  0x46   : > { %v936_v39 = vshrl.u32 %v19373_v18, 16  ;;  %v8389_v6 = vor.u32 %v8388_v57, %v8385_v56  ;;  %v8407_v34 = vor.u32 %v8406_v22, %v8403_v15  ;;  %v8437_v56 = vshrl.u32 %v19387_v42, 16 }
  0x47   : > { %v8381_v59 = vsel %vm2166_vm3, %v8371_v41, %v8380_v45  ;;  %v8440_v57 = vshll.u32 %v19387_v42, 16 }
  0x48   : > { %17796 = vmatmul.mubr.msk.bf16.vlgmr.msra.gmra.mrb[0].mxu0 %vm391_vm1, %v8300_v29  ;;  %v19378_v29 = vld [vmem:[%s20011_s9 + $0x7c] sm:$0xff]   ;;  %v8390_v21 = vsel %vm2166_vm3, %v8380_v45, %v8389_v6  ;;  %v976_v45 = vshrl.u32 %v19384_v20, 16 }
  0x49   : > { %17836 = vmatpush3.bf16.msra.mxu0 %v9087_v25  ;;  %17799 = vmatprep.mubr.msk.bf16.mxu0 %vm391_vm1, %v8309_v32  ;;  %v926_v25 = vrot.slane %v924_v14, 1  ;;  %v932_v32 = vshll.u32 %v19373_v18, 16  ;;  %v19383_v14 = vld [vmem:[%s20011_s9 + $0x94] sm:$0xff]   ;;  %v8442_v8 = vrot.slane %v8440_v57, 2  ;;  %v19399_v57 = vld [vmem:[%s20011_s9 + $0x2c] sm:$0xff]  }
  0x4a   : > { %19275 = vmatprep.subr.msk.bf16.mxu0 %vm452_vm0, %v20110_v36 }
  0x4b   : > { %v927_v38 = vsel %vm915_vm4, %v922_v24, %v926_v25  ;;  %v934_v44 = vrot.slane %v932_v32, 1  ;;  %v968_v32 = vshrl.u32 %v19381_v9, 16 }
  0x4c   : > { %17274 = vmatmul.mubr.msk.bf16.gmra.mrb[24].mxu1 %vm391_vm1, %v19356_v26  ;;  %v19376_v26 = vld [vmem:[%s20011_s9 + $0x18] sm:$0xff]  }
  0x4d   : > { %17277 = vmatprep.mubr.msk.bf16.mxu1 %vm391_vm1, %v19359_v35  ;;  %v928_v35 = vshrl.u32 %v19372_v61, 16  ;;  %v940_v40 = vshll.u32 %v19376_v26, 16  ;;  %v19382_v61 = vld [vmem:[%s20011_s9 + $0x8c] sm:$0xff]  }
  0x4e   : > { %v8410_v11 = vshrl.u32 %v19382_v61, 16  ;;  %v8413_v12 = vshll.u32 %v19382_v61, 16 }
  0x4f   : > { %v942_v52 = vrot.slane %v940_v40, 1 }
  0x50   : > { %17800 = vmatmul.mubr.msk.bf16.gmra.mrb[4].mxu0 %vm391_vm1, %v8318_v43  ;;  %v8392_v43 = vshrl.u32 %v19378_v29, 16 }
  0x51   : > { %17803 = vmatprep.mubr.msk.bf16.mxu0 %vm391_vm1, %v8327_v47  ;;  %v930_v47 = vor.u32 %v928_v35, %v926_v25  ;;  %v964_v25 = vshll.u32 %v19381_v9, 16  ;;  %v8422_v35 = vshll.u32 %v19383_v14, 16 }
  0x52   : > { %v8394_v58 = vrot.slane %v8392_v43, 1 }
  0x53   : > { %v935_v62 = vsel %vm915_vm4, %v930_v47, %v934_v44  ;;  %v19388_v47 = vld [vmem:[%s20011_s9 + $0x48] sm:$0xff]   ;;  %v8424_v49 = vrot.slane %v8422_v35, 2 }
  0x54   : > { %17278 = vmatmul.mubr.msk.bf16.gmra.mrb[28].mxu1 %vm391_vm1, %v19360_v46  ;;  %v8395_v46 = vshll.u32 %v19378_v29, 16  ;;  %v8419_v29 = vshrl.u32 %v19383_v14, 16  ;;  %v988_v61 = vshll.u32 %v19388_v47, 16 }
  0x55   : > { %17281 = vmatprep.mubr.msk.bf16.mxu1 %vm391_vm1, %v19363_v51  ;;  %v938_v51 = vor.u32 %v936_v39, %v934_v44  ;;  %v8431_v39 = vshll.u32 %v19386_v23, 16  ;;  %v974_v44 = vrot.slane %v972_v33, 1 }
  0x56   : > { %v8397_v60 = vrot.slane %v8395_v46, 2  ;;  %v8421_v41 = vrot.slane %v8419_v29, 1 }
  0x57   : > { %v943_v2 = vsel %vm915_vm4, %v938_v51, %v942_v52 }
  0x58   : > { %17804 = vmatmul.mubr.msk.bf16.gmra.mrb[8].mxu0 %vm391_vm1, %v8336_v0  ;;  %v944_v0 = vshrl.u32 %v19376_v26, 16  ;;  %v8412_v26 = vrot.slane %v8410_v11, 1  ;;  %v19392_v11 = vld [vmem:[%s20011_s9 + $0x58] sm:$0xff]  }
  0x59   : > { %17807 = vmatprep.mubr.msk.bf16.mxu0 %vm391_vm1, %v8345_v5  ;;  %v956_v5 = vshll.u32 %v19380_v54, 16  ;;  %v19390_v54 = vld [vmem:[%s20011_s9 + $0xac] sm:$0xff]  }
  0x5a   : > { %v946_v13 = vor.u32 %v944_v0, %v942_v52  ;;  %v8433_v52 = vrot.slane %v8431_v39, 2  ;;  %v19389_v0 = vld [vmem:[%s20011_s9 + $0x50] sm:$0xff]   ;;  %v1008_v39 = vshrl.u32 %v19392_v11, 16 }
  0x5b   : > { %v958_v18 = vrot.slane %v956_v5, 1  ;;  %v978_v5 = vor.u32 %v976_v45, %v974_v44  ;;  %v996_v14 = vshll.u32 %v19389_v0, 16 }
  0x5c   : > { %17282 = vmatmul.mubr.msk.bf16.gmra.mrb[32].mxu1 %vm391_vm1, %v19364_v4  ;;  %v952_v4 = vshrl.u32 %v19377_v37, 16  ;;  %v951_v28 = vsel %vm915_vm4, %v946_v13, %v950_v1  ;;  %v966_v37 = vrot.slane %v964_v25, 1  ;;  %v8434_v7 = vor.u32 %v8433_v52, %v8430_v50  ;;  %v19398_v50 = vld [vmem:[%s20011_s9 + $0x70] sm:$0xff]  }
  0x5d   : > { %17285 = vmatprep.mubr.msk.bf16.mxu1 %vm391_vm1, %v19367_v10  ;;  %v8398_v10 = vor.u32 %v8397_v60, %v8394_v58  ;;  %v962_v40 = vor.u32 %v960_v19, %v958_v18  ;;  %v992_v13 = vshrl.u32 %v19388_v47, 16  ;;  %v1004_v25 = vshll.u32 %v19392_v11, 16 }
  0x5e   : > { %v954_v16 = vor.u32 %v952_v4, %v950_v1  ;;  %v970_v43 = vor.u32 %v968_v32, %v966_v37  ;;  %v19391_v1 = vld [vmem:[%s20011_s9 + $0xb4] ss:$0 sps:$4 sm:$0x33]   ;;  %v8449_v4 = vshll.u32 %v19390_v54, 16 }
  0x5f   : > { %v8399_v24 = vsel %vm2166_vm3, %v8389_v6, %v8398_v10  ;;  %v8439_v6 = vrot.slane %v8437_v56, 1  ;;  %v8455_v19 = vshrl.u32 %v19391_v1, 16  ;;  %v8458_v23 = vshll.u32 %v19391_v1, 16 }
  0x60   : > { %17808 = vmatmul.mubr.msk.bf16.gmra.mrb[12].mxu0 %vm391_vm1, %v8354_v27  ;;  %v8415_v27 = vrot.slane %v8413_v12, 2  ;;  %v975_v58 = vsel %vm915_vm4, %v970_v43, %v974_v44 }
  0x61   : > { %17811 = vmatprep.mubr.msk.bf16.mxu0 %vm391_vm1, %v8363_v31  ;;  %v959_v31 = vsel %vm915_vm4, %v954_v16, %v958_v18  ;;  %v8451_v18 = vrot.slane %v8449_v4, 2  ;;  %v8460_v32 = vrot.slane %v8458_v23, 2  ;;  %v8990_v4 = vrot.slane %v19399_v57, 2 }
  0x64   : > { %17286 = vmatmul.mubr.msk.bf16.gmra.mrb[36].mxu1 %vm391_vm1, %v19368_v30  ;;  %v19385_v30 = vld [vmem:[%s20011_s9 + $0x40] sm:$0xff]  }
  0x65   : > { %17291 = vmatprep.mubr.msk.bf16.mxu1 %vm391_vm1, %v927_v38  ;;  %v8416_v38 = vor.u32 %v8415_v27, %v8412_v26  ;;  %v980_v46 = vshll.u32 %v19385_v30, 16  ;;  %v984_v60 = vshrl.u32 %v19385_v30, 16  ;;  %v19393_v26 = vld [vmem:[%s20011_s9 + $0x60] sm:$0xff]   ;;  %v8443_v27 = vor.u32 %v8442_v8, %v8439_v6 }
  0x66   : > { %v8457_v30 = vrot.slane %v8455_v19, 1  ;;  %v1012_v35 = vshll.u32 %v19393_v26, 16  ;;  %v1016_v45 = vshrl.u32 %v19393_v26, 16  ;;  %v19402_v6 = vld [vmem:[%s20011_s9 + $0x80] sm:$0xff]  }
  0x67   : > { %v8417_v51 = vsel %vm2166_vm3, %v8407_v34, %v8416_v38 }
  0x68   : > { %17812 = vmatmul.mubr.msk.bf16.gmra.mrb[16].mxu0 %vm391_vm1, %v8372_v55  ;;  %v967_v55 = vsel %vm915_vm4, %v962_v40, %v966_v37  ;;  %v8444_v37 = vsel %vm2166_vm3, %v8434_v7, %v8443_v27  ;;  %v19394_v40 = vld [vmem:[%s20011_s9 + $0x14] sm:$0xfc]   ;;  %v1014_v44 = vrot.slane %v1012_v35, 1  ;;  %v8461_v47 = vor.u32 %v8460_v32, %v8457_v30 }
  0x69   : > { %17815 = vmatprep.mubr.msk.bf16.mxu0 %vm391_vm1, %v8381_v59  ;;  %v982_v59 = vrot.slane %v980_v46, 1  ;;  %v1020_v46 = vshll.u32 %v19397_v17, 16  ;;  %v19409_v32 = vld [vmem:[%s20011_s9 + $0x98] sm:$0xff]  }
  0x6b   : > { %v986_v9 = vor.u32 %v984_v60, %v982_v59  ;;  %v983_v20 = vsel %vm915_vm4, %v978_v5, %v982_v59  ;;  %v1022_v56 = vrot.slane %v1020_v46, 1  ;;  %v1024_v60 = vshrl.u32 %v19397_v17, 16 }
  0x6c   : > { %17292 = vmatmul.mubr.msk.bf16.vlgmr.msra.gmra.mrb[0].mxu1 %vm391_vm1, %v935_v62  ;;  %v8425_v62 = vor.u32 %v8424_v49, %v8421_v41  ;;  %v19395_v41 = vld [vmem:[%s20011_s9 + $0x1c] sm:$0xff]  }
  0x6d   : > { %17332 = vmatpush3.bf16.msra.mxu1 %v1705_v48  ;;  %17295 = vmatprep.mubr.msk.bf16.mxu1 %vm391_vm1, %v943_v2  ;;  %v8408_v48 = vsel %vm2166_vm3, %v8398_v10, %v8407_v34  ;;  %v8446_v2 = vshrl.u32 %v19390_v54, 16  ;;  %v990_v10 = vrot.slane %v988_v61, 1  ;;  %v1006_v34 = vrot.slane %v1004_v25, 1  ;;  %v19396_v54 = vld [vmem:[%s20011_s9 + $0x24] sm:$0xff]  }
  0x6e   : > { %v8426_v12 = vsel %vm2166_vm3, %v8416_v38, %v8425_v62  ;;  %v8435_v15 = vsel %vm2166_vm3, %v8425_v62, %v8434_v7  ;;  %v8986_v49 = vrot.slane %v19395_v41, 2  ;;  %v1028_v61 = vshll.u32 %v19398_v50, 16 }
  0x6f   : > { %v8448_v16 = vrot.slane %v8446_v2, 1  ;;  %v991_v22 = vsel %vm915_vm4, %v986_v9, %v990_v10  ;;  %v1010_v52 = vor.u32 %v1008_v39, %v1006_v34  ;;  %v1032_v7 = vshrl.u32 %v19398_v50, 16 }
  0x70   : > { %17816 = vmatmul.mubr.msk.bf16.gmra.mrb[20].mxu0 %vm391_vm1, %v8390_v21  ;;  %v20199_v21 = vld [vmem:[%s22340_s1 + $0x6] sm:$0x3]  ;;  %v8988_v2 = vrot.slane %v19396_v54, 2  ;;  %v1030_v5 = vrot.slane %v1028_v61, 1  ;;  %v1026_v8 = vor.u32 %v1024_v60, %v1022_v56  ;;  %v1072_v54 = vshrl.u32 %v19409_v32, 16 }
  0x71   : > { %17819 = vmatprep.mubr.msk.bf16.mxu0 %vm391_vm1, %v8399_v24  ;;  %v1000_v24 = vshrl.u32 %v19389_v0, 16  ;;  %19262 = vmatprep.subr.msk.bf16.mxu1 %vm452_vm0, %v20199_v21  ;;  %v8452_v29 = vor.u32 %v8451_v18, %v8448_v16  ;;  %v1015_v0 = vsel %vm915_vm4, %v1010_v52, %v1014_v44  ;;  %v1044_v18 = vshll.u32 %v19402_v6, 16  ;;  %v19413_v60 = vld [vmem:[%s20011_s9] sm:$0xfe]  }
  0x72   : > { %v1034_v11 = vor.u32 %v1032_v7, %v1030_v5  ;;  %v8991_v16 = vsel %vm2877_vm5, %v8988_v2, %v8990_v4  ;;  %v1031_v19 = vsel %vm915_vm4, %v1026_v8, %v1030_v5  ;;  %v1603_v7 = vrot.slane %v19413_v60, 1  ;;  %v19412_v5 = vld [vmem:[%s20011_s9 + $0x64] sm:$0xff]   ;;  %v19416_v8 = vld [vmem:[%s20011_s9 + $0x6c] sm:$0xff]  }
  0x73   : > { %v8453_v38 = vsel %vm2166_vm3, %v8443_v27, %v8452_v29  ;;  %v1046_v27 = vrot.slane %v1044_v18, 1  ;;  %v19432_v60 = vld [vmem:[%s20011_s9 + $0xac] sm:$0xff]  }
  0x74   : > { %17296 = vmatmul.mubr.msk.bf16.gmra.mrb[4].mxu1 %vm391_vm1, %v951_v28  ;;  %v998_v28 = vrot.slane %v996_v14, 1  ;;  %v19403_v14 = vld [vmem:[%s20011_s9 + $0x3c] sm:$0xff]  }
  0x75   : > { %17299 = vmatprep.mubr.msk.bf16.mxu1 %vm391_vm1, %v959_v31  ;;  %v994_v31 = vor.u32 %v992_v13, %v990_v10  ;;  %v19405_v10 = vld [vmem:[%s20011_s9 + $0x88] sm:$0xff]   ;;  %v19400_v13 = vld [vmem:[%s20011_s9 + $0x34] sm:$0xff]   ;;  %v8994_v26 = vrot.slane %v19403_v14, 2  ;;  %v9006_v14 = vrot.slane %v19416_v8, 2 }
  0x76   : > { %v1002_v33 = vor.u32 %v1000_v24, %v998_v28  ;;  %v1048_v24 = vshrl.u32 %v19402_v6, 16  ;;  %v8992_v25 = vrot.slane %v19400_v13, 2  ;;  %v1056_v39 = vshrl.u32 %v19405_v10, 16 }
  0x77   : > { %v999_v42 = vsel %vm915_vm4, %v994_v31, %v998_v28  ;;  %v19406_v28 = vld [vmem:[%s20011_s9 + $0x90] sm:$0xff]   ;;  %v9004_v13 = vrot.slane %v19412_v5, 2 }
  0x78   : > { %17820 = vmatmul.mubr.msk.bf16.gmra.mrb[24].mxu0 %vm391_vm1, %v8408_v48  ;;  %v1007_v43 = vsel %vm915_vm4, %v1002_v33, %v1006_v34  ;;  %v8985_v48 = vrot.slane %v19394_v40, 2  ;;  %v1050_v30 = vor.u32 %v1048_v24, %v1046_v27  ;;  %v8993_v33 = vsel %vm2877_vm5, %v8990_v4, %v8992_v25  ;;  %v19404_v34 = vld [vmem:[%s20011_s9 + $0x44] sm:$0xff]   ;;  %v19420_v24 = vld [vmem:[%s20011_s9 + $0x7c] sm:$0xff]   ;;  %v19433_v5 = vld [vmem:[%s20011_s9 + $0xb4] ss:$0 sps:$4 sm:$0x33]  }
  0x79   : > { %17823 = vmatprep.mubr.msk.bf16.mxu0 %vm391_vm1, %v8417_v51  ;;  %v19401_v51 = vld [vmem:[%s20011_s9 + $0x78] sm:$0xff]   ;;  %v8995_v35 = vsel %vm2877_vm5, %v8992_v25, %v8994_v26  ;;  %v1060_v17 = vshll.u32 %v19406_v28, 16  ;;  %v1064_v41 = vshrl.u32 %v19406_v28, 16  ;;  %v2416_v25 = vsel %vm452_vm0, %v20199_v21, 0 }
  0x7a   : > { %v8987_v59 = vsel %vm2877_vm5, %v8985_v48, %v8986_v49  ;;  %v1036_v62 = vshll.u32 %v19401_v51, 16 }
  0x7c   : > { %17300 = vmatmul.mubr.msk.bf16.gmra.mrb[8].mxu1 %vm391_vm1, %v967_v55  ;;  %v1018_v55 = vor.u32 %v1016_v45, %v1014_v44  ;;  %v1038_v9 = vrot.slane %v1036_v62, 1  ;;  %v19410_v44 = vld [vmem:[%s20011_s9 + $0xa0] ss:$0 sps:$4 sm:$0x11]   ;;  %v1062_v45 = vrot.slane %v1060_v17, 1 }
  0x7d   : > { %17303 = vmatprep.mubr.msk.bf16.mxu1 %vm391_vm1, %v975_v58  ;;  %v8462_v58 = vsel %vm2166_vm3, %v8452_v29, %v8461_v47  ;;  %v1076_v57 = vshll.u32 %v19410_v44, 16 }
  0x7e   : > { %v1023_v1 = vsel %vm915_vm4, %v1018_v55, %v1022_v56  ;;  %v1039_v23 = vsel %vm915_vm4, %v1034_v11, %v1038_v9  ;;  %v1066_v48 = vor.u32 %v1064_v41, %v1062_v45  ;;  %v19411_v55 = vld [vmem:[%s20011_s9 + $0x5c] sm:$0xff]  }
  0x7f   : > { %v9002_v62 = vrot.slane %v19411_v55, 2 }
  0x80   : > { %17824 = vmatmul.mubr.msk.bf16.gmra.mrb[28].mxu0 %vm391_vm1, %v8426_v12  ;;  %v8989_v12 = vsel %vm2877_vm5, %v8986_v49, %v8988_v2 }
  0x81   : > { %17827 = vmatprep.mubr.msk.bf16.mxu0 %vm391_vm1, %v8435_v15  ;;  %v9650_v15 = vsel %vm452_vm0, %v20110_v36, 0  ;;  %v1052_v36 = vshll.u32 %v19405_v10, 16  ;;  %v19415_v10 = vld [vmem:[%s20011_s9 + $0x10] sm:$0xff]  }
  0x83   : > { %v1054_v31 = vrot.slane %v1052_v36, 1 }
  0x84   : > { %17304 = vmatmul.mubr.msk.bf16.gmra.mrb[12].mxu1 %vm391_vm1, %v983_v20  ;;  %v1040_v20 = vshrl.u32 %v19401_v51, 16  ;;  %v19408_v51 = vld [vmem:[%s20011_s9 + $0x54] sm:$0xff]  }
  0x85   : > { %17307 = vmatprep.mubr.msk.bf16.mxu1 %vm391_vm1, %v991_v22  ;;  %v20244_v22 = vld [vmem:[%s22340_s1 + $0x20] sm:$0x3]  ;;  %v1055_v40 = vsel %vm915_vm4, %v1050_v30, %v1054_v31  ;;  %v1058_v47 = vor.u32 %v1056_v39, %v1054_v31  ;;  %v9000_v61 = vrot.slane %v19408_v51, 2  ;;  %v9010_v31 = vrot.slane %v19420_v24, 2  ;;  %v19426_v39 = vld [vmem:[%s20011_s9 + $0x38] sm:$0xff]   ;;  %v19430_v51 = vld [vmem:[%s20011_s9 + $0x48] sm:$0xff]  }
  0x86   : > { %v1042_v29 = vor.u32 %v1040_v20, %v1038_v9  ;;  %v19419_v20 = vld [vmem:[%s20011_s9 + $0x20] sm:$0xff]  }
  0x87   : > { %v1063_v56 = vsel %vm915_vm4, %v1058_v47, %v1062_v45  ;;  %v9003_v6 = vsel %vm2877_vm5, %v9000_v61, %v9002_v62  ;;  %v1610_v30 = vrot.slane %v19419_v20, 1  ;;  %v19425_v45 = vld [vmem:[%s20011_s9 + $0x94] sm:$0xff]   ;;  %v19428_v47 = vld [vmem:[%s20011_s9 + $0x9c] sm:$0xff]  }
  0x88   : > { %17828 = vmatmul.mubr.msk.bf16.gmra.mrb[32].mxu0 %vm391_vm1, %v8444_v37  ;;  %v19407_v37 = vld [vmem:[%s20011_s9 + $0x4c] sm:$0xff]  }
  0x89   : > { %17831 = vmatprep.mubr.msk.bf16.mxu0 %vm391_vm1, %v8453_v38  ;;  %v1047_v38 = vsel %vm915_vm4, %v1042_v29, %v1046_v27  ;;  %v8998_v46 = vrot.slane %v19407_v37, 2  ;;  %v19422_v27 = vld [vmem:[%s20011_s9 + $0x28] sm:$0xff]   ;;  %v19423_v37 = vld [vmem:[%s20011_s9 + $0x30] sm:$0xff]  }
  0x8a   : > { %v20305_v29 = vld [vmem:[%s22340_s1 + $0x8] sm:$0x3]  ;;  %v1612_v21 = vrot.slane %v19422_v27, 1 }
  0x8b   : > { %v9001_v4 = vsel %vm2877_vm5, %v8998_v46, %v9000_v61 }
  0x8c   : > { %17308 = vmatmul.mubr.msk.bf16.gmra.mrb[16].mxu1 %vm391_vm1, %v999_v42  ;;  %v1068_v42 = vshll.u32 %v19409_v32, 16 }
  0x8d   : > { %17311 = vmatprep.mubr.msk.bf16.mxu1 %vm391_vm1, %v1007_v43  ;;  %v8996_v43 = vrot.slane %v19404_v34, 2 }
  0x8e   : > { %v1070_v49 = vrot.slane %v1068_v42, 1  ;;  %v1614_v42 = vrot.slane %v19423_v37, 1  ;;  %v20378_v37 = vld [vmem:[%s20011_s9 + $0x4c] sm:$0xff]  }
  0x8f   : > { %v8997_v50 = vsel %vm2877_vm5, %v8994_v26, %v8996_v43  ;;  %v8999_v52 = vsel %vm2877_vm5, %v8996_v43, %v8998_v46  ;;  %v1616_v43 = vrot.slane %v19426_v39, 1  ;;  %v20381_v39 = vld [vmem:[%s20011_s9 + $0x88] sm:$0xff]  }
  0x90   : > { %17832 = vmatmul.mubr.msk.bf16.gmra.mrb[36].mxu0 %vm391_vm1, %v8462_v58  ;;  %v19414_v58 = vld [vmem:[%s20011_s9 + $0x8] sm:$0xff]  }
  0x91   : > { %17837 = vmatprep.mubr.msk.bf16.mxu0 %vm391_vm1, %v8987_v59  ;;  %v1071_v59 = vsel %vm915_vm4, %v1066_v48, %v1070_v49  ;;  %v1604_v2 = vrot.slane %v19414_v58, 1  ;;  %v1615_v48 = vsel %vm1602_vm2, %v1612_v21, %v1614_v42  ;;  %v19429_v58 = vld [vmem:[%s20011_s9 + $0xa4] sm:$0xff]  }
  0x93   : > { %v1605_v11 = vsel %vm1602_vm2, %v1603_v7, %v1604_v2  ;;  %v9020_v7 = vrot.slane %v19429_v58, 2 }
  0x94   : > { %17312 = vmatmul.mubr.msk.bf16.gmra.mrb[20].mxu1 %vm391_vm1, %v1015_v0  ;;  %v1074_v0 = vor.u32 %v1072_v54, %v1070_v49  ;;  %v19427_v49 = vld [vmem:[%s20011_s9 + $0x40] sm:$0xff]   ;;  %v9018_v54 = vrot.slane %v19428_v47, 2 }
  0x95   : > { %17315 = vmatprep.mubr.msk.bf16.mxu1 %vm391_vm1, %v1023_v1  ;;  %v1078_v1 = vrot.slane %v1076_v57, 1  ;;  %v1618_v55 = vrot.slane %v19427_v49, 1  ;;  %v20394_v49 = vld [vmem:[%s20011_s9 + $0x54] sm:$0xff]  }
  0x96   : > { %v9021_v8 = vsel %vm2877_vm5, %v9018_v54, %v9020_v7  ;;  %v9561_v58 = vrot.slane %v20394_v49, 2 }
  0x97   : > { %v1079_v9 = vsel %vm915_vm4, %v1074_v0, %v1078_v1  ;;  %v1619_v61 = vsel %vm1602_vm2, %v1616_v43, %v1618_v55  ;;  %v19434_v1 = vld [vmem:[%s20011_s9 + $0x58] sm:$0xff]  }
  0x98   : > { %17838 = vmatmul.mubr.msk.bf16.vlgmr.msra.gmra.mrb[0].mxu0 %vm391_vm1, %v8989_v12  ;;  %v19418_v12 = vld [vmem:[%s20011_s9 + $0x18] sm:$0xff]  }
  0x99   : > { %17878 = vmatpush3.bf16.msra.mxu0 %v9650_v15  ;;  %17841 = vmatprep.mubr.msk.bf16.mxu0 %vm391_vm1, %v8991_v16  ;;  %v1606_v15 = vrot.slane %v19415_v10, 1  ;;  %v19417_v16 = vld [vmem:[%s20011_s9 + $0x74] sm:$0xff]   ;;  %v1608_v18 = vrot.slane %v19418_v12, 1 }
  0x9a   : > { %19276 = vmatprep.subr.msk.bf16.mxu0 %vm452_vm0, %v20244_v22  ;;  %v9008_v28 = vrot.slane %v19417_v16, 2  ;;  %v9024_v16 = vrot.slane %v19433_v5, 2 }
  0x9b   : > { %v1607_v36 = vsel %vm1602_vm2, %v1604_v2, %v1606_v15  ;;  %v1609_v26 = vsel %vm1602_vm2, %v1606_v15, %v1608_v18  ;;  %v1611_v17 = vsel %vm1602_vm2, %v1608_v18, %v1610_v30  ;;  %v9022_v2 = vrot.slane %v19432_v60, 2  ;;  %v19439_v15 = vld [vmem:[%s20011_s9 + $0x68] sm:$0xff]  }
  0x9c   : > { %17316 = vmatmul.mubr.msk.bf16.gmra.mrb[24].mxu1 %vm391_vm1, %v1031_v19  ;;  %v9005_v19 = vsel %vm2877_vm5, %v9002_v62, %v9004_v13  ;;  %v9009_v32 = vsel %vm2877_vm5, %v9006_v14, %v9008_v28  ;;  %v9011_v34 = vsel %vm2877_vm5, %v9008_v28, %v9010_v31  ;;  %v19431_v62 = vld [vmem:[%s20011_s9 + $0x50] sm:$0xff]  }
  0x9d   : > { %17319 = vmatprep.mubr.msk.bf16.mxu1 %vm391_vm1, %v1039_v23  ;;  %v9007_v23 = vsel %vm2877_vm5, %v9004_v13, %v9006_v14  ;;  %v9023_v10 = vsel %vm2877_vm5, %v9020_v7, %v9022_v2  ;;  %v19435_v13 = vld [vmem:[%s20011_s9 + $0x60] sm:$0xff]   ;;  %v9025_v24 = vsel %vm2877_vm5, %v9022_v2, %v9024_v16  ;;  %v19440_v28 = vld [vmem:[%s20011_s9 + $0x70] sm:$0xff]  }
  0x9e   : > { %v1626_v20 = vrot.slane %v19435_v13, 1  ;;  %v19457_v7 = vld [vmem:[%s20011_s9 + $0x10] sm:$0xff]  }
  0x9f   : > { %v20442_v16 = vld [vmem:[%s20011_s9 + $0x74] sm:$0xff]  }
  0xa0   : > { %17842 = vmatmul.mubr.msk.bf16.gmra.mrb[4].mxu0 %vm391_vm1, %v8993_v33  ;;  %v19421_v33 = vld [vmem:[%s20011_s9 + $0x84] sm:$0xff]  }
  0xa1   : > { %17845 = vmatprep.mubr.msk.bf16.mxu0 %vm391_vm1, %v8995_v35  ;;  %v19424_v35 = vld [vmem:[%s20011_s9 + $0x8c] sm:$0xff]  }
  0xa2   : > { %v9014_v41 = vrot.slane %v19424_v35, 2  ;;  %v20374_v35 = vld [vmem:[%s20011_s9 + $0x44] sm:$0xff]  }
  0xa3   : > { %v9557_v47 = vrot.slane %v20374_v35, 2 }
  0xa4   : > { %17320 = vmatmul.mubr.msk.bf16.gmra.mrb[28].mxu1 %vm391_vm1, %v1047_v38  ;;  %v1613_v38 = vsel %vm1602_vm2, %v1610_v30, %v1612_v21 }
  0xa5   : > { %17323 = vmatprep.mubr.msk.bf16.mxu1 %vm391_vm1, %v1055_v40  ;;  %v9012_v40 = vrot.slane %v19421_v33, 2 }
  0xa7   : > { %v9013_v44 = vsel %vm2877_vm5, %v9010_v31, %v9012_v40  ;;  %v9015_v46 = vsel %vm2877_vm5, %v9012_v40, %v9014_v41  ;;  %v19443_v31 = vld [vmem:[%s20011_s9 + $0x78] sm:$0xff]  }
  0xa8   : > { %17846 = vmatmul.mubr.msk.bf16.gmra.mrb[8].mxu0 %vm391_vm1, %v8997_v50  ;;  %v1617_v50 = vsel %vm1602_vm2, %v1614_v42, %v1616_v43  ;;  %v10360_v42 = vsel %vm452_vm0, %v20244_v22, 0  ;;  %v20399_v22 = vld [vmem:[%s22340_s1 + $0x22] sm:$0x3] }
  0xa9   : > { %17849 = vmatprep.mubr.msk.bf16.mxu0 %vm391_vm1, %v8999_v52  ;;  %v9016_v52 = vrot.slane %v19425_v45, 2 }
  0xab   : > { %v9017_v57 = vsel %vm2877_vm5, %v9014_v41, %v9016_v52  ;;  %v20385_v41 = vld [vmem:[%s20011_s9 + $0x90] sm:$0xff]  }
  0xac   : > { %17324 = vmatmul.mubr.msk.bf16.gmra.mrb[32].mxu1 %vm391_vm1, %v1063_v56  ;;  %v1620_v56 = vrot.slane %v19430_v51, 1  ;;  %v1636_v51 = vrot.slane %v20381_v39, 1 }
  0xad   : > { %17327 = vmatprep.mubr.msk.bf16.mxu1 %vm391_vm1, %v1071_v59  ;;  %v9019_v59 = vsel %vm2877_vm5, %v9016_v52, %v9018_v54  ;;  %v20405_v52 = vld [vmem:[%s20011_s9 + $0x5c] sm:$0xff]   ;;  %v1638_v54 = vrot.slane %v20385_v41, 1  ;;  %v20468_v41 = vld [vmem:[%s20011_s9 + $0x8c] sm:$0xff]  }
  0xae   : > { %v1621_v0 = vsel %vm1602_vm2, %v1618_v55, %v1620_v56  ;;  %v20410_v55 = vld [vmem:[%s20011_s9 + $0x98] sm:$0xff]   ;;  %v9563_v60 = vrot.slane %v20405_v52, 2 }
  0xb0   : > { %17850 = vmatmul.mubr.msk.bf16.gmra.mrb[12].mxu0 %vm391_vm1, %v9001_v4  ;;  %v1622_v4 = vrot.slane %v19431_v62, 1  ;;  %v19455_v62 = vld [vmem:[%s20011_s9] sm:$0xfe]  }
  0xb1   : > { %17853 = vmatprep.mubr.msk.bf16.mxu0 %vm391_vm1, %v9003_v6  ;;  %v1624_v6 = vrot.slane %v19434_v1, 1  ;;  %v1640_v1 = vrot.slane %v20410_v55, 1  ;;  %v2171_v13 = vshll.u32 %v19455_v62, 16 }
  0xb2   : > { %v1623_v12 = vsel %vm1602_vm2, %v1620_v56, %v1622_v4  ;;  %v20414_v56 = vld [vmem:[%s20011_s9 + $0xa0] ss:$0 sps:$4 sm:$0x11]  }
  0xb3   : > { %v1625_v14 = vsel %vm1602_vm2, %v1622_v4, %v1624_v6  ;;  %v1627_v27 = vsel %vm1602_vm2, %v1624_v6, %v1626_v20  ;;  %v1641_v39 = vsel %vm1602_vm2, %v1638_v54, %v1640_v1 }
  0xb4   : > { %17328 = vmatmul.mubr.msk.bf16.gmra.mrb[36].mxu1 %vm391_vm1, %v1079_v9  ;;  %v19436_v9 = vld [vmem:[%s20011_s9 + $0x1c] sm:$0xfc]  }
  0xb5   : > { %17333 = vmatprep.mubr.msk.bf16.mxu1 %vm391_vm1, %v1605_v11  ;;  %v19437_v11 = vld [vmem:[%s20011_s9 + $0x24] sm:$0xff]   ;;  %v9548_v18 = vrot.slane %v19436_v9, 2 }
  0xb8   : > { %17854 = vmatmul.mubr.msk.bf16.gmra.mrb[16].mxu0 %vm391_vm1, %v9005_v19  ;;  %v9549_v19 = vrot.slane %v19437_v11, 2 }
  0xb9   : > { %17857 = vmatprep.mubr.msk.bf16.mxu0 %vm391_vm1, %v9007_v23  ;;  %v1628_v23 = vrot.slane %v19439_v15, 1  ;;  %v2185_v15 = vshrl.u32 %v19457_v7, 16 }
  0xbb   : > { %v1629_v30 = vsel %vm1602_vm2, %v1626_v20, %v1628_v23  ;;  %v2188_v20 = vshll.u32 %v19457_v7, 16  ;;  %v19469_v7 = vld [vmem:[%s20011_s9 + $0x40] sm:$0xff]  }
  0xbc   : > { %17334 = vmatmul.mubr.msk.bf16.vlgmr.msra.gmra.mrb[0].mxu1 %vm391_vm1, %v1607_v36  ;;  %v19438_v36 = vld [vmem:[%s20011_s9 + $0x2c] sm:$0xff]  }
  0xbd   : > { %17374 = vmatpush3.bf16.msra.mxu1 %v2416_v25  ;;  %17337 = vmatprep.mubr.msk.bf16.mxu1 %vm391_vm1, %v1609_v26  ;;  %v9550_v25 = vsel %vm2877_vm5, %v9548_v18, %v9549_v19  ;;  %v19441_v26 = vld [vmem:[%s20011_s9 + $0x34] sm:$0xff]   ;;  %v9551_v21 = vrot.slane %v19438_v36, 2  ;;  %v19461_v36 = vld [vmem:[%s20011_s9 + $0x20] sm:$0xff]  }
  0xbe   : > { %19263 = vmatprep.subr.msk.bf16.mxu1 %vm452_vm0, %v20305_v29  ;;  %v9553_v33 = vrot.slane %v19441_v26, 2 }
  0xbf   : > { %v9552_v40 = vsel %vm2877_vm5, %v9549_v19, %v9551_v21 }
  0xc0   : > { %17858 = vmatmul.mubr.msk.bf16.gmra.mrb[20].mxu0 %vm391_vm1, %v9009_v32  ;;  %v19442_v32 = vld [vmem:[%s20011_s9 + $0x3c] sm:$0xff]   ;;  %v9554_v43 = vsel %vm2877_vm5, %v9551_v21, %v9553_v33  ;;  %v9569_v21 = vrot.slane %v20442_v16, 2 }
  0xc1   : > { %17861 = vmatprep.mubr.msk.bf16.mxu0 %vm391_vm1, %v9011_v34  ;;  %v19444_v34 = vld [vmem:[%s20011_s9 + $0x80] sm:$0xff]  }
  0xc4   : > { %17338 = vmatmul.mubr.msk.bf16.gmra.mrb[4].mxu1 %vm391_vm1, %v1611_v17  ;;  %v1630_v17 = vrot.slane %v19440_v28, 1 }
  0xc5   : > { %17341 = vmatprep.mubr.msk.bf16.mxu1 %vm391_vm1, %v1613_v38  ;;  %v1632_v38 = vrot.slane %v19443_v31, 1  ;;  %v2187_v31 = vrot.slane %v2185_v15, 1  ;;  %v19473_v15 = vld [vmem:[%s20011_s9 + $0x50] sm:$0xff]  }
  0xc6   : > { %v1631_v45 = vsel %vm1602_vm2, %v1628_v23, %v1630_v17  ;;  %v20446_v23 = vld [vmem:[%s20011_s9 + $0x7c] sm:$0xff]  }
  0xc7   : > { %v9571_v35 = vrot.slane %v20446_v23, 2 }
  0xc8   : > { %17862 = vmatmul.mubr.msk.bf16.gmra.mrb[24].mxu0 %vm391_vm1, %v9013_v44  ;;  %v9555_v44 = vrot.slane %v19442_v32, 2 }
  0xc9   : > { %17865 = vmatprep.mubr.msk.bf16.mxu0 %vm391_vm1, %v9015_v46  ;;  %v1634_v46 = vrot.slane %v19444_v34, 1 }
  0xca   : > { %v9558_v2 = vsel %vm2877_vm5, %v9555_v44, %v9557_v47 }
  0xcb   : > { %v1635_v6 = vsel %vm1602_vm2, %v1632_v38, %v1634_v46 }
  0xcc   : > { %17342 = vmatmul.mubr.msk.bf16.gmra.mrb[8].mxu1 %vm391_vm1, %v1615_v48  ;;  %v9559_v48 = vrot.slane %v20378_v37, 2  ;;  %v2206_v37 = vshll.u32 %v19461_v36, 16 }
  0xcd   : > { %17345 = vmatprep.mubr.msk.bf16.mxu1 %vm391_vm1, %v1617_v50  ;;  %v1633_v50 = vsel %vm1602_vm2, %v1630_v17, %v1632_v38  ;;  %v2203_v17 = vshrl.u32 %v19461_v36, 16  ;;  %v20461_v38 = vld [vmem:[%s20011_s9 + $0x84] sm:$0xff]   ;;  %v2242_v36 = vshll.u32 %v19469_v7, 16 }
  0xce   : > { %v9562_v32 = vsel %vm2877_vm5, %v9559_v48, %v9561_v58 }
  0xd0   : > { %17866 = vmatmul.mubr.msk.bf16.gmra.mrb[28].mxu0 %vm391_vm1, %v9017_v57  ;;  %v19456_v57 = vld [vmem:[%s20011_s9 + $0x8] sm:$0xff]  }
  0xd1   : > { %17869 = vmatprep.mubr.msk.bf16.mxu0 %vm391_vm1, %v9019_v59  ;;  %v20422_v59 = vld [vmem:[%s20011_s9 + $0x64] sm:$0xff]   ;;  %v2176_v4 = vshrl.u32 %v19456_v57, 16  ;;  %v2179_v5 = vshll.u32 %v19456_v57, 16  ;;  %v20486_v57 = vrot.slane %v2206_v37, 2 }
  0xd2   : > { %v9565_v9 = vrot.slane %v20422_v59, 2 }
  0xd3   : > { %v2178_v18 = vrot.slane %v2176_v4, 1  ;;  %v2181_v19 = vrot.slane %v2179_v5, 2 }
  0xd4   : > { %17346 = vmatmul.mubr.msk.bf16.gmra.mrb[12].mxu1 %vm391_vm1, %v1619_v61  ;;  %v20426_v61 = vld [vmem:[%s20011_s9 + $0x6c] sm:$0xff]  }
  0xd5   : > { %17349 = vmatprep.mubr.msk.bf16.mxu1 %vm391_vm1, %v1621_v0  ;;  %v9556_v0 = vsel %vm2877_vm5, %v9553_v33, %v9555_v44  ;;  %v9567_v11 = vrot.slane %v20426_v61, 2  ;;  %v2190_v33 = vrot.slane %v2188_v20, 2  ;;  %v2182_v49 = vor.u32 %v2181_v19, %v2178_v18 }
  0xd6   : > { %v2239_v20 = vshrl.u32 %v19469_v7, 16 }
  0xd8   : > { %17870 = vmatmul.mubr.msk.bf16.gmra.mrb[32].mxu0 %vm391_vm1, %v9021_v8  ;;  %v1642_v8 = vrot.slane %v20414_v56, 1  ;;  %v20514_v56 = vld [vmem:[%s20011_s9 + $0xac] sm:$0xff]  }
  0xd9   : > { %17873 = vmatprep.mubr.msk.bf16.mxu0 %vm391_vm1, %v9023_v10  ;;  %v1637_v10 = vsel %vm1602_vm2, %v1634_v46, %v1636_v51  ;;  %v20474_v46 = vld [vmem:[%s20011_s9 + $0x94] sm:$0xff]  }
  0xda   : > { %v1643_v52 = vsel %vm1602_vm2, %v1640_v1, %v1642_v8 }
  0xdc   : > { %17350 = vmatmul.mubr.msk.bf16.gmra.mrb[16].mxu1 %vm391_vm1, %v1623_v12  ;;  %v2168_v12 = vshrl.u32 %v19455_v62, 16  ;;  %v9573_v62 = vrot.slane %v20461_v38, 2 }
  0xdd   : > { %17353 = vmatprep.mubr.msk.bf16.mxu1 %vm391_vm1, %v1625_v14  ;;  %v19460_v14 = vld [vmem:[%s20011_s9 + $0x18] sm:$0xff]  }
  0xde   : > { %v2194_v26 = vshrl.u32 %v19460_v14, 16  ;;  %v2170_v28 = vrot.slane %v2168_v12, 1  ;;  %v2197_v34 = vshll.u32 %v19460_v14, 16  ;;  %v9577_v12 = vrot.slane %v20474_v46, 2 }
  0xe0   : > { %17874 = vmatmul.mubr.msk.bf16.gmra.mrb[36].mxu0 %vm391_vm1, %v9025_v24  ;;  %v20451_v24 = vsel %vm452_vm0, %v20305_v29, 0  ;;  %v1639_v29 = vsel %vm1602_vm2, %v1636_v51, %v1638_v54  ;;  %v2199_v44 = vrot.slane %v2197_v34, 2  ;;  %v20484_v51 = vld [vmem:[%s20011_s9 + $0x9c] sm:$0xff]   ;;  %v20519_v34 = vld [vmem:[%s20011_s9 + $0xb4] sm:$0xff]  }
  0xe1   : > { %17879 = vmatprep.mubr.msk.bf16.mxu0 %vm391_vm1, %v9550_v25  ;;  %v9560_v25 = vsel %vm2877_vm5, %v9557_v47, %v9559_v48  ;;  %v19468_v47 = vld [vmem:[%s20011_s9 + $0x38] sm:$0xff]   ;;  %v9564_v48 = vsel %vm2877_vm5, %v9561_v58, %v9563_v60  ;;  %v9566_v58 = vsel %vm2877_vm5, %v9563_v60, %v9565_v9  ;;  %v9579_v60 = vrot.slane %v20484_v51, 2 }
  0xe2   : > { %v2233_v14 = vshll.u32 %v19468_v47, 16  ;;  %v9585_v59 = vrot.slane %v20519_v34, 2 }
  0xe4   : > { %17354 = vmatmul.mubr.msk.bf16.gmra.mrb[20].mxu1 %vm391_vm1, %v1627_v27  ;;  %v19464_v27 = vld [vmem:[%s20011_s9 + $0x28] sm:$0xff]  }
  0xe5   : > { %17357 = vmatprep.mubr.msk.bf16.mxu1 %vm391_vm1, %v1629_v30  ;;  %v2173_v30 = vrot.slane %v2171_v13, 2  ;;  %v2230_v13 = vshrl.u32 %v19468_v47, 16 }
  0xe7   : > { %v2174_v54 = vor.u32 %v2173_v30, %v2170_v28  ;;  %v2232_v8 = vrot.slane %v2230_v13, 1  ;;  %v2191_v28 = vor.u32 %v2190_v33, %v2187_v31  ;;  %v9583_v31 = vrot.slane %v20514_v56, 2 }
  0xe8   : > { %17880 = vmatmul.mubr.msk.bf16.vlgmr.msra.gmra.mrb[0].mxu0 %vm391_vm1, %v9552_v40  ;;  %v2196_v40 = vrot.slane %v2194_v26, 1  ;;  %v2235_v26 = vrot.slane %v2233_v14, 2  ;;  %v19478_v14 = vld [vmem:[%s20011_s9 + $0x1c] sm:$0xfc]  }
  0xe9   : > { %17920 = vmatpush3.bf16.msra.mxu0 %v10360_v42  ;;  %17883 = vmatprep.mubr.msk.bf16.mxu0 %vm391_vm1, %v9554_v43  ;;  %v2212_v42 = vshrl.u32 %v19464_v27, 16  ;;  %v19465_v43 = vld [vmem:[%s20011_s9 + $0x30] sm:$0xff]   ;;  %v2183_v18 = vsel %vm2166_vm3, %v2174_v54, %v2182_v49  ;;  %v2192_v47 = vsel %vm2166_vm3, %v2182_v49, %v2191_v28  ;;  %v20558_v49 = vld [vmem:[%s22340_s1 + $0xa] sm:$0x3] }
  0xea   : > { %19277 = vmatprep.subr.msk.bf16.mxu0 %vm452_vm0, %v20399_v22  ;;  %v2224_v5 = vshll.u32 %v19465_v43, 16  ;;  %v2200_v30 = vor.u32 %v2199_v44, %v2196_v40  ;;  %v9570_v40 = vsel %vm2877_vm5, %v9567_v11, %v9569_v21 }
  0xeb   : > { %v2214_v4 = vrot.slane %v2212_v42, 1  ;;  %v19476_v42 = vld [vmem:[%s20011_s9 + $0x58] sm:$0xff]  }
  0xec   : > { %17358 = vmatmul.mubr.msk.bf16.gmra.mrb[24].mxu1 %vm391_vm1, %v1631_v45  ;;  %v2215_v45 = vshll.u32 %v19464_v27, 16  ;;  %v2226_v1 = vrot.slane %v2224_v5, 2  ;;  %v2266_v61 = vshrl.u32 %v19476_v42, 16  ;;  %v19479_v5 = vld [vmem:[%s20011_s9 + $0x24] sm:$0xff]  }
  0xed   : > { %17361 = vmatprep.mubr.msk.bf16.mxu1 %vm391_vm1, %v1633_v50  ;;  %v20481_v50 = vrot.slane %v2203_v17, 1  ;;  %v20523_v17 = vrot.slane %v2242_v36, 2  ;;  %v10120_v16 = vshrl.u32 %v19479_v5, 16  ;;  %v10115_v36 = vshll.u32 %v19478_v14, 16 }
  0xf0   : > { %17884 = vmatmul.mubr.msk.bf16.gmra.mrb[4].mxu0 %vm391_vm1, %v9556_v0  ;;  %v2221_v0 = vshrl.u32 %v19465_v43, 16  ;;  %v9568_v43 = vsel %vm2877_vm5, %v9565_v9, %v9567_v11  ;;  %v2201_v9 = vsel %vm2166_vm3, %v2191_v28, %v2200_v30  ;;  %v20553_v11 = vld [vmem:[%s20011_s9 + $0xbc] ss:$0 sps:$4 sm:$0x33]   ;;  %v2236_v28 = vor.u32 %v2235_v26, %v2232_v8 }
  0xf1   : > { %17887 = vmatprep.mubr.msk.bf16.mxu0 %vm391_vm1, %v9558_v2  ;;  %v9575_v2 = vrot.slane %v20468_v41, 2  ;;  %v20616_v41 = vrot.slane %v10115_v36, 3  ;;  %v19487_v36 = vld [vmem:[%s20011_s9 + $0x44] sm:$0xff]  }
  0xf2   : > { %v20507_v19 = vrot.slane %v2221_v0, 1  ;;  %v2269_v0 = vshll.u32 %v19476_v42, 16 }
  0xf3   : > { %v9576_v42 = vsel %vm2877_vm5, %v9573_v62, %v9575_v2 }
  0xf4   : > { %17362 = vmatmul.mubr.msk.bf16.gmra.mrb[28].mxu1 %vm391_vm1, %v1635_v6  ;;  %v19472_v6 = vld [vmem:[%s20011_s9 + $0x48] sm:$0xff]  }
  0xf5   : > { %17365 = vmatprep.mubr.msk.bf16.mxu1 %vm391_vm1, %v1637_v10  ;;  %v2217_v10 = vrot.slane %v2215_v45, 2  ;;  %v2248_v55 = vshrl.u32 %v19472_v6, 16  ;;  %v2251_v27 = vshll.u32 %v19472_v6, 16  ;;  %v19477_v45 = vld [vmem:[%s20011_s9 + $0x60] sm:$0xff]   ;;  %v2209_v6 = vor.u32 %v20486_v57, %v20481_v50 }
  0xf6   : > { %v2275_v7 = vshrl.u32 %v19477_v45, 16  ;;  %v9587_v57 = vrot.slane %v20553_v11, 2 }
  0xf7   : > { %v20533_v33 = vrot.slane %v2248_v55, 1  ;;  %v20540_v44 = vrot.slane %v2251_v27, 2  ;;  %v2218_v13 = vor.u32 %v2217_v10, %v2214_v4  ;;  %v2210_v50 = vsel %vm2166_vm3, %v2200_v30, %v2209_v6 }
  0xf8   : > { %17888 = vmatmul.mubr.msk.bf16.gmra.mrb[8].mxu0 %vm391_vm1, %v9560_v25  ;;  %v20510_v25 = vld [vmem:[%s20011_s9 + $0xa4] sm:$0xff]   ;;  %v20582_v4 = vrot.slane %v2266_v61, 1  ;;  %v20587_v23 = vrot.slane %v2275_v7, 1  ;;  %v2227_v27 = vor.u32 %v2226_v1, %v20507_v19  ;;  %v20594_v30 = vrot.slane %v10120_v16, 2  ;;  %v19484_v7 = vld [vmem:[%s20011_s9 + $0x3c] sm:$0xff]  }
  0xf9   : > { %17891 = vmatprep.mubr.msk.bf16.mxu0 %vm391_vm1, %v9562_v32  ;;  %v2257_v32 = vshrl.u32 %v19473_v15, 16  ;;  %v9581_v37 = vrot.slane %v20510_v25, 2  ;;  %v2219_v10 = vsel %vm2166_vm3, %v2209_v6, %v2218_v13  ;;  %v19486_v6 = vld [vmem:[%s20011_s9 + $0x80] sm:$0xff]  }
  0xfa   : > { %v2228_v19 = vsel %vm2166_vm3, %v2218_v13, %v2227_v27  ;;  %v2237_v26 = vsel %vm2166_vm3, %v2227_v27, %v2236_v28  ;;  %v9586_v27 = vsel %vm2877_vm5, %v9583_v31, %v9585_v59 }
  0xfb   : > { %v9582_v13 = vsel %vm2877_vm5, %v9579_v60, %v9581_v37 }
  0xfc   : > { %17366 = vmatmul.mubr.msk.bf16.gmra.mrb[32].mxu1 %vm391_vm1, %v1639_v29  ;;  %v20521_v29 = vrot.slane %v2239_v20, 1  ;;  %v10112_v20 = vshrl.u32 %v19478_v14, 16 }
  0xfd   : > { %17369 = vmatprep.mubr.msk.bf16.mxu1 %vm391_vm1, %v1641_v39  ;;  %v2260_v39 = vshll.u32 %v19473_v15, 16  ;;  %v9572_v15 = vsel %vm2877_vm5, %v9569_v21, %v9571_v35  ;;  %v10123_v21 = vshll.u32 %v19479_v5, 16  ;;  %v19485_v5 = vld [vmem:[%s20011_s9 + $0x78] sm:$0xff]  }
  0xfe   : > { %v20613_v38 = vrot.slane %v10112_v20, 2  ;;  %v2245_v61 = vor.u32 %v20523_v17, %v20521_v29  ;;  %v2314_v20 = vshll.u32 %v19486_v6, 16 }
  0xff   : > { %v20549_v54 = vrot.slane %v2260_v39, 2  ;;  %v19482_v39 = vld [vmem:[%s20011_s9 + $0x70] sm:$0xff]   ;;  %v10125_v1 = vrot.slane %v10123_v21, 3 }
 0x100   : > { %17892 = vmatmul.mubr.msk.bf16.gmra.mrb[12].mxu0 %vm391_vm1, %v9564_v48  ;;  %v20544_v48 = vrot.slane %v2257_v32, 1  ;;  %v19481_v32 = vld [vmem:[%s20011_s9 + $0x68] sm:$0xff]   ;;  %v2246_v29 = vsel %vm2166_vm3, %v2236_v28, %v2245_v61 }
 0x101   : > { %17895 = vmatprep.mubr.msk.bf16.mxu0 %vm391_vm1, %v9566_v58  ;;  %v2278_v58 = vshll.u32 %v19477_v45, 16  ;;  %v2287_v45 = vshll.u32 %v19481_v32, 16  ;;  %v10126_v56 = vor.u32 %v10125_v1, %v20594_v30  ;;  %v19491_v1 = vld [vmem:[%s20011_s9 + $0x54] sm:$0xff]  }
 0x102   : > { %v2263_v16 = vor.u32 %v20549_v54, %v20544_v48 }
 0x103   : > { %v2289_v14 = vrot.slane %v2287_v45, 2  ;;  %v10159_v45 = vshll.u32 %v19487_v36, 16 }
 0x104   : > { %17370 = vmatmul.mubr.msk.bf16.gmra.mrb[36].mxu1 %vm391_vm1, %v1643_v52  ;;  %v19480_v52 = vld [vmem:[%s20011_s9 + $0x2c] sm:$0xff]  }
 0x105   : > { %17375 = vmatprep.mubr.msk.bf16.mxu1 %vm391_vm1, %v2183_v18  ;;  %v2271_v18 = vrot.slane %v2269_v0, 2  ;;  %v10129_v55 = vshrl.u32 %v19480_v52, 16  ;;  %v2254_v0 = vor.u32 %v20540_v44, %v20533_v33 }
 0x107   : > { %v20609_v8 = vrot.slane %v10129_v55, 2  ;;  %v2255_v17 = vsel %vm2166_vm3, %v2245_v61, %v2254_v0  ;;  %v2272_v21 = vor.u32 %v2271_v18, %v20582_v4  ;;  %v9584_v55 = vsel %vm2877_vm5, %v9581_v37, %v9583_v31  ;;  %v19488_v18 = vld [vmem:[%s20011_s9 + $0x4c] sm:$0xff]  }
 0x108   : > { %17896 = vmatmul.mubr.msk.bf16.gmra.mrb[16].mxu0 %vm391_vm1, %v9568_v43  ;;  %v9578_v43 = vsel %vm2877_vm5, %v9575_v2, %v9577_v12  ;;  %v20620_v2 = vsel %vm452_vm0, %v20399_v22, 0  ;;  %v9580_v22 = vsel %vm2877_vm5, %v9577_v12, %v9579_v60  ;;  %v10150_v60 = vshll.u32 %v19484_v7, 16  ;;  %v19489_v31 = vld [vmem:[%s20011_s9 + $0x88] sm:$0xff]  }
 0x109   : > { %17899 = vmatprep.mubr.msk.bf16.mxu0 %vm391_vm1, %v9570_v40  ;;  %v2284_v40 = vshrl.u32 %v19481_v32, 16  ;;  %v2264_v48 = vsel %vm2166_vm3, %v2254_v0, %v2263_v16  ;;  %v2273_v32 = vsel %vm2166_vm3, %v2263_v16, %v2272_v21  ;;  %v10168_v30 = vshll.u32 %v19488_v18, 16 }
 0x10a   : > { %v10152_v25 = vrot.slane %v10150_v60, 3  ;;  %v2323_v61 = vshll.u32 %v19489_v31, 16 }
 0x10b   : > { %v2286_v44 = vrot.slane %v2284_v40, 1 }
 0x10c   : > { %17376 = vmatmul.mubr.msk.bf16.vlgmr.msra.gmra.mrb[0].mxu1 %vm391_vm1, %v2192_v47  ;;  %v2293_v47 = vshrl.u32 %v19482_v39, 16 }
 0x10d   : > { %17416 = vmatpush3.bf16.msra.mxu1 %v20451_v24  ;;  %17379 = vmatprep.mubr.msk.bf16.mxu1 %vm391_vm1, %v2201_v9  ;;  %v9574_v24 = vsel %vm2877_vm5, %v9571_v35, %v9573_v62  ;;  %v20590_v35 = vrot.slane %v2278_v58, 2  ;;  %v10132_v62 = vshll.u32 %v19480_v52, 16  ;;  %v19483_v9 = vld [vmem:[%s20011_s9 + $0x34] sm:$0xff]   ;;  %v2296_v58 = vshll.u32 %v19482_v39, 16 }
 0x10e   : > { %19264 = vmatprep.subr.msk.bf16.mxu1 %vm452_vm0, %v20558_v49  ;;  %v20645_v52 = vrot.slane %v2293_v47, 1  ;;  %v10138_v12 = vshrl.u32 %v19483_v9, 16  ;;  %v10141_v51 = vshll.u32 %v19483_v9, 16  ;;  %v10165_v47 = vshrl.u32 %v19488_v18, 16 }
 0x10f   : > { %v10134_v33 = vrot.slane %v10132_v62, 3  ;;  %v20647_v46 = vrot.slane %v2296_v58, 2  ;;  %v19490_v62 = vld [vmem:[%s20011_s9 + $0x90] sm:$0xff]   ;;  %v2281_v40 = vor.u32 %v20590_v35, %v20587_v23  ;;  %v2290_v9 = vor.u32 %v2289_v14, %v2286_v44 }
 0x110   : > { %17900 = vmatmul.mubr.msk.bf16.gmra.mrb[20].mxu0 %vm391_vm1, %v9572_v15  ;;  %v10147_v15 = vshrl.u32 %v19484_v7, 16  ;;  %v10140_v54 = vrot.slane %v10138_v12, 2  ;;  %v10143_v28 = vrot.slane %v10141_v51, 3  ;;  %v10161_v23 = vrot.slane %v10159_v45, 3 }
 0x111   : > { %17903 = vmatprep.mubr.msk.bf16.mxu0 %vm391_vm1, %v9574_v24  ;;  %v2302_v24 = vshrl.u32 %v19485_v5, 16  ;;  %v2282_v7 = vsel %vm2166_vm3, %v2272_v21, %v2281_v40  ;;  %v2291_v35 = vsel %vm2166_vm3, %v2281_v40, %v2290_v9  ;;  %v10135_v34 = vor.u32 %v10134_v33, %v20609_v8 }
 0x112   : > { %v10149_v4 = vrot.slane %v10147_v15, 2  ;;  %v2299_v44 = vor.u32 %v20647_v46, %v20645_v52  ;;  %v10177_v51 = vshll.u32 %v19491_v1, 16  ;;  %v19493_v15 = vld [vmem:[%s20011_s9 + $0x98] sm:$0xff]   ;;  %v19495_v46 = vld [vmem:[%s20011_s9 + $0x64] sm:$0xff]  }
 0x113   : > { %v2304_v39 = vrot.slane %v2302_v24, 1  ;;  %v10136_v8 = vsel %vm4004_vm6, %v10126_v56, %v10135_v34  ;;  %v20704_v24 = vld [vmem:[%s22340_s1 + $0x24] sm:$0x3]  ;;  %v10192_v18 = vshrl.u32 %v19495_v46, 16 }
 0x114   : > { %17380 = vmatmul.mubr.msk.bf16.gmra.mrb[4].mxu1 %vm391_vm1, %v2210_v50  ;;  %v2305_v50 = vshll.u32 %v19485_v5, 16  ;;  %v10167_v5 = vrot.slane %v10165_v47, 2  ;;  %v2300_v60 = vsel %vm2166_vm3, %v2290_v9, %v2299_v44 }
 0x115   : > { %17383 = vmatprep.mubr.msk.bf16.mxu1 %vm391_vm1, %v2219_v10  ;;  %v2311_v10 = vshrl.u32 %v19486_v6, 16  ;;  %v2329_v6 = vshrl.u32 %v19490_v62, 16  ;;  %v10194_v47 = vrot.slane %v10192_v18, 2 }
 0x116   : > { %v2307_v37 = vrot.slane %v2305_v50, 2 }
 0x117   : > { %v2331_v12 = vrot.slane %v2329_v6, 1 }
 0x118   : > { %17904 = vmatmul.mubr.msk.bf16.gmra.mrb[24].mxu0 %vm391_vm1, %v9576_v42  ;;  %v10118_v42 = vor.u32 %v20616_v41, %v20613_v38  ;;  %v9588_v38 = vsel %vm2877_vm5, %v9585_v59, %v9587_v57  ;;  %v2320_v41 = vshrl.u32 %v19489_v31, 16  ;;  %v10170_v59 = vrot.slane %v10168_v30, 3 }
 0x119   : > { %17907 = vmatprep.mubr.msk.bf16.mxu0 %vm391_vm1, %v9578_v43  ;;  %v2313_v43 = vrot.slane %v2311_v10, 1  ;;  %v10144_v57 = vor.u32 %v10143_v28, %v10140_v54  ;;  %v2308_v14 = vor.u32 %v2307_v37, %v2304_v39  ;;  %v10153_v10 = vor.u32 %v10152_v25, %v10149_v4 }
 0x11a   : > { %v10127_v0 = vsel %vm4004_vm6, %v10118_v42, %v10126_v56  ;;  %v2322_v11 = vrot.slane %v2320_v41, 1 }
 0x11b   : > { %v10145_v33 = vsel %vm4004_vm6, %v10135_v34, %v10144_v57  ;;  %v2309_v50 = vsel %vm2166_vm3, %v2299_v44, %v2308_v14  ;;  %v10154_v4 = vsel %vm4004_vm6, %v10144_v57, %v10153_v10  ;;  %v19497_v34 = vld [vmem:[%s20011_s9] sm:$0xfc]  }
 0x11c   : > { %17384 = vmatmul.mubr.msk.bf16.gmra.mrb[8].mxu1 %vm391_vm1, %v2228_v19  ;;  %v2316_v19 = vrot.slane %v2314_v20, 2  ;;  %v19501_v44 = vld [vmem:[%s20011_s9 + $0x7c] sm:$0xff]  }
 0x11d   : > { %17387 = vmatprep.mubr.msk.bf16.mxu1 %vm391_vm1, %v2237_v26  ;;  %v10156_v26 = vshrl.u32 %v19487_v36, 16  ;;  %v10179_v36 = vrot.slane %v10177_v51, 3  ;;  %v19504_v51 = vld [vmem:[%s20011_s9 + $0x84] sm:$0xff]  }
 0x11e   : > { %v2317_v54 = vor.u32 %v2316_v19, %v2313_v43  ;;  %v10171_v43 = vor.u32 %v10170_v59, %v10167_v5 }
 0x11f   : > { %v10158_v58 = vrot.slane %v10156_v26, 2  ;;  %v10195_v26 = vshll.u32 %v19495_v46, 16 }
 0x120   : > { %17908 = vmatmul.mubr.msk.bf16.gmra.mrb[28].mxu0 %vm391_vm1, %v9580_v22  ;;  %v2325_v22 = vrot.slane %v2323_v61, 2  ;;  %v2318_v39 = vsel %vm2166_vm3, %v2308_v14, %v2317_v54 }
 0x121   : > { %17911 = vmatprep.mubr.msk.bf16.mxu0 %vm391_vm1, %v9582_v13  ;;  %v2332_v13 = vshll.u32 %v19490_v62, 16  ;;  %v10162_v16 = vor.u32 %v10161_v23, %v10158_v58  ;;  %v10197_v61 = vrot.slane %v10195_v26, 3 }
 0x122   : > { %v2326_v28 = vor.u32 %v2325_v22, %v2322_v11 }
 0x123   : > { %v2334_v21 = vrot.slane %v2332_v13, 2  ;;  %v10163_v25 = vsel %vm4004_vm6, %v10153_v10, %v10162_v16  ;;  %v10198_v22 = vor.u32 %v10197_v61, %v10194_v47  ;;  %v10219_v10 = vshrl.u32 %v19501_v44, 16 }
 0x124   : > { %17388 = vmatmul.mubr.msk.bf16.gmra.mrb[12].mxu1 %vm391_vm1, %v2246_v29  ;;  %v10174_v29 = vshrl.u32 %v19491_v1, 16  ;;  %v2327_v31 = vsel %vm2166_vm3, %v2317_v54, %v2326_v28 }
 0x125   : > { %17391 = vmatprep.mubr.msk.bf16.mxu1 %vm391_vm1, %v2255_v17  ;;  %v19492_v17 = vld [vmem:[%s20011_s9 + $0x5c] sm:$0xff]   ;;  %v2335_v1 = vor.u32 %v2334_v21, %v2331_v12  ;;  %v2878_v12 = vrot.slane %v19497_v34, 2  ;;  %v19505_v21 = vld [vmem:[%s20011_s9 + $0x8c] sm:$0xff]  }
 0x126   : > { %v10183_v52 = vshrl.u32 %v19492_v17, 16  ;;  %v10176_v20 = vrot.slane %v10174_v29, 2 }
 0x127   : > { %v2336_v23 = vsel %vm2166_vm3, %v2326_v28, %v2335_v1  ;;  %v10221_v28 = vrot.slane %v10219_v10, 2  ;;  %v19516_v10 = vld [vmem:[%s20011_s9 + $0xb4] sm:$0xff]  }
 0x128   : > { %17912 = vmatmul.mubr.msk.bf16.gmra.mrb[32].mxu0 %vm391_vm1, %v9584_v55  ;;  %v10186_v55 = vshll.u32 %v19492_v17, 16  ;;  %v10185_v56 = vrot.slane %v10183_v52, 2  ;;  %v10180_v19 = vor.u32 %v10179_v36, %v10176_v20  ;;  %v19502_v52 = vld [vmem:[%s20011_s9 + $0x18] sm:$0xff]   ;;  %v10228_v36 = vshrl.u32 %v19504_v51, 16 }
 0x129   : > { %17915 = vmatprep.mubr.msk.bf16.mxu0 %vm391_vm1, %v9586_v27  ;;  %v2338_v27 = vshrl.u32 %v19493_v15, 16  ;;  %v2883_v54 = vrot.slane %v19502_v52, 2 }
 0x12a   : > { %v10188_v62 = vrot.slane %v10186_v55, 3  ;;  %v10181_v58 = vsel %vm4004_vm6, %v10171_v43, %v10180_v19 }
 0x12b   : > { %v2340_v37 = vrot.slane %v2338_v27, 1 }
 0x12c   : > { %17392 = vmatmul.mubr.msk.bf16.gmra.mrb[16].mxu1 %vm391_vm1, %v2264_v48  ;;  %v2341_v48 = vshll.u32 %v19493_v15, 16  ;;  %v10189_v59 = vor.u32 %v10188_v62, %v10185_v56  ;;  %v10230_v56 = vrot.slane %v10228_v36, 2  ;;  %v3543_v62 = vsel %vm452_vm0, %v20558_v49, 0 }
 0x12d   : > { %17395 = vmatprep.mubr.msk.bf16.mxu1 %vm391_vm1, %v2273_v32  ;;  %v19496_v32 = vld [vmem:[%s20011_s9 + $0x6c] sm:$0xff]  }
 0x12e   : > { %v2343_v42 = vrot.slane %v2341_v48, 2  ;;  %v10201_v9 = vshrl.u32 %v19496_v32, 16  ;;  %v10204_v30 = vshll.u32 %v19496_v32, 16  ;;  %v10190_v15 = vsel %vm4004_vm6, %v10180_v19, %v10189_v59  ;;  %v19503_v32 = vld [vmem:[%s20011_s9 + $0x20] sm:$0xff]  }
 0x130   : > { %17916 = vmatmul.mubr.msk.bf16.gmra.mrb[36].mxu0 %vm391_vm1, %v9588_v38  ;;  %v19498_v38 = vld [vmem:[%s20011_s9 + $0x8] sm:$0xff]   ;;  %v2344_v41 = vor.u32 %v2343_v42, %v2340_v37  ;;  %v10203_v11 = vrot.slane %v10201_v9, 2  ;;  %v10206_v13 = vrot.slane %v10204_v30, 3  ;;  %v19508_v37 = vld [vmem:[%s20011_s9 + $0x94] sm:$0xff]  }
 0x131   : > { %17921 = vmatprep.mubr.msk.bf16.mxu0 %vm391_vm1, %v10127_v0  ;;  %v19500_v0 = vld [vmem:[%s20011_s9 + $0x74] sm:$0xff]   ;;  %v2879_v57 = vrot.slane %v19498_v38, 2  ;;  %v20764_v38 = vld [vmem:[%s22340_s1 + $0xc] sm:$0x3]  ;;  %v10249_v61 = vshll.u32 %v19508_v37, 16 }
 0x132   : > { %v2345_v6 = vsel %vm2166_vm3, %v2335_v1, %v2344_v41  ;;  %v10210_v29 = vshrl.u32 %v19500_v0, 16  ;;  %v10213_v17 = vshll.u32 %v19500_v0, 16  ;;  %v10207_v55 = vor.u32 %v10206_v13, %v10203_v11 }
 0x133   : > { %v2880_v20 = vsel %vm2877_vm5, %v2878_v12, %v2879_v57 }
 0x134   : > { %17396 = vmatmul.mubr.msk.bf16.gmra.mrb[20].mxu1 %vm391_vm1, %v2282_v7  ;;  %v10172_v7 = vsel %vm4004_vm6, %v10162_v16, %v10171_v43  ;;  %v10222_v16 = vshll.u32 %v19501_v44, 16  ;;  %v19509_v43 = vld [vmem:[%s20011_s9 + $0x9c] sm:$0xff]  }
 0x135   : > { %17399 = vmatprep.mubr.msk.bf16.mxu1 %vm391_vm1, %v2291_v35  ;;  %v10255_v0 = vshrl.u32 %v19509_v43, 16 }
 0x136   : > { %v10224_v18 = vrot.slane %v10222_v16, 3 }
 0x137   : > { %v10257_v12 = vrot.slane %v10255_v0, 2  ;;  %v19521_v0 = vld [vmem:[%s20011_s9 + $0x24] sm:$0xff]  }
 0x138   : > { %17922 = vmatmul.mubr.msk.bf16.vlgmr.msra.gmra.mrb[0].mxu0 %vm391_vm1, %v10136_v8  ;;  %v10199_v8 = vsel %vm4004_vm6, %v10189_v59, %v10198_v22  ;;  %v10225_v9 = vor.u32 %v10224_v18, %v10221_v28  ;;  %v10251_v59 = vrot.slane %v10249_v61, 3  ;;  %v10285_v28 = vshll.u32 %v19516_v10, 16  ;;  %v19520_v61 = vld [vmem:[%s20011_s9 + $0x1c] sm:$0xf8]  }
 0x139   : > { %17962 = vmatpush3.bf16.msra.mxu0 %v20620_v2  ;;  %17925 = vmatprep.mubr.msk.bf16.mxu0 %vm391_vm1, %v10145_v33  ;;  %v19494_v2 = vld [vmem:[%s20011_s9 + $0xa0] ss:$0 sps:$4 sm:$0x33]   ;;  %v19499_v33 = vld [vmem:[%s20011_s9 + $0x10] sm:$0xff]  }
 0x13a   : > { %19278 = vmatprep.subr.msk.bf16.mxu0 %vm452_vm0, %v20704_v24  ;;  %v2347_v40 = vshrl.u32 %v19494_v2, 16  ;;  %v2350_v45 = vshll.u32 %v19494_v2, 16  ;;  %v2881_v27 = vrot.slane %v19499_v33, 2  ;;  %v10231_v2 = vshll.u32 %v19504_v51, 16 }
 0x13c   : > { %17400 = vmatmul.mubr.msk.bf16.gmra.mrb[24].mxu1 %vm391_vm1, %v2300_v60  ;;  %v2349_v35 = vrot.slane %v2347_v40, 1  ;;  %v2352_v5 = vrot.slane %v2350_v45, 2  ;;  %v10212_v60 = vrot.slane %v10210_v29, 2  ;;  %v10233_v26 = vrot.slane %v10231_v2, 3 }
 0x13d   : > { %17403 = vmatprep.mubr.msk.bf16.mxu1 %vm391_vm1, %v2309_v50  ;;  %v10215_v50 = vrot.slane %v10213_v17, 3  ;;  %v2882_v19 = vsel %vm2877_vm5, %v2879_v57, %v2881_v27  ;;  %v2884_v40 = vsel %vm2877_vm5, %v2881_v27, %v2883_v54  ;;  %v2885_v45 = vrot.slane %v19503_v32, 2 }
 0x13e   : > { %v2353_v14 = vor.u32 %v2352_v5, %v2349_v35  ;;  %v10234_v49 = vor.u32 %v10233_v26, %v10230_v56  ;;  %v19512_v35 = vld [vmem:[%s20011_s9 + $0xa4] sm:$0xff]   ;;  %v10282_v2 = vshrl.u32 %v19516_v10, 16 }
 0x13f   : > { %v10216_v48 = vor.u32 %v10215_v50, %v10212_v60  ;;  %v2886_v11 = vsel %vm2877_vm5, %v2883_v54, %v2885_v45  ;;  %v10264_v57 = vshrl.u32 %v19512_v35, 16 }
 0x140   : > { %17926 = vmatmul.mubr.msk.bf16.gmra.mrb[4].mxu0 %vm391_vm1, %v10154_v4  ;;  %v2354_v46 = vsel %vm2166_vm3, %v2344_v41, %v2353_v14  ;;  %v10237_v4 = vshrl.u32 %v19505_v21, 16  ;;  %v10246_v41 = vshrl.u32 %v19508_v37, 16  ;;  %v10284_v56 = vrot.slane %v10282_v2, 2 }
 0x141   : > { %17929 = vmatprep.mubr.msk.bf16.mxu0 %vm391_vm1, %v10163_v25  ;;  %v10240_v25 = vshll.u32 %v19505_v21, 16  ;;  %v10217_v42 = vsel %vm4004_vm6, %v10207_v55, %v10216_v48  ;;  %v10226_v5 = vsel %vm4004_vm6, %v10216_v48, %v10225_v9  ;;  %v10266_v33 = vrot.slane %v10264_v57, 2 }
 0x142   : > { %v10239_v47 = vrot.slane %v10237_v4, 2  ;;  %v10248_v34 = vrot.slane %v10246_v41, 2  ;;  %v19517_v4 = vld [vmem:[%s20011_s9 + $0xbc] ss:$0 sps:$4 sm:$0x77]   ;;  %v10287_v37 = vrot.slane %v10285_v28, 3 }
 0x143   : > { %v10242_v30 = vrot.slane %v10240_v25, 3  ;;  %v20849_v28 = vld [vmem:[%s20011_s9 + $0x54] sm:$0xff]  }
 0x144   : > { %17404 = vmatmul.mubr.msk.bf16.gmra.mrb[28].mxu1 %vm391_vm1, %v2318_v39  ;;  %v19506_v39 = vld [vmem:[%s20011_s9 + $0x28] sm:$0xff]   ;;  %v10252_v14 = vor.u32 %v10251_v59, %v10248_v34  ;;  %v10822_v34 = vrot.slane %v19521_v0, 3 }
 0x145   : > { %17407 = vmatprep.mubr.msk.bf16.mxu1 %vm391_vm1, %v2327_v31  ;;  %v10208_v31 = vsel %vm4004_vm6, %v10198_v22, %v10207_v55  ;;  %v2887_v1 = vrot.slane %v19506_v39, 2  ;;  %v19513_v22 = vld [vmem:[%s20011_s9 + $0xac] sm:$0xff]   ;;  %v10243_v29 = vor.u32 %v10242_v30, %v10239_v47 }
 0x146   : > { %v10273_v60 = vshrl.u32 %v19513_v22, 16  ;;  %v10276_v21 = vshll.u32 %v19513_v22, 16  ;;  %v19522_v22 = vld [vmem:[%s20011_s9 + $0x2c] sm:$0xff]  }
 0x147   : > { %v2888_v13 = vsel %vm2877_vm5, %v2885_v45, %v2887_v1  ;;  %v10244_v50 = vsel %vm4004_vm6, %v10234_v49, %v10243_v29  ;;  %v10253_v52 = vsel %vm4004_vm6, %v10243_v29, %v10252_v14  ;;  %v10288_v45 = vor.u32 %v10287_v37, %v10284_v56  ;;  %v19525_v29 = vld [vmem:[%s20011_s9 + $0x34] sm:$0xff]   ;;  %v20865_v56 = vld [vmem:[%s20011_s9 + $0x64] sm:$0xff]  }
 0x148   : > { %17930 = vmatmul.mubr.msk.bf16.gmra.mrb[8].mxu0 %vm391_vm1, %v10172_v7  ;;  %v19507_v7 = vld [vmem:[%s20011_s9 + $0x30] sm:$0xff]   ;;  %v10275_v54 = vrot.slane %v10273_v60, 2  ;;  %v10278_v18 = vrot.slane %v10276_v21, 3  ;;  %v20898_v0 = vld [vmem:[%s20011_s9 + $0x28] sm:$0xff]  }
 0x149   : > { %17933 = vmatprep.mubr.msk.bf16.mxu0 %vm391_vm1, %v10181_v58  ;;  %v10258_v58 = vshll.u32 %v19509_v43, 16  ;;  %v2889_v17 = vrot.slane %v19507_v7, 2  ;;  %v19518_v43 = vld [vmem:[%s20011_s9 + $0x58] sm:$0xff]  }
 0x14b   : > { %v10260_v51 = vrot.slane %v10258_v58, 3  ;;  %v2890_v16 = vsel %vm2877_vm5, %v2887_v1, %v2889_v17  ;;  %v19519_v58 = vld [vmem:[%s20011_s9 + $0x60] sm:$0xff]  }
 0x14c   : > { %17408 = vmatmul.mubr.msk.bf16.gmra.mrb[32].mxu1 %vm391_vm1, %v2336_v23  ;;  %v19510_v23 = vld [vmem:[%s20011_s9 + $0x38] sm:$0xff]   ;;  %v2901_v59 = vrot.slane %v19519_v58, 2  ;;  %v20903_v58 = vld [vmem:[%s20011_s9 + $0x84] sm:$0xff]  }
 0x14d   : > { %17411 = vmatprep.mubr.msk.bf16.mxu1 %vm391_vm1, %v2345_v6  ;;  %v10235_v6 = vsel %vm4004_vm6, %v10225_v9, %v10234_v49  ;;  %v2891_v44 = vrot.slane %v19510_v23, 2  ;;  %v10261_v55 = vor.u32 %v10260_v51, %v10257_v12  ;;  %v2899_v9 = vrot.slane %v19518_v43, 2  ;;  %v19527_v12 = vld [vmem:[%s20011_s9 + $0x78] sm:$0xff]  }
 0x14e   : > { %v10824_v51 = vrot.slane %v19522_v22, 3  ;;  %v2907_v60 = vrot.slane %v19527_v12, 2  ;;  %v20921_v22 = vld [vmem:[%s20011_s9 + $0x94] sm:$0xff]  }
 0x14f   : > { %v2892_v36 = vsel %vm2877_vm5, %v2889_v17, %v2891_v44  ;;  %v10262_v25 = vsel %vm4004_vm6, %v10252_v14, %v10261_v55  ;;  %v2902_v17 = vsel %vm2877_vm5, %v2899_v9, %v2901_v59 }
 0x150   : > { %17934 = vmatmul.mubr.msk.bf16.gmra.mrb[12].mxu0 %vm391_vm1, %v10190_v15  ;;  %v10267_v15 = vshll.u32 %v19512_v35, 16  ;;  %v19523_v35 = vld [vmem:[%s20011_s9 + $0x68] sm:$0xff]  }
 0x151   : > { %17937 = vmatprep.mubr.msk.bf16.mxu0 %vm391_vm1, %v10199_v8  ;;  %v19511_v8 = vld [vmem:[%s20011_s9 + $0x40] sm:$0xff]  }
 0x152   : > { %v2893_v27 = vrot.slane %v19511_v8, 2 }
 0x154   : > { %17412 = vmatmul.mubr.msk.bf16.gmra.mrb[36].mxu1 %vm391_vm1, %v2354_v46  ;;  %v10269_v46 = vrot.slane %v10267_v15, 3  ;;  %v10826_v15 = vrot.slane %v19525_v29, 3 }
 0x155   : > { %17417 = vmatprep.mubr.msk.bf16.mxu1 %vm391_vm1, %v2880_v20  ;;  %v19514_v20 = vld [vmem:[%s20011_s9 + $0x48] sm:$0xff]  }
 0x156   : > { %v10270_v48 = vor.u32 %v10269_v46, %v10266_v33  ;;  %v2895_v32 = vrot.slane %v19514_v20, 2  ;;  %v19526_v33 = vld [vmem:[%s20011_s9 + $0x3c] sm:$0xff]   ;;  %v11633_v46 = vsel %vm452_vm0, %v20704_v24, 0  ;;  %v10827_v10 = vsel %vm4715_vm7, %v10824_v51, %v10826_v15  ;;  %v20839_v20 = vld [vmem:[%s22340_s1 + $0x26] sm:$0x3]  ;;  %v19530_v24 = vld [vmem:[%s20011_s9 + $0x4c] sm:$0xff]  }
 0x158   : > { %17938 = vmatmul.mubr.msk.bf16.gmra.mrb[16].mxu0 %vm391_vm1, %v10208_v31  ;;  %v10271_v39 = vsel %vm4004_vm6, %v10261_v55, %v10270_v48  ;;  %v2894_v31 = vsel %vm2877_vm5, %v2891_v44, %v2893_v27  ;;  %v2896_v26 = vsel %vm2877_vm5, %v2893_v27, %v2895_v32  ;;  %v19524_v44 = vld [vmem:[%s20011_s9 + $0x70] sm:$0xff]   ;;  %v19531_v27 = vld [vmem:[%s20011_s9 + $0x88] sm:$0xff]  }
 0x159   : > { %17941 = vmatprep.mubr.msk.bf16.mxu0 %vm391_vm1, %v10217_v42  ;;  %v19515_v42 = vld [vmem:[%s20011_s9 + $0x50] sm:$0xff]   ;;  %v2905_v8 = vrot.slane %v19524_v44, 2 }
 0x15a   : > { %v2897_v47 = vrot.slane %v19515_v42, 2  ;;  %v20869_v42 = vld [vmem:[%s20011_s9 + $0x6c] sm:$0xff]  }
 0x15b   : > { %v2908_v55 = vsel %vm2877_vm5, %v2905_v8, %v2907_v60 }
 0x15c   : > { %17418 = vmatmul.mubr.msk.bf16.vlgmr.msra.gmra.mrb[0].mxu1 %vm391_vm1, %v2882_v19  ;;  %v10279_v19 = vor.u32 %v10278_v18, %v10275_v54  ;;  %v2898_v7 = vsel %vm2877_vm5, %v2895_v32, %v2897_v47  ;;  %v2900_v23 = vsel %vm2877_vm5, %v2897_v47, %v2899_v9  ;;  %v19532_v54 = vld [vmem:[%s20011_s9 + $0x90] sm:$0xff]   ;;  %v20855_v18 = vld [vmem:[%s20011_s9 + $0x5c] sm:$0xff]  }
 0x15d   : > { %17458 = vmatpush3.bf16.msra.mxu1 %v3543_v62  ;;  %17421 = vmatprep.mubr.msk.bf16.mxu1 %vm391_vm1, %v2884_v40  ;;  %v10291_v62 = vshrl.u32 %v19517_v4, 16  ;;  %v10294_v40 = vshll.u32 %v19517_v4, 16  ;;  %v20858_v32 = vld [vmem:[%s20011_s9 + $0xa0] ss:$0 sps:$4 sm:$0x33]   ;;  %v2911_v4 = vrot.slane %v19531_v27, 2 }
 0x15e   : > { %19265 = vmatprep.subr.msk.bf16.mxu1 %vm452_vm0, %v20764_v38  ;;  %v10280_v30 = vsel %vm4004_vm6, %v10270_v48, %v10279_v19  ;;  %v10289_v41 = vsel %vm4004_vm6, %v10279_v19, %v10288_v45  ;;  %v2913_v19 = vrot.slane %v19532_v54, 2  ;;  %v10836_v9 = vrot.slane %v20855_v18, 3  ;;  %v20962_v27 = vld [vmem:[%s20011_s9 + $0x50] sm:$0xff]  }
 0x15f   : > { %v10293_v1 = vrot.slane %v10291_v62, 2  ;;  %v10296_v49 = vrot.slane %v10294_v40, 3  ;;  %v10834_v62 = vrot.slane %v20849_v28, 3  ;;  %v20877_v40 = vld [vmem:[%s20011_s9 + $0x10] sm:$0xff]   ;;  %v19562_v28 = vld [vmem:[%s20011_s9 + $0x1c] sm:$0xf8]  }
 0x160   : > { %17942 = vmatmul.mubr.msk.bf16.gmra.mrb[20].mxu0 %vm391_vm1, %v10226_v5  ;;  %v2914_v12 = vsel %vm2877_vm5, %v2911_v4, %v2913_v19  ;;  %v20968_v54 = vld [vmem:[%s20011_s9 + $0xb4] sm:$0xff]  }
 0x161   : > { %17945 = vmatprep.mubr.msk.bf16.mxu0 %vm391_vm1, %v10235_v6  ;;  %v10297_v5 = vor.u32 %v10296_v49, %v10293_v1  ;;  %v10821_v6 = vrot.slane %v19520_v61, 3  ;;  %v20887_v1 = vld [vmem:[%s20011_s9 + $0x74] sm:$0xff]   ;;  %v20890_v49 = vld [vmem:[%s20011_s9 + $0x7c] sm:$0xff]   ;;  %v10837_v18 = vsel %vm4715_vm7, %v10834_v62, %v10836_v9 }
 0x162   : > { %v20895_v61 = vld [vmem:[%s20011_s9 + $0x20] sm:$0xff]   ;;  %v10842_v29 = vrot.slane %v20887_v1, 3  ;;  %v10844_v44 = vrot.slane %v20890_v49, 3 }
 0x163   : > { %v10298_v57 = vsel %vm4004_vm6, %v10288_v45, %v10297_v5  ;;  %v20880_v45 = vld [vmem:[%s20011_s9 + $0x18] sm:$0xff]   ;;  %v20909_v5 = vld [vmem:[%s20011_s9 + $0x8c] sm:$0xff]  }
 0x164   : > { %17422 = vmatmul.mubr.msk.bf16.gmra.mrb[4].mxu1 %vm391_vm1, %v2886_v11  ;;  %v2903_v11 = vrot.slane %v19523_v35, 2 }
 0x165   : > { %17425 = vmatprep.mubr.msk.bf16.mxu1 %vm391_vm1, %v2888_v13  ;;  %v10823_v13 = vsel %vm4715_vm7, %v10821_v6, %v10822_v34  ;;  %v20912_v6 = vld [vmem:[%s20011_s9 + $0x30] sm:$0xff]  }
 0x166   : > { %v2904_v14 = vsel %vm2877_vm5, %v2901_v59, %v2903_v11  ;;  %v2906_v21 = vsel %vm2877_vm5, %v2903_v11, %v2905_v8  ;;  %v20916_v59 = vld [vmem:[%s20011_s9 + $0x38] sm:$0xff]   ;;  %v3448_v8 = vrot.slane %v20898_v0, 2 }
 0x168   : > { %17946 = vmatmul.mubr.msk.bf16.gmra.mrb[24].mxu0 %vm391_vm1, %v10244_v50  ;;  %v10825_v50 = vsel %vm4715_vm7, %v10822_v34, %v10824_v51  ;;  %v3442_v34 = vrot.slane %v20877_v40, 2  ;;  %v21037_v40 = vld [vmem:[%s22340_s1 + $0xe] sm:$0x3] }
 0x169   : > { %17949 = vmatprep.mubr.msk.bf16.mxu0 %vm391_vm1, %v10253_v52  ;;  %v19528_v52 = vld [vmem:[%s20011_s9 + $0x80] sm:$0xff]  }
 0x16a   : > { %v2909_v48 = vrot.slane %v19528_v52, 2  ;;  %v3450_v52 = vrot.slane %v20912_v6, 2 }
 0x16c   : > { %17426 = vmatmul.mubr.msk.bf16.gmra.mrb[8].mxu1 %vm391_vm1, %v2890_v16  ;;  %v19529_v16 = vld [vmem:[%s20011_s9 + $0x44] sm:$0xff]   ;;  %v2910_v43 = vsel %vm2877_vm5, %v2907_v60, %v2909_v48  ;;  %v2912_v47 = vsel %vm2877_vm5, %v2909_v48, %v2911_v4  ;;  %v20965_v48 = vld [vmem:[%s20011_s9 + $0x58] sm:$0xff]   ;;  %v3451_v49 = vsel %vm2877_vm5, %v3448_v8, %v3450_v52 }
 0x16d   : > { %17429 = vmatprep.mubr.msk.bf16.mxu1 %vm391_vm1, %v2892_v36  ;;  %v10828_v36 = vrot.slane %v19526_v33, 3  ;;  %v10830_v2 = vrot.slane %v19529_v16, 3  ;;  %v20938_v33 = vld [vmem:[%s20011_s9 + $0x40] sm:$0xff]   ;;  %v20941_v60 = vld [vmem:[%s20011_s9 + $0x48] sm:$0xff]  }
 0x16e   : > { %v20951_v16 = vld [vmem:[%s20011_s9 + $0xa4] sm:$0xff]  }
 0x16f   : > { %v10831_v37 = vsel %vm4715_vm7, %v10828_v36, %v10830_v2  ;;  %v19563_v4 = vld [vmem:[%s20011_s9 + $0x24] sm:$0xff]  }
 0x170   : > { %17950 = vmatmul.mubr.msk.bf16.gmra.mrb[28].mxu0 %vm391_vm1, %v10262_v25  ;;  %v20861_v25 = vld [vmem:[%s20011_s9 + $0x98] sm:$0xff]  }
 0x171   : > { %17953 = vmatprep.mubr.msk.bf16.mxu0 %vm391_vm1, %v10271_v39  ;;  %v10829_v39 = vsel %vm4715_vm7, %v10826_v15, %v10828_v36  ;;  %v3446_v15 = vrot.slane %v20895_v61, 2  ;;  %v20956_v36 = vld [vmem:[%s20011_s9 + $0xac] sm:$0xff]  }
 0x173   : > { %v3449_v1 = vsel %vm2877_vm5, %v3446_v15, %v3448_v8 }
 0x174   : > { %17430 = vmatmul.mubr.msk.bf16.gmra.mrb[12].mxu1 %vm391_vm1, %v2894_v31  ;;  %v10832_v31 = vrot.slane %v19530_v24, 3  ;;  %v3456_v24 = vrot.slane %v20941_v60, 2  ;;  %v19582_v60 = vld [vmem:[%s20011_s9 + $0x10] sm:$0xff]  }
 0x175   : > { %17433 = vmatprep.mubr.msk.bf16.mxu1 %vm391_vm1, %v2896_v26  ;;  %v20872_v26 = vld [vmem:[%s20011_s9 + $0x8] sm:$0xfc]  }
 0x176   : > { %v3441_v35 = vrot.slane %v20872_v26, 2  ;;  %v10833_v11 = vsel %vm4715_vm7, %v10830_v2, %v10832_v31  ;;  %v20971_v2 = vld [vmem:[%s20011_s9 + $0xbc] ss:$0 sps:$4 sm:$0x77]   ;;  %v3458_v26 = vrot.slane %v20962_v27, 2 }
 0x178   : > { %17954 = vmatmul.mubr.msk.bf16.gmra.mrb[32].mxu0 %vm391_vm1, %v10280_v30  ;;  %v2915_v30 = vrot.slane %v20861_v25, 2 }
 0x179   : > { %17957 = vmatprep.mubr.msk.bf16.mxu0 %vm391_vm1, %v10289_v41  ;;  %v2917_v41 = vrot.slane %v20858_v32, 2  ;;  %v10854_v32 = vrot.slane %v20951_v16, 3  ;;  %v19584_v16 = vld [vmem:[%s20011_s9 + $0x74] sm:$0xff]  }
 0x17a   : > { %v2916_v51 = vsel %vm2877_vm5, %v2913_v19, %v2915_v30  ;;  %v3443_v19 = vsel %vm2877_vm5, %v3441_v35, %v3442_v34  ;;  %v11396_v35 = vshll.u32 %v19563_v4, 16 }
 0x17c   : > { %17434 = vmatmul.mubr.msk.bf16.gmra.mrb[16].mxu1 %vm391_vm1, %v2898_v7  ;;  %v10838_v7 = vrot.slane %v20865_v56, 3 }
 0x17d   : > { %17437 = vmatprep.mubr.msk.bf16.mxu1 %vm391_vm1, %v2900_v23  ;;  %v10840_v23 = vrot.slane %v20869_v42, 3 }
 0x17e   : > { %v10839_v25 = vsel %vm4715_vm7, %v10836_v9, %v10838_v7  ;;  %v10858_v9 = vrot.slane %v20968_v54, 3 }
 0x180   : > { %17958 = vmatmul.mubr.msk.bf16.gmra.mrb[36].mxu0 %vm391_vm1, %v10298_v57  ;;  %v3444_v57 = vrot.slane %v20880_v45, 2 }
 0x181   : > { %17963 = vmatprep.mubr.msk.bf16.mxu0 %vm391_vm1, %v10823_v13  ;;  %v10835_v13 = vsel %vm4715_vm7, %v10832_v31, %v10834_v62  ;;  %v2918_v31 = vsel %vm2877_vm5, %v2915_v30, %v2917_v41  ;;  %v3460_v62 = vrot.slane %v20965_v48, 2  ;;  %v10860_v30 = vrot.slane %v20971_v2, 3 }
 0x182   : > { %v11385_v41 = vshrl.u32 %v19562_v28, 16  ;;  %v3445_v56 = vsel %vm2877_vm5, %v3442_v34, %v3444_v57  ;;  %v3447_v42 = vsel %vm2877_vm5, %v3444_v57, %v3446_v15  ;;  %v21041_v34 = vrot.slane %v11396_v35, 4  ;;  %v21048_v57 = vld [vmem:[%s20011_s9 + $0x78] sm:$0xff]  }
 0x183   : > { %v3466_v35 = vrot.slane %v21023_v63, 2 }
 0x184   : > { %17438 = vmatmul.mubr.msk.bf16.gmra.mrb[20].mxu1 %vm391_vm1, %v2902_v17  ;;  %v20927_v17 = vsel %vm452_vm0, %v20764_v38, 0  ;;  %v10846_v38 = vrot.slane %v20903_v58, 3 }
 0x185   : > { %17441 = vmatprep.mubr.msk.bf16.mxu1 %vm391_vm1, %v2904_v14  ;;  %v20931_v14 = vld [vmem:[%s20011_s9 + $0x9c] sm:$0xff]  }
 0x188   : > { %17964 = vmatmul.mubr.msk.bf16.vlgmr.msra.gmra.mrb[0].mxu0 %vm391_vm1, %v10825_v50  ;;  %v10848_v50 = vrot.slane %v20909_v5, 3 }
 0x189   : > { %18004 = vmatpush3.bf16.msra.mxu0 %v11633_v46  ;;  %17967 = vmatprep.mubr.msk.bf16.mxu0 %vm391_vm1, %v10827_v10  ;;  %v3452_v46 = vrot.slane %v20916_v59, 2  ;;  %v10850_v10 = vrot.slane %v20921_v22, 3 }
 0x18a   : > { %19279 = vmatprep.subr.msk.bf16.mxu0 %vm452_vm0, %v20839_v20 }
 0x18b   : > { %v3453_v58 = vsel %vm2877_vm5, %v3450_v52, %v3452_v46 }
 0x18c   : > { %17442 = vmatmul.mubr.msk.bf16.gmra.mrb[24].mxu1 %vm391_vm1, %v2906_v21  ;;  %v10852_v21 = vrot.slane %v20931_v14, 3  ;;  %v3459_v14 = vsel %vm2877_vm5, %v3456_v24, %v3458_v26 }
 0x18d   : > { %17445 = vmatprep.mubr.msk.bf16.mxu1 %vm391_vm1, %v2908_v55  ;;  %v3454_v55 = vrot.slane %v20938_v33, 2  ;;  %v21181_v33 = vld [vmem:[%s20011_s9 + $0xa8] ss:$0 sps:$4 sm:$0x33]  }
 0x18f   : > { %v3455_v5 = vsel %vm2877_vm5, %v3452_v46, %v3454_v55 }
 0x190   : > { %17968 = vmatmul.mubr.msk.bf16.gmra.mrb[4].mxu0 %vm391_vm1, %v10829_v39  ;;  %v10856_v39 = vrot.slane %v20956_v36, 3 }
 0x191   : > { %17971 = vmatprep.mubr.msk.bf16.mxu0 %vm391_vm1, %v10831_v37  ;;  %v20982_v37 = vld [vmem:[%s20011_s9 + $0x60] sm:$0xff]  }
 0x194   : > { %17446 = vmatmul.mubr.msk.bf16.gmra.mrb[28].mxu1 %vm391_vm1, %v2910_v43  ;;  %v19564_v43 = vld [vmem:[%s20011_s9 + $0x2c] sm:$0xff]  }
 0x195   : > { %17449 = vmatprep.mubr.msk.bf16.mxu1 %vm391_vm1, %v2912_v47  ;;  %v20993_v47 = vld [vmem:[%s20011_s9 + $0x68] sm:$0xff]  }
 0x198   : > { %17972 = vmatmul.mubr.msk.bf16.gmra.mrb[8].mxu0 %vm391_vm1, %v10833_v11  ;;  %v11388_v11 = vshll.u32 %v19562_v28, 16  ;;  %v10843_v28 = vsel %vm4715_vm7, %v10840_v23, %v10842_v29 }
 0x199   : > { %17975 = vmatprep.mubr.msk.bf16.mxu0 %vm391_vm1, %v10835_v13  ;;  %v11393_v13 = vshrl.u32 %v19563_v4, 16  ;;  %v21012_v4 = vrot.slane %v11385_v41, 3 }
 0x19c   : > { %17450 = vmatmul.mubr.msk.bf16.gmra.mrb[32].mxu1 %vm391_vm1, %v2914_v12  ;;  %v3462_v12 = vrot.slane %v20982_v37, 2 }
 0x19d   : > { %17453 = vmatprep.mubr.msk.bf16.mxu1 %vm391_vm1, %v2916_v51  ;;  %v11402_v51 = vshrl.u32 %v19564_v43, 16 }
 0x19e   : > { %v3463_v36 = vsel %vm2877_vm5, %v3460_v62, %v3462_v12 }
 0x19f   : > { %v21043_v41 = vrot.slane %v11402_v51, 3 }
 0x1a0   : > { %17976 = vmatmul.mubr.msk.bf16.gmra.mrb[12].mxu0 %vm391_vm1, %v10837_v18  ;;  %v10841_v18 = vsel %vm4715_vm7, %v10838_v7, %v10840_v23  ;;  %v21020_v7 = vrot.slane %v11388_v11, 4  ;;  %v21031_v23 = vrot.slane %v11393_v13, 3  ;;  %v21054_v11 = vsel %vm452_vm0, %v20839_v20, 0 }
 0x1a1   : > { %17979 = vmatprep.mubr.msk.bf16.mxu0 %vm391_vm1, %v10839_v25  ;;  %v3464_v25 = vrot.slane %v20993_v47, 2  ;;  %v10847_v20 = vsel %vm4715_vm7, %v10844_v44, %v10846_v38 }
 0x1a3   : > { %v3467_v54 = vsel %vm2877_vm5, %v3464_v25, %v3466_v35 }
 0x1a4   : > { %17454 = vmatmul.mubr.msk.bf16.gmra.mrb[36].mxu1 %vm391_vm1, %v2918_v31  ;;  %v11405_v31 = vshll.u32 %v19564_v43, 16  ;;  %v19568_v43 = vld [vmem:[%s20011_s9 + $0x3c] sm:$0xff]  }
 0x1a5   : > { %17459 = vmatprep.mubr.msk.bf16.mxu1 %vm391_vm1, %v3443_v19  ;;  %v19567_v19 = vld [vmem:[%s20011_s9 + $0x34] sm:$0xff]   ;;  %v11420_v51 = vshrl.u32 %v19568_v43, 16 }
 0x1a6   : > { %v21045_v45 = vrot.slane %v11405_v31, 4  ;;  %v11411_v13 = vshrl.u32 %v19567_v19, 16  ;;  %v11423_v31 = vshll.u32 %v19568_v43, 16  ;;  %v21097_v43 = vld [vmem:[%s20011_s9 + $0x88] sm:$0xff]  }
 0x1a7   : > { %v21092_v61 = vrot.slane %v11420_v51, 3  ;;  %v10849_v51 = vsel %vm4715_vm7, %v10846_v38, %v10848_v50  ;;  %v21125_v38 = vld [vmem:[%s20011_s9 + $0x98] sm:$0xff]  }
 0x1a8   : > { %17980 = vmatmul.mubr.msk.bf16.gmra.mrb[16].mxu0 %vm391_vm1, %v10841_v18  ;;  %v11414_v18 = vshll.u32 %v19567_v19, 16  ;;  %v19571_v19 = vld [vmem:[%s20011_s9 + $0x44] sm:$0xff]   ;;  %v21094_v15 = vrot.slane %v11423_v31, 4  ;;  %v21108_v31 = vld [vmem:[%s20011_s9 + $0x90] sm:$0xff]   ;;  %v11408_v37 = vor.u32 %v21045_v45, %v21043_v41 }
 0x1a9   : > { %17983 = vmatprep.mubr.msk.bf16.mxu0 %vm391_vm1, %v10843_v28  ;;  %v3468_v28 = vrot.slane %v21048_v57, 2  ;;  %v11432_v8 = vshll.u32 %v19571_v19, 16 }
 0x1ab   : > { %v21135_v6 = vrot.slane %v11432_v8, 4  ;;  %v10853_v8 = vsel %vm4715_vm7, %v10850_v10, %v10852_v21 }
 0x1ac   : > { %17460 = vmatmul.mubr.msk.bf16.vlgmr.msra.gmra.mrb[0].mxu1 %vm391_vm1, %v3445_v56  ;;  %v21076_v56 = vrot.slane %v11411_v13, 3  ;;  %v11429_v13 = vshrl.u32 %v19571_v19, 16  ;;  %v19576_v19 = vld [vmem:[%s20011_s9 + $0x5c] sm:$0xff]  }
 0x1ad   : > { %17500 = vmatpush3.bf16.msra.mxu1 %v20927_v17  ;;  %17463 = vmatprep.mubr.msk.bf16.mxu1 %vm391_vm1, %v3447_v42  ;;  %v10845_v17 = vsel %vm4715_vm7, %v10842_v29, %v10844_v44  ;;  %v21079_v29 = vld [vmem:[%s20011_s9 + $0x80] sm:$0xff]   ;;  %v21087_v44 = vrot.slane %v11414_v18, 4  ;;  %v19572_v42 = vld [vmem:[%s20011_s9 + $0x4c] sm:$0xff]   ;;  %v11456_v59 = vshrl.u32 %v19576_v19, 16  ;;  %v11459_v46 = vshll.u32 %v19576_v19, 16 }
 0x1ae   : > { %19266 = vmatprep.subr.msk.bf16.mxu1 %vm452_vm0, %v21037_v40  ;;  %v11438_v18 = vshrl.u32 %v19572_v42, 16  ;;  %v21122_v0 = vrot.slane %v11429_v13, 3  ;;  %v10855_v19 = vsel %vm4715_vm7, %v10852_v21, %v10854_v32 }
 0x1af   : > { %v21169_v22 = vrot.slane %v11456_v59, 3 }
 0x1b0   : > { %17984 = vmatmul.mubr.msk.bf16.gmra.mrb[20].mxu0 %vm391_vm1, %v10845_v17  ;;  %v19575_v17 = vld [vmem:[%s20011_s9 + $0x54] sm:$0xff]   ;;  %v21137_v52 = vrot.slane %v11438_v18, 3  ;;  %v11435_v57 = vor.u32 %v21135_v6, %v21122_v0  ;;  %v22347_v6 = vrot.slane %v21097_v43, 2 }
 0x1b1   : > { %17987 = vmatprep.mubr.msk.bf16.mxu0 %vm391_vm1, %v10847_v20  ;;  %v11441_v20 = vshll.u32 %v19572_v42, 16  ;;  %v11450_v42 = vshll.u32 %v19575_v17, 16 }
 0x1b3   : > { %v21139_v13 = vrot.slane %v11441_v20, 4  ;;  %v21155_v18 = vrot.slane %v11450_v42, 4  ;;  %v19580_v20 = vld [vmem:[%s20011_s9 + $0x6c] sm:$0xff]  }
 0x1b4   : > { %17464 = vmatmul.mubr.msk.bf16.gmra.mrb[4].mxu1 %vm391_vm1, %v3449_v1  ;;  %v10851_v1 = vsel %vm4715_vm7, %v10848_v50, %v10850_v10  ;;  %v11447_v50 = vshrl.u32 %v19575_v17, 16  ;;  %v21171_v10 = vrot.slane %v11459_v46, 4  ;;  %v11474_v59 = vshrl.u32 %v19580_v20, 16  ;;  %v19583_v17 = vld [vmem:[%s20011_s9 + $0x18] sm:$0xff]  }
 0x1b5   : > { %17467 = vmatprep.mubr.msk.bf16.mxu1 %vm391_vm1, %v3451_v49  ;;  %v11477_v46 = vshll.u32 %v19580_v20, 16  ;;  %v3461_v20 = vsel %vm2877_vm5, %v3458_v26, %v3460_v62  ;;  %v11399_v26 = vor.u32 %v21041_v34, %v21031_v23  ;;  %v4017_v62 = vshll.u32 %v19582_v60, 16 }
 0x1b6   : > { %v21144_v49 = vrot.slane %v11447_v50, 3  ;;  %v3457_v50 = vsel %vm2877_vm5, %v3454_v55, %v3456_v24  ;;  %v10857_v24 = vsel %vm4715_vm7, %v10854_v32, %v10856_v39  ;;  %v21215_v32 = vrot.slane %v11474_v59, 3  ;;  %v19586_v55 = vld [vmem:[%s20011_s9 + $0x20] sm:$0xff]  }
 0x1b7   : > { %v21217_v27 = vrot.slane %v11477_v46, 4  ;;  %v4023_v59 = vshrl.u32 %v19583_v17, 16  ;;  %v11483_v46 = vshrl.u32 %v19584_v16, 16  ;;  %v3465_v23 = vsel %vm2877_vm5, %v3462_v12, %v3464_v25 }
 0x1b8   : > { %17988 = vmatmul.mubr.msk.bf16.gmra.mrb[24].mxu0 %vm391_vm1, %v10849_v51  ;;  %v3474_v51 = vrot.slane %v21108_v31, 2  ;;  %v21251_v2 = vrot.slane %v4017_v62, 3  ;;  %v11409_v41 = vsel %vm5279_vm8, %v11399_v26, %v11408_v37  ;;  %v11462_v31 = vor.u32 %v21171_v10, %v21169_v22  ;;  %v19594_v22 = vld [vmem:[%s20011_s9 + $0x40] sm:$0xff]   ;;  %v19595_v10 = vld [vmem:[%s20011_s9 + $0x48] sm:$0xff]  }
 0x1b9   : > { %17991 = vmatprep.mubr.msk.bf16.mxu0 %vm391_vm1, %v10851_v1  ;;  %v21147_v1 = vld [vmem:[%s20011_s9 + $0xa0] sm:$0xff]   ;;  %v21263_v47 = vrot.slane %v11483_v46, 3 }
 0x1bc   : > { %17468 = vmatmul.mubr.msk.bf16.gmra.mrb[8].mxu1 %vm391_vm1, %v3453_v58  ;;  %v19579_v58 = vld [vmem:[%s20011_s9 + $0x64] sm:$0xff]  }
 0x1bd   : > { %17471 = vmatprep.mubr.msk.bf16.mxu1 %vm391_vm1, %v3455_v5  ;;  %v19581_v5 = vld [vmem:[%s20011_s9 + $0x8] sm:$0xfc]   ;;  %v11465_v21 = vshrl.u32 %v19579_v58, 16  ;;  %v11468_v42 = vshll.u32 %v19579_v58, 16  ;;  %v10859_v58 = vsel %vm4715_vm7, %v10856_v39, %v10858_v9  ;;  %v11391_v39 = vor.u32 %v21020_v7, %v21012_v4 }
 0x1be   : > { %v10861_v4 = vsel %vm4715_vm7, %v10858_v9, %v10860_v30  ;;  %v21253_v9 = vrot.slane %v4023_v59, 2  ;;  %v11417_v30 = vor.u32 %v21087_v44, %v21076_v56  ;;  %v3469_v56 = vsel %vm2877_vm5, %v3466_v35, %v3468_v28  ;;  %v21280_v44 = vld [vmem:[%s22340_s1 + $0x28] sm:$0x3] }
 0x1bf   : > { %v11400_v7 = vsel %vm5279_vm8, %v11391_v39, %v11399_v26  ;;  %v21290_v39 = vsel %vm452_vm0, %v21037_v40, 0  ;;  %v11426_v35 = vor.u32 %v21094_v15, %v21092_v61  ;;  %v19590_v61 = vld [vmem:[%s20011_s9 + $0x30] sm:$0xff]  }
 0x1c0   : > { %17992 = vmatmul.mubr.msk.bf16.gmra.mrb[28].mxu0 %vm391_vm1, %v10853_v8  ;;  %v4006_v8 = vshrl.u32 %v19581_v5, 16  ;;  %v11418_v45 = vsel %vm5279_vm8, %v11408_v37, %v11417_v30  ;;  %v4050_v43 = vshrl.u32 %v19590_v61, 16 }
 0x1c1   : > { %17995 = vmatprep.mubr.msk.bf16.mxu0 %vm391_vm1, %v10855_v19  ;;  %v11486_v19 = vshll.u32 %v19584_v16, 16  ;;  %v19588_v16 = vld [vmem:[%s20011_s9 + $0x84] sm:$0xff]   ;;  %v11427_v15 = vsel %vm5279_vm8, %v11417_v30, %v11426_v35  ;;  %v11436_v0 = vsel %vm5279_vm8, %v11426_v35, %v11435_v57  ;;  %v11453_v30 = vor.u32 %v21155_v18, %v21144_v49 }
 0x1c2   : > { %v21225_v48 = vrot.slane %v4006_v8, 2  ;;  %v11501_v62 = vshrl.u32 %v19588_v16, 16 }
 0x1c3   : > { %v21265_v25 = vrot.slane %v11486_v19, 4  ;;  %v22346_v19 = vrot.slane %v21079_v29, 2  ;;  %v11444_v29 = vor.u32 %v21139_v13, %v21137_v52  ;;  %v22350_v52 = vrot.slane %v21125_v38, 2 }
 0x1c4   : > { %17472 = vmatmul.mubr.msk.bf16.gmra.mrb[12].mxu1 %vm391_vm1, %v3457_v50  ;;  %v21204_v50 = vrot.slane %v11465_v21, 3  ;;  %v4009_v21 = vshll.u32 %v19581_v5, 16 }
 0x1c5   : > { %17475 = vmatprep.mubr.msk.bf16.mxu1 %vm391_vm1, %v3459_v14  ;;  %v21206_v14 = vrot.slane %v11468_v42, 4  ;;  %v4014_v42 = vshrl.u32 %v19582_v60, 16  ;;  %v4032_v60 = vshrl.u32 %v19586_v55, 16  ;;  %v3477_v13 = vsel %vm2877_vm5, %v3474_v51, %v22350_v52 }
 0x1c6   : > { %v21241_v34 = vrot.slane %v4009_v21, 3 }
 0x1c7   : > { %v21303_v40 = vrot.slane %v4032_v60, 2  ;;  %v19591_v60 = vld [vmem:[%s20011_s9 + $0x38] sm:$0xff]  }
 0x1c8   : > { %17996 = vmatmul.mubr.msk.bf16.gmra.mrb[32].mxu0 %vm391_vm1, %v10857_v24  ;;  %v4026_v24 = vshll.u32 %v19583_v17, 16  ;;  %v21243_v17 = vrot.slane %v4014_v42, 2  ;;  %v4059_v35 = vshrl.u32 %v19591_v60, 16 }
 0x1c9   : > { %17999 = vmatprep.mubr.msk.bf16.mxu0 %vm391_vm1, %v10859_v58  ;;  %v19585_v58 = vld [vmem:[%s20011_s9 + $0x7c] sm:$0xff]  }
 0x1ca   : > { %v21260_v12 = vrot.slane %v4026_v24, 3  ;;  %v11492_v5 = vshrl.u32 %v19585_v58, 16  ;;  %v11495_v8 = vshll.u32 %v19585_v58, 16  ;;  %v22349_v58 = vmov %v22347_v6 }
 0x1cc   : > { %17476 = vmatmul.mubr.msk.bf16.gmra.mrb[16].mxu1 %vm391_vm1, %v3461_v20  ;;  %v19587_v20 = vld [vmem:[%s20011_s9 + $0x28] sm:$0xff]   ;;  %v21292_v63 = vrot.slane %v11492_v5, 3  ;;  %v21300_v26 = vrot.slane %v11495_v8, 4  ;;  %v21335_v5 = vrot.slane %v11501_v62, 3  ;;  %v4053_v8 = vshll.u32 %v19590_v61, 16  ;;  %v19593_v62 = vld [vmem:[%s20011_s9 + $0x9c] sm:$0xff]  }
 0x1cd   : > { %17479 = vmatprep.mubr.msk.bf16.mxu1 %vm391_vm1, %v3463_v36  ;;  %v3471_v36 = vsel %vm2877_vm5, %v3468_v28, %v22346_v19  ;;  %v4035_v28 = vshll.u32 %v19586_v55, 16  ;;  %v4041_v21 = vshrl.u32 %v19587_v20, 16  ;;  %v4044_v42 = vshll.u32 %v19587_v20, 16  ;;  %v19592_v20 = vld [vmem:[%s20011_s9 + $0x94] sm:$0xff]  }
 0x1ce   : > { %v22348_v55 = vmov %v22346_v19  ;;  %v4055_v38 = vrot.slane %v4053_v8, 3  ;;  %v4020_v61 = vor.u32 %v21251_v2, %v21243_v17  ;;  %v11531_v17 = vshll.u32 %v19593_v62, 16 }
 0x1cf   : > { %v3473_v59 = vsel %vm2877_vm5, %v22348_v55, %v22347_v6  ;;  %v21317_v24 = vrot.slane %v4035_v28, 3  ;;  %v21319_v46 = vrot.slane %v4041_v21, 2  ;;  %v11471_v28 = vor.u32 %v21206_v14, %v21204_v50 }
 0x1d0   : > { %18000 = vmatmul.mubr.msk.bf16.gmra.mrb[36].mxu0 %vm391_vm1, %v10861_v4  ;;  %v3475_v4 = vsel %vm2877_vm5, %v22349_v58, %v3474_v51  ;;  %v4052_v51 = vrot.slane %v4050_v43, 2  ;;  %v11519_v21 = vshrl.u32 %v19592_v20, 16  ;;  %v22353_v50 = vrot.slane %v21181_v33, 2 }
 0x1d1   : > { %18005 = vmatprep.mubr.msk.bf16.mxu0 %vm391_vm1, %v11400_v7  ;;  %v21327_v7 = vrot.slane %v4044_v42, 3  ;;  %v11522_v42 = vshll.u32 %v19592_v20, 16  ;;  %v21378_v55 = vrot.slane %v4059_v35, 2  ;;  %v11480_v33 = vor.u32 %v21217_v27, %v21215_v32  ;;  %v19596_v27 = vld [vmem:[%s20011_s9 + $0xa4] sm:$0xff]  }
 0x1d2   : > { %v11521_v2 = vrot.slane %v11519_v21, 3  ;;  %v4038_v32 = vor.u32 %v21317_v24, %v21303_v40  ;;  %v11533_v8 = vrot.slane %v11531_v17, 4  ;;  %v19597_v40 = vld [vmem:[%s20011_s9 + $0xac] sm:$0xff]  }
 0x1d3   : > { %v11524_v58 = vrot.slane %v11522_v42, 4  ;;  %v21409_v24 = vld [vmem:[%s22340_s1 + $0x10] sm:$0x3] }
 0x1d4   : > { %17480 = vmatmul.mubr.msk.bf16.gmra.mrb[20].mxu1 %vm391_vm1, %v3465_v23  ;;  %v11504_v23 = vshll.u32 %v19588_v16, 16  ;;  %v11445_v16 = vsel %vm5279_vm8, %v11435_v57, %v11444_v29  ;;  %v4062_v57 = vshll.u32 %v19591_v60, 16 }
 0x1d5   : > { %17483 = vmatprep.mubr.msk.bf16.mxu1 %vm391_vm1, %v3467_v54 }
 0x1d6   : > { %v11506_v49 = vrot.slane %v11504_v23, 4  ;;  %v4071_v23 = vshll.u32 %v19594_v22, 16 }
 0x1d8   : > { %18006 = vmatmul.mubr.msk.bf16.vlgmr.msra.gmra.mrb[0].mxu0 %vm391_vm1, %v11409_v41  ;;  %v11454_v41 = vsel %vm5279_vm8, %v11444_v29, %v11453_v30  ;;  %v4077_v29 = vshrl.u32 %v19595_v10, 16 }
 0x1d9   : > { %18046 = vmatpush3.bf16.msra.mxu0 %v21054_v11  ;;  %18009 = vmatprep.mubr.msk.bf16.mxu0 %vm391_vm1, %v11418_v45  ;;  %v19589_v11 = vld [vmem:[%s20011_s9 + $0x8c] sm:$0xff]   ;;  %v22351_v45 = vrot.slane %v21147_v1, 2  ;;  %v11489_v1 = vor.u32 %v21265_v25, %v21263_v47  ;;  %v11481_v47 = vsel %vm5279_vm8, %v11471_v28, %v11480_v33 }
 0x1da   : > { %19280 = vmatprep.subr.msk.bf16.mxu0 %vm452_vm0, %v21280_v44  ;;  %v11510_v54 = vshrl.u32 %v19589_v11, 16  ;;  %v11513_v37 = vshll.u32 %v19589_v11, 16  ;;  %v4012_v11 = vor.u32 %v21241_v34, %v21225_v48  ;;  %v11528_v34 = vshrl.u32 %v19593_v62, 16 }
 0x1db   : > { %v22354_v14 = vmov %v22351_v45  ;;  %v11490_v25 = vsel %vm5279_vm8, %v11480_v33, %v11489_v1 }
 0x1dc   : > { %17484 = vmatmul.mubr.msk.bf16.gmra.mrb[24].mxu1 %vm391_vm1, %v3469_v56  ;;  %v21347_v18 = vrot.slane %v11510_v54, 3  ;;  %v22352_v56 = vmov %v22350_v52  ;;  %v3481_v6 = vsel %vm2877_vm5, %v22354_v14, %v22353_v50  ;;  %v4021_v48 = vsel %vm4004_vm6, %v4012_v11, %v4020_v61 }
 0x1dd   : > { %17487 = vmatprep.mubr.msk.bf16.mxu1 %vm391_vm1, %v3471_v36  ;;  %v3479_v19 = vsel %vm2877_vm5, %v22352_v56, %v22351_v45  ;;  %v21355_v36 = vrot.slane %v11513_v37, 4  ;;  %v4080_v54 = vshll.u32 %v19595_v10, 16  ;;  %v4029_v37 = vor.u32 %v21260_v12, %v21253_v9  ;;  %v19600_v56 = vld [vmem:[%s20011_s9 + $0xb4] sm:$0xff]  }
 0x1de   : > { %v11530_v43 = vrot.slane %v11528_v34, 3  ;;  %v11498_v9 = vor.u32 %v21300_v26, %v21292_v63  ;;  %v11507_v12 = vor.u32 %v11506_v49, %v21335_v5  ;;  %v11540_v45 = vshll.u32 %v19596_v27, 16  ;;  %v19598_v26 = vld [vmem:[%s20011_s9 + $0x50] sm:$0xff]   ;;  %v19599_v49 = vld [vmem:[%s20011_s9 + $0x58] sm:$0xff]  }
 0x1df   : > { %v4039_v60 = vsel %vm4004_vm6, %v4029_v37, %v4038_v32  ;;  %v4082_v52 = vrot.slane %v4080_v54, 3  ;;  %v4047_v63 = vor.u32 %v21327_v7, %v21319_v46  ;;  %v4056_v5 = vor.u32 %v4055_v38, %v4052_v51  ;;  %v19601_v54 = vld [vmem:[%s20011_s9 + $0xbc] ss:$0 sps:$4 sm:$0xff]  }
 0x1e0   : > { %18010 = vmatmul.mubr.msk.bf16.gmra.mrb[4].mxu0 %vm391_vm1, %v11427_v15  ;;  %v11463_v15 = vsel %vm5279_vm8, %v11453_v30, %v11462_v31  ;;  %v4030_v30 = vsel %vm4004_vm6, %v4020_v61, %v4029_v37  ;;  %v11508_v35 = vsel %vm5279_vm8, %v11498_v9, %v11507_v12  ;;  %v11542_v7 = vrot.slane %v11540_v45, 4  ;;  %v19607_v45 = vld [vmem:[%s20011_s9 + $0x78] sm:$0xff]  }
 0x1e1   : > { %18013 = vmatprep.mubr.msk.bf16.mxu0 %vm391_vm1, %v11436_v0  ;;  %v11472_v0 = vsel %vm5279_vm8, %v11462_v31, %v11471_v28  ;;  %v4048_v31 = vsel %vm4004_vm6, %v4038_v32, %v4047_v63  ;;  %v4057_v28 = vsel %vm4004_vm6, %v4047_v63, %v4056_v5  ;;  %v11516_v51 = vor.u32 %v21355_v36, %v21347_v18 }
 0x1e2   : > { %v11525_v38 = vor.u32 %v11524_v58, %v11521_v2  ;;  %v4086_v21 = vshrl.u32 %v19598_v26, 16  ;;  %v4089_v42 = vshll.u32 %v19598_v26, 16  ;;  %v4095_v62 = vshrl.u32 %v19599_v49, 16 }
 0x1e3   : > { %v4098_v11 = vshll.u32 %v19599_v49, 16  ;;  %v11555_v61 = vshrl.u32 %v19600_v56, 16  ;;  %v11517_v50 = vsel %vm5279_vm8, %v11507_v12, %v11516_v51 }
 0x1e4   : > { %17488 = vmatmul.mubr.msk.bf16.gmra.mrb[28].mxu1 %vm391_vm1, %v3473_v59  ;;  %v21380_v59 = vrot.slane %v4062_v57, 3  ;;  %v11546_v57 = vshrl.u32 %v19597_v40, 16  ;;  %v11526_v18 = vsel %vm5279_vm8, %v11516_v51, %v11525_v38  ;;  %v4088_v34 = vrot.slane %v4086_v21, 2  ;;  %v19610_v51 = vld [vmem:[%s20011_s9 + $0x80] sm:$0xff]  }
 0x1e5   : > { %17491 = vmatprep.mubr.msk.bf16.mxu1 %vm391_vm1, %v3475_v4  ;;  %v4068_v4 = vshrl.u32 %v19594_v22, 16  ;;  %v11558_v22 = vshll.u32 %v19600_v56, 16  ;;  %v4091_v17 = vrot.slane %v4089_v42, 3  ;;  %v4097_v33 = vrot.slane %v4095_v62, 2  ;;  %v19611_v62 = vld [vmem:[%s20011_s9 + $0x88] sm:$0xff]  }
 0x1e6   : > { %v4065_v10 = vor.u32 %v21380_v59, %v21378_v55  ;;  %v11548_v14 = vrot.slane %v11546_v57, 3  ;;  %v11534_v55 = vor.u32 %v11533_v8, %v11530_v43  ;;  %v11557_v2 = vrot.slane %v11555_v61, 3 }
 0x1e7   : > { %v4070_v20 = vrot.slane %v4068_v4, 2  ;;  %v11560_v58 = vrot.slane %v11558_v22, 4  ;;  %v4092_v37 = vor.u32 %v4091_v17, %v4088_v34  ;;  %v4134_v21 = vshll.u32 %v19607_v45, 16 }
 0x1e8   : > { %18014 = vmatmul.mubr.msk.bf16.gmra.mrb[8].mxu0 %vm391_vm1, %v11445_v16  ;;  %v4073_v16 = vrot.slane %v4071_v23, 3  ;;  %v4066_v36 = vsel %vm4004_vm6, %v4056_v5, %v4065_v10  ;;  %v11535_v32 = vsel %vm5279_vm8, %v11525_v38, %v11534_v55  ;;  %v4140_v61 = vshrl.u32 %v19610_v51, 16 }
 0x1e9   : > { %18017 = vmatprep.mubr.msk.bf16.mxu0 %vm391_vm1, %v11454_v41  ;;  %v4079_v41 = vrot.slane %v4077_v29, 2  ;;  %v4143_v22 = vshll.u32 %v19610_v51, 16  ;;  %v19623_v51 = vld [vmem:[%s20011_s9 + $0x10] sm:$0xff]  }
 0x1ea   : > { %v4142_v34 = vrot.slane %v4140_v61, 2 }
 0x1eb   : > { %v4083_v29 = vor.u32 %v4082_v52, %v4079_v41  ;;  %v4145_v17 = vrot.slane %v4143_v22, 3  ;;  %v19624_v22 = vld [vmem:[%s20011_s9 + $0x18] sm:$0xff]  }
 0x1ec   : > { %17492 = vmatmul.mubr.msk.bf16.gmra.mrb[32].mxu1 %vm391_vm1, %v3477_v13  ;;  %v11537_v13 = vshrl.u32 %v19596_v27, 16  ;;  %v19603_v27 = vld [vmem:[%s20011_s9 + $0x68] sm:$0xff]  }
 0x1ed   : > { %17495 = vmatprep.mubr.msk.bf16.mxu1 %vm391_vm1, %v3479_v19  ;;  %v11499_v19 = vsel %vm5279_vm8, %v11489_v1, %v11498_v9  ;;  %v4100_v1 = vrot.slane %v4098_v11, 3  ;;  %v4093_v43 = vsel %vm4004_vm6, %v4083_v29, %v4092_v37  ;;  %v11567_v9 = vshll.u32 %v19601_v54, 16 }
 0x1ee   : > { %v11539_v46 = vrot.slane %v11537_v13, 3  ;;  %v4113_v41 = vshrl.u32 %v19603_v27, 16  ;;  %v4116_v52 = vshll.u32 %v19603_v27, 16  ;;  %v21482_v27 = vld [vmem:[%s22340_s1 + $0x2a] sm:$0x3] }
 0x1ef   : > { %v4101_v12 = vor.u32 %v4100_v1, %v4097_v33  ;;  %v11569_v56 = vrot.slane %v11567_v9, 4  ;;  %v12669_v33 = vsel %vm452_vm0, %v21280_v44, 0 }
 0x1f0   : > { %18018 = vmatmul.mubr.msk.bf16.gmra.mrb[12].mxu0 %vm391_vm1, %v11463_v15  ;;  %v4074_v15 = vor.u32 %v4073_v16, %v4070_v20  ;;  %v11543_v59 = vor.u32 %v11542_v7, %v11539_v46  ;;  %v11564_v16 = vshrl.u32 %v19601_v54, 16  ;;  %v4118_v57 = vrot.slane %v4116_v52, 3 }
 0x1f1   : > { %18021 = vmatprep.mubr.msk.bf16.mxu0 %vm391_vm1, %v11472_v0  ;;  %v19602_v0 = vld [vmem:[%s20011_s9 + $0x60] sm:$0xff]  }
 0x1f2   : > { %v4104_v4 = vshrl.u32 %v19602_v0, 16  ;;  %v4107_v23 = vshll.u32 %v19602_v0, 16  ;;  %v11566_v49 = vrot.slane %v11564_v16, 3 }
 0x1f4   : > { %17496 = vmatmul.mubr.msk.bf16.gmra.mrb[36].mxu1 %vm391_vm1, %v3481_v6  ;;  %v4106_v8 = vrot.slane %v4104_v4, 2  ;;  %v11570_v38 = vor.u32 %v11569_v56, %v11566_v49 }
 0x1f5   : > { %17501 = vmatprep.mubr.msk.bf16.mxu1 %vm391_vm1, %v4021_v48  ;;  %v4075_v48 = vsel %vm4004_vm6, %v4065_v10, %v4074_v15 }
 0x1f8   : > { %18022 = vmatmul.mubr.msk.bf16.gmra.mrb[16].mxu0 %vm391_vm1, %v11481_v47  ;;  %v11544_v47 = vsel %vm5279_vm8, %v11534_v55, %v11543_v59 }
 0x1f9   : > { %18025 = vmatprep.mubr.msk.bf16.mxu0 %vm391_vm1, %v11490_v25  ;;  %v4084_v25 = vsel %vm4004_vm6, %v4074_v15, %v4083_v29  ;;  %v19604_v15 = vld [vmem:[%s20011_s9 + $0x20] sm:$0xff]  }
 0x1fc   : > { %17502 = vmatmul.mubr.msk.bf16.vlgmr.msra.gmra.mrb[0].mxu1 %vm391_vm1, %v4030_v30  ;;  %v19606_v30 = vld [vmem:[%s20011_s9 + $0x70] sm:$0xff]  }
 0x1fd   : > { %17542 = vmatpush3.bf16.msra.mxu1 %v21290_v39  ;;  %17505 = vmatprep.mubr.msk.bf16.mxu1 %vm391_vm1, %v4039_v60  ;;  %v11549_v39 = vshll.u32 %v19597_v40, 16  ;;  %v4109_v60 = vrot.slane %v4107_v23, 3  ;;  %v11561_v40 = vor.u32 %v11560_v58, %v11557_v2  ;;  %v4122_v13 = vshrl.u32 %v19606_v30, 16  ;;  %v19608_v2 = vld [vmem:[%s20011_s9 + $0x30] sm:$0xff]  }
 0x1fe   : > { %19267 = vmatprep.subr.msk.bf16.mxu1 %vm452_vm0, %v21409_v24  ;;  %v4125_v26 = vshll.u32 %v19606_v30, 16  ;;  %v4146_v58 = vor.u32 %v4145_v17, %v4142_v34  ;;  %v19609_v30 = vld [vmem:[%s20011_s9 + $0x38] sm:$0xff]   ;;  %v19631_v17 = vld [vmem:[%s20011_s9 + $0x30] sm:$0xff]  }
 0x1ff   : > { %v11551_v6 = vrot.slane %v11549_v39, 4  ;;  %v4110_v63 = vor.u32 %v4109_v60, %v4106_v8  ;;  %v4124_v39 = vrot.slane %v4122_v13, 2  ;;  %v11571_v10 = vsel %vm5279_vm8, %v11561_v40, %v11570_v38  ;;  %v19617_v38 = vld [vmem:[%s20011_s9 + $0x58] sm:$0xff]  }
 0x200   : > { %18026 = vmatmul.mubr.msk.bf16.gmra.mrb[20].mxu0 %vm391_vm1, %v11499_v19  ;;  %v4102_v19 = vsel %vm4004_vm6, %v4092_v37, %v4101_v12  ;;  %v4127_v7 = vrot.slane %v4125_v26, 3  ;;  %v19615_v37 = vld [vmem:[%s20011_s9 + $0x98] sm:$0xff]  }
 0x201   : > { %18029 = vmatprep.mubr.msk.bf16.mxu0 %vm391_vm1, %v11508_v35  ;;  %v11552_v20 = vor.u32 %v11551_v6, %v11548_v14  ;;  %v4111_v46 = vsel %vm4004_vm6, %v4101_v12, %v4110_v63  ;;  %v4149_v14 = vshrl.u32 %v19611_v62, 16  ;;  %v4152_v6 = vshll.u32 %v19611_v62, 16  ;;  %v19619_v12 = vld [vmem:[%s20011_s9 + $0xa8] ss:$0 sps:$4 sm:$0x77]  }
 0x202   : > { %v4128_v11 = vor.u32 %v4127_v7, %v4124_v39  ;;  %v4167_v8 = vshrl.u32 %v19615_v37, 16  ;;  %v4170_v60 = vshll.u32 %v19615_v37, 16  ;;  %v4188_v49 = vshll.u32 %v19619_v12, 16 }
 0x203   : > { %v11553_v5 = vsel %vm5279_vm8, %v11543_v59, %v11552_v20  ;;  %v11562_v35 = vsel %vm5279_vm8, %v11552_v20, %v11561_v40  ;;  %v19605_v59 = vld [vmem:[%s20011_s9 + $0x28] sm:$0xff]   ;;  %v4151_v23 = vrot.slane %v4149_v14, 2  ;;  %v4154_v29 = vrot.slane %v4152_v6, 3  ;;  %v19612_v40 = vld [vmem:[%s20011_s9 + $0x40] sm:$0xff]  }
 0x204   : > { %17506 = vmatmul.mubr.msk.bf16.gmra.mrb[4].mxu1 %vm391_vm1, %v4048_v31  ;;  %v4115_v31 = vrot.slane %v4113_v41, 2  ;;  %v4169_v52 = vrot.slane %v4167_v8, 2  ;;  %v4172_v13 = vrot.slane %v4170_v60, 3  ;;  %v4190_v39 = vrot.slane %v4188_v49, 3  ;;  %v19628_v6 = vld [vmem:[%s20011_s9 + $0x28] sm:$0xff]   ;;  %v19634_v8 = vld [vmem:[%s20011_s9 + $0x98] sm:$0xff]  }
 0x205   : > { %17509 = vmatprep.mubr.msk.bf16.mxu1 %vm391_vm1, %v4057_v28  ;;  %v4131_v28 = vshrl.u32 %v19607_v45, 16  ;;  %v4717_v62 = vrot.slane %v19623_v51, 3  ;;  %v19647_v49 = vld [vmem:[%s20011_s9 + $0x70] sm:$0xff]  }
 0x206   : > { %v4119_v42 = vor.u32 %v4118_v57, %v4115_v31  ;;  %v4173_v56 = vor.u32 %v4172_v13, %v4169_v52  ;;  %v19616_v31 = vld [vmem:[%s20011_s9 + $0x50] sm:$0xff]   ;;  %v19638_v52 = vld [vmem:[%s20011_s9 + $0xa8] sm:$0xff]  }
 0x207   : > { %v4133_v0 = vrot.slane %v4131_v28, 2  ;;  %v19646_v51 = vld [vmem:[%s20011_s9 + $0x30] sm:$0xff]  }
 0x208   : > { %18030 = vmatmul.mubr.msk.bf16.gmra.mrb[24].mxu0 %vm391_vm1, %v11517_v50  ;;  %v4136_v50 = vrot.slane %v4134_v21, 3 }
 0x209   : > { %18033 = vmatprep.mubr.msk.bf16.mxu0 %vm391_vm1, %v11526_v18  ;;  %v19614_v18 = vld [vmem:[%s20011_s9 + $0x90] sm:$0xff]  }
 0x20a   : > { %v4158_v55 = vshrl.u32 %v19614_v18, 16  ;;  %v4137_v1 = vor.u32 %v4136_v50, %v4133_v0  ;;  %v4161_v4 = vshll.u32 %v19614_v18, 16  ;;  %v4719_v0 = vrot.slane %v19624_v22, 3  ;;  %v19621_v50 = vld [vmem:[%s20011_s9 + $0x68] sm:$0xff]  }
 0x20c   : > { %17510 = vmatmul.mubr.msk.bf16.gmra.mrb[8].mxu1 %vm391_vm1, %v4066_v36  ;;  %v4120_v36 = vsel %vm4004_vm6, %v4110_v63, %v4119_v42  ;;  %v4160_v54 = vrot.slane %v4158_v55, 2  ;;  %v4147_v44 = vsel %vm4004_vm6, %v4137_v1, %v4146_v58  ;;  %v4720_v14 = vsel %vm4715_vm7, %v4717_v62, %v4719_v0  ;;  %v21534_v55 = vld [vmem:[%s22340_s1 + $0x12] sm:$0x3] }
 0x20d   : > { %17513 = vmatprep.mubr.msk.bf16.mxu1 %vm391_vm1, %v4075_v48  ;;  %v4129_v48 = vsel %vm4004_vm6, %v4119_v42, %v4128_v11 }
 0x210   : > { %18034 = vmatmul.mubr.msk.bf16.gmra.mrb[28].mxu0 %vm391_vm1, %v11535_v32  ;;  %v4138_v32 = vsel %vm4004_vm6, %v4128_v11, %v4137_v1  ;;  %v19620_v11 = vld [vmem:[%s20011_s9 + $0x60] sm:$0xff]  }
 0x211   : > { %18037 = vmatprep.mubr.msk.bf16.mxu0 %vm391_vm1, %v11544_v47  ;;  %v4163_v47 = vrot.slane %v4161_v4, 3  ;;  %v19629_v1 = vld [vmem:[%s20011_s9 + $0x80] sm:$0xff]  }
 0x213   : > { %v4164_v20 = vor.u32 %v4163_v47, %v4160_v54  ;;  %v19630_v54 = vld [vmem:[%s20011_s9 + $0x88] sm:$0xff]  }
 0x214   : > { %17514 = vmatmul.mubr.msk.bf16.gmra.mrb[12].mxu1 %vm391_vm1, %v4084_v25  ;;  %v19618_v25 = vld [vmem:[%s20011_s9 + $0xa0] sm:$0xff]   ;;  %v19636_v47 = vld [vmem:[%s20011_s9 + $0x48] sm:$0xff]  }
 0x215   : > { %17517 = vmatprep.mubr.msk.bf16.mxu1 %vm391_vm1, %v4093_v43  ;;  %v4155_v43 = vor.u32 %v4154_v29, %v4151_v23  ;;  %v4176_v16 = vshrl.u32 %v19618_v25, 16  ;;  %v4179_v9 = vshll.u32 %v19618_v25, 16  ;;  %v4174_v28 = vsel %vm4004_vm6, %v4164_v20, %v4173_v56  ;;  %v19635_v23 = vld [vmem:[%s20011_s9 + $0x40] sm:$0xff]  }
 0x216   : > { %v4729_v37 = vrot.slane %v19635_v23, 3 }
 0x217   : > { %v4156_v41 = vsel %vm4004_vm6, %v4146_v58, %v4155_v43  ;;  %v4165_v45 = vsel %vm4004_vm6, %v4155_v43, %v4164_v20  ;;  %v4178_v63 = vrot.slane %v4176_v16, 2  ;;  %v4181_v26 = vrot.slane %v4179_v9, 3  ;;  %v19632_v58 = vld [vmem:[%s20011_s9 + $0x38] sm:$0xff]   ;;  %v19637_v20 = vld [vmem:[%s20011_s9 + $0xa0] sm:$0xff]  }
 0x218   : > { %18038 = vmatmul.mubr.msk.bf16.gmra.mrb[32].mxu0 %vm391_vm1, %v11553_v5  ;;  %v4185_v5 = vshrl.u32 %v19619_v12, 16  ;;  %v4727_v29 = vrot.slane %v19632_v58, 3  ;;  %v4731_v43 = vrot.slane %v19636_v47, 3  ;;  %v19640_v9 = vld [vmem:[%s20011_s9 + $0x58] sm:$0xff]  }
 0x219   : > { %18041 = vmatprep.mubr.msk.bf16.mxu0 %vm391_vm1, %v11562_v35  ;;  %v4182_v35 = vor.u32 %v4181_v26, %v4178_v63  ;;  %v19644_v26 = vld [vmem:[%s20011_s9 + $0x68] sm:$0xff]  }
 0x21a   : > { %v4187_v57 = vrot.slane %v4185_v5, 2  ;;  %v4730_v25 = vsel %vm4715_vm7, %v4727_v29, %v4729_v37  ;;  %v4732_v16 = vsel %vm4715_vm7, %v4729_v37, %v4731_v43  ;;  %v19665_v37 = vld [vmem:[%s20011_s9 + $0x18] sm:$0xff]  }
 0x21b   : > { %v4183_v7 = vsel %vm4004_vm6, %v4173_v56, %v4182_v35  ;;  %v4739_v56 = vrot.slane %v19644_v26, 3 }
 0x21c   : > { %17518 = vmatmul.mubr.msk.bf16.gmra.mrb[16].mxu1 %vm391_vm1, %v4102_v19  ;;  %v19613_v19 = vld [vmem:[%s20011_s9 + $0x48] sm:$0xff]   ;;  %v4191_v21 = vor.u32 %v4190_v39, %v4187_v57  ;;  %v19648_v39 = vld [vmem:[%s20011_s9 + $0x78] sm:$0xff]  }
 0x21d   : > { %17521 = vmatprep.mubr.msk.bf16.mxu1 %vm391_vm1, %v4111_v46  ;;  %v19622_v46 = vld [vmem:[%s20011_s9 + $0x8] sm:$0xf8]  }
 0x21e   : > { %v4716_v42 = vrot.slane %v19622_v46, 3  ;;  %v4192_v61 = vsel %vm4004_vm6, %v4182_v35, %v4191_v21  ;;  %v4741_v35 = vrot.slane %v19647_v49, 3  ;;  %v19651_v46 = vld [vmem:[%s20011_s9 + $0x80] sm:$0xff]   ;;  %v19649_v21 = vld [vmem:[%s20011_s9 + $0x38] sm:$0xff]  }
 0x220   : > { %18042 = vmatmul.mubr.msk.bf16.gmra.mrb[36].mxu0 %vm391_vm1, %v11571_v10  ;;  %v4718_v10 = vsel %vm4715_vm7, %v4716_v42, %v4717_v62  ;;  %v13355_v42 = vsel %vm452_vm0, %v21482_v27, 0 }
 0x221   : > { %18047 = vmatprep.mubr.msk.bf16.mxu0 %vm391_vm1, %v19604_v15  ;;  %v19627_v15 = vld [vmem:[%s20011_s9 + $0x20] sm:$0xff]  }
 0x222   : > { %v4721_v18 = vrot.slane %v19627_v15, 3  ;;  %v19650_v15 = vld [vmem:[%s20011_s9 + $0x40] sm:$0xff]  }
 0x224   : > { %17522 = vmatmul.mubr.msk.bf16.gmra.mrb[20].mxu1 %vm391_vm1, %v4120_v36  ;;  %v19625_v36 = vld [vmem:[%s20011_s9 + $0x70] sm:$0xff]   ;;  %v4722_v34 = vsel %vm4715_vm7, %v4719_v0, %v4721_v18 }
 0x225   : > { %17525 = vmatprep.mubr.msk.bf16.mxu1 %vm391_vm1, %v4129_v48  ;;  %v5529_v48 = vsel %vm452_vm0, %v21409_v24, 0  ;;  %v19626_v24 = vld [vmem:[%s20011_s9 + $0x78] sm:$0xff]  }
 0x228   : > { %18048 = vmatmul.mubr.msk.bf16.vlgmr.msra.gmra.mrb[0].mxu0 %vm391_vm1, %v19605_v59  ;;  %v4723_v59 = vrot.slane %v19628_v6, 3 }
 0x229   : > { %18088 = vmatpush3.bf16.msra.mxu0 %v12669_v33  ;;  %18051 = vmatprep.mubr.msk.bf16.mxu0 %vm391_vm1, %v19608_v2  ;;  %v4725_v33 = vrot.slane %v19631_v17, 3 }
 0x22a   : > { %19281 = vmatprep.subr.msk.bf16.mxu0 %vm452_vm0, %v21482_v27  ;;  %v4724_v2 = vsel %vm4715_vm7, %v4721_v18, %v4723_v59 }
 0x22b   : > { %v4726_v4 = vsel %vm4715_vm7, %v4723_v59, %v4725_v33 }
 0x22c   : > { %17526 = vmatmul.mubr.msk.bf16.gmra.mrb[24].mxu1 %vm391_vm1, %v4138_v32  ;;  %v19633_v32 = vld [vmem:[%s20011_s9 + $0x90] sm:$0xff]  }
 0x22d   : > { %17529 = vmatprep.mubr.msk.bf16.mxu1 %vm391_vm1, %v4147_v44  ;;  %v4728_v44 = vsel %vm4715_vm7, %v4725_v33, %v4727_v29 }
 0x230   : > { %18052 = vmatmul.mubr.msk.bf16.gmra.mrb[4].mxu0 %vm391_vm1, %v19609_v30  ;;  %v19639_v30 = vld [vmem:[%s20011_s9 + $0x50] sm:$0xff]  }
 0x231   : > { %18055 = vmatprep.mubr.msk.bf16.mxu0 %vm391_vm1, %v19612_v40  ;;  %v4733_v60 = vrot.slane %v19639_v30, 3  ;;  %v19643_v40 = vld [vmem:[%s20011_s9 + $0x60] sm:$0xff]  }
 0x232   : > { %v4737_v13 = vrot.slane %v19643_v40, 3  ;;  %v19668_v30 = vld [vmem:[%s20011_s9 + $0x20] sm:$0xff]  }
 0x233   : > { %v4734_v12 = vsel %vm4715_vm7, %v4731_v43, %v4733_v60  ;;  %v5310_v40 = vshll.u32 %v19668_v30, 16 }
 0x234   : > { %17530 = vmatmul.mubr.msk.bf16.gmra.mrb[28].mxu1 %vm391_vm1, %v4156_v41  ;;  %v4735_v41 = vrot.slane %v19640_v9, 3  ;;  %v4740_v57 = vsel %vm4715_vm7, %v4737_v13, %v4739_v56 }
 0x235   : > { %17533 = vmatprep.mubr.msk.bf16.mxu1 %vm391_vm1, %v4165_v45  ;;  %v19641_v45 = vld [vmem:[%s20011_s9 + $0xb0] sm:$0xff]   ;;  %v5312_v49 = vrot.slane %v5310_v40, 4 }
 0x236   : > { %v4736_v63 = vsel %vm4715_vm7, %v4733_v60, %v4735_v41  ;;  %v4738_v5 = vsel %vm4715_vm7, %v4735_v41, %v4737_v13  ;;  %v5301_v60 = vshll.u32 %v19665_v37, 16  ;;  %v19661_v41 = vld [vmem:[%s20011_s9 + $0x68] sm:$0xff]  }
 0x238   : > { %18056 = vmatmul.mubr.msk.bf16.gmra.mrb[8].mxu0 %vm391_vm1, %v19613_v19  ;;  %v19642_v19 = vld [vmem:[%s20011_s9 + $0xb8] sm:$0xff]  }
 0x239   : > { %18059 = vmatprep.mubr.msk.bf16.mxu0 %vm391_vm1, %v19616_v31  ;;  %v19645_v31 = vld [vmem:[%s20011_s9 + $0x28] sm:$0xff]  }
 0x23c   : > { %17534 = vmatmul.mubr.msk.bf16.gmra.mrb[32].mxu1 %vm391_vm1, %v4174_v28  ;;  %v4742_v28 = vsel %vm4715_vm7, %v4739_v56, %v4741_v35  ;;  %v19672_v56 = vld [vmem:[%s20011_s9 + $0x30] sm:$0xff]  }
 0x23d   : > { %17537 = vmatprep.mubr.msk.bf16.mxu1 %vm391_vm1, %v4183_v7  ;;  %v4743_v7 = vrot.slane %v19648_v39, 3 }
 0x23f   : > { %v4744_v62 = vsel %vm4715_vm7, %v4741_v35, %v4743_v7 }
 0x240   : > { %18060 = vmatmul.mubr.msk.bf16.gmra.mrb[12].mxu0 %vm391_vm1, %v19617_v38  ;;  %v4745_v38 = vrot.slane %v19651_v46, 3  ;;  %v5328_v46 = vshll.u32 %v19672_v56, 16 }
 0x241   : > { %18063 = vmatprep.mubr.msk.bf16.mxu0 %vm391_vm1, %v19620_v11  ;;  %v19652_v11 = vld [vmem:[%s20011_s9 + $0x88] sm:$0xff]  }
 0x242   : > { %v4746_v22 = vsel %vm4715_vm7, %v4743_v7, %v4745_v38  ;;  %v4747_v27 = vrot.slane %v19652_v11, 3  ;;  %v19666_v7 = vld [vmem:[%s20011_s9 + $0x78] sm:$0xff]  }
 0x244   : > { %17538 = vmatmul.mubr.msk.bf16.gmra.mrb[36].mxu1 %vm391_vm1, %v4192_v61  ;;  %v21599_v61 = vld [vmem:[%s22340_s1 + $0x2c] sm:$0x3]  ;;  %v4748_v18 = vsel %vm4715_vm7, %v4745_v38, %v4747_v27 }
 0x245   : > { %17543 = vmatprep.mubr.msk.bf16.mxu1 %vm391_vm1, %v4718_v10  ;;  %v19655_v10 = vld [vmem:[%s20011_s9 + $0x90] sm:$0xff]  }
 0x246   : > { %v4749_v0 = vrot.slane %v19655_v10, 3  ;;  %v5330_v10 = vrot.slane %v5328_v46, 4  ;;  %v19687_v46 = vld [vmem:[%s20011_s9 + $0x30] sm:$0xff]  }
 0x248   : > { %18064 = vmatmul.mubr.msk.bf16.gmra.mrb[16].mxu0 %vm391_vm1, %v19621_v50  ;;  %v19653_v50 = vld [vmem:[%s20011_s9 + $0x48] sm:$0xff]   ;;  %v4750_v6 = vsel %vm4715_vm7, %v4747_v27, %v4749_v0  ;;  %v19676_v27 = vld [vmem:[%s20011_s9 + $0x40] sm:$0xff]  }
 0x249   : > { %18067 = vmatprep.mubr.msk.bf16.mxu0 %vm391_vm1, %v19625_v36  ;;  %v19656_v36 = vld [vmem:[%s20011_s9 + $0x98] sm:$0xff]  }
 0x24a   : > { %v4751_v17 = vrot.slane %v19656_v36, 3 }
 0x24c   : > { %17544 = vmatmul.mubr.msk.bf16.vlgmr.msra.gmra.mrb[0].mxu1 %vm391_vm1, %v4720_v14  ;;  %v19659_v14 = vld [vmem:[%s20011_s9 + $0xa0] sm:$0xff]   ;;  %v4752_v23 = vsel %vm4715_vm7, %v4749_v0, %v4751_v17 }
 0x24d   : > { %17584 = vmatpush3.bf16.msra.mxu1 %v5529_v48  ;;  %17547 = vmatprep.mubr.msk.bf16.mxu1 %vm391_vm1, %v4722_v34  ;;  %v19663_v48 = vld [vmem:[%s20011_s9 + $0x8] sm:$0xf8]   ;;  %v19664_v34 = vld [vmem:[%s20011_s9 + $0x10] sm:$0xff]   ;;  %v4753_v59 = vrot.slane %v19659_v14, 3  ;;  %v5343_v14 = vshrl.u32 %v19676_v27, 16 }
 0x24e   : > { %19268 = vmatprep.subr.msk.bf16.mxu1 %vm452_vm0, %v21534_v55  ;;  %v5281_v33 = vshrl.u32 %v19663_v48, 16  ;;  %v5292_v58 = vshll.u32 %v19664_v34, 16 }
 0x24f   : > { %v4754_v29 = vsel %vm4715_vm7, %v4751_v17, %v4753_v59 }
 0x250   : > { %18068 = vmatmul.mubr.msk.bf16.gmra.mrb[20].mxu0 %vm391_vm1, %v19626_v24  ;;  %v19654_v24 = vld [vmem:[%s20011_s9 + $0x50] sm:$0xff]  }
 0x251   : > { %18071 = vmatprep.mubr.msk.bf16.mxu0 %vm391_vm1, %v19629_v1  ;;  %v5284_v1 = vshll.u32 %v19663_v48, 16  ;;  %v19670_v48 = vld [vmem:[%s20011_s9 + $0x88] sm:$0xff]  }
 0x254   : > { %17548 = vmatmul.mubr.msk.bf16.gmra.mrb[4].mxu1 %vm391_vm1, %v4724_v2  ;;  %v5289_v2 = vshrl.u32 %v19664_v34, 16 }
 0x255   : > { %17551 = vmatprep.mubr.msk.bf16.mxu1 %vm391_vm1, %v4726_v4  ;;  %v19657_v4 = vld [vmem:[%s20011_s9 + $0x58] sm:$0xff]  }
 0x256   : > { %v5291_v47 = vrot.slane %v5289_v2, 3 }
 0x258   : > { %18072 = vmatmul.mubr.msk.bf16.gmra.mrb[24].mxu0 %vm391_vm1, %v19630_v54  ;;  %v19660_v54 = vld [vmem:[%s20011_s9 + $0xa8] ss:$0 sps:$4 sm:$0x77]  }
 0x259   : > { %18075 = vmatprep.mubr.msk.bf16.mxu0 %vm391_vm1, %v19633_v32  ;;  %v5283_v32 = vrot.slane %v5281_v33, 3  ;;  %v4755_v43 = vrot.slane %v19660_v54, 3  ;;  %v19671_v54 = vld [vmem:[%s20011_s9 + $0x90] sm:$0xff]  }
 0x25c   : > { %17552 = vmatmul.mubr.msk.bf16.gmra.mrb[8].mxu1 %vm391_vm1, %v4728_v44  ;;  %v5286_v44 = vrot.slane %v5284_v1, 4  ;;  %v5345_v1 = vrot.slane %v5343_v14, 3  ;;  %v19690_v14 = vld [vmem:[%s20011_s9 + $0x78] sm:$0xff]  }
 0x25d   : > { %17555 = vmatprep.mubr.msk.bf16.mxu1 %vm391_vm1, %v4730_v25  ;;  %v5294_v25 = vrot.slane %v5292_v58, 4  ;;  %v19680_v58 = vld [vmem:[%s20011_s9 + $0x50] sm:$0xff]  }
 0x25f   : > { %v5295_v9 = vor.u32 %v5294_v25, %v5291_v47  ;;  %v19674_v47 = vld [vmem:[%s20011_s9 + $0x98] sm:$0xff]  }
 0x260   : > { %18076 = vmatmul.mubr.msk.bf16.gmra.mrb[28].mxu0 %vm391_vm1, %v19634_v8  ;;  %v5298_v8 = vshrl.u32 %v19665_v37, 16 }
 0x261   : > { %18079 = vmatprep.mubr.msk.bf16.mxu0 %vm391_vm1, %v19637_v20  ;;  %v19658_v20 = vld [vmem:[%s20011_s9 + $0x60] sm:$0xff]  }
 0x262   : > { %v5300_v13 = vrot.slane %v5298_v8, 3  ;;  %v19681_v8 = vld [vmem:[%s20011_s9 + $0x58] sm:$0xff]  }
 0x263   : > { %v5370_v40 = vshrl.u32 %v19681_v8, 16 }
 0x264   : > { %17556 = vmatmul.mubr.msk.bf16.gmra.mrb[12].mxu1 %vm391_vm1, %v4732_v16  ;;  %v5287_v16 = vor.u32 %v5286_v44, %v5283_v32  ;;  %v5361_v32 = vshrl.u32 %v19680_v58, 16  ;;  %v5364_v44 = vshll.u32 %v19680_v58, 16  ;;  %v5406_v58 = vshrl.u32 %v19690_v14, 16 }
 0x265   : > { %17559 = vmatprep.mubr.msk.bf16.mxu1 %vm391_vm1, %v4734_v12  ;;  %v5307_v12 = vshrl.u32 %v19668_v30, 16 }
 0x266   : > { %v5296_v26 = vsel %vm5279_vm8, %v5287_v16, %v5295_v9  ;;  %v5366_v16 = vrot.slane %v5364_v44, 4  ;;  %v13142_v44 = vshrl.u32 %v19687_v46, 16 }
 0x268   : > { %18080 = vmatmul.mubr.msk.bf16.gmra.mrb[32].mxu0 %vm391_vm1, %v19638_v52  ;;  %v4756_v52 = vsel %vm4715_vm7, %v4753_v59, %v4755_v43 }
 0x269   : > { %18083 = vmatprep.mubr.msk.bf16.mxu0 %vm391_vm1, %v19641_v45  ;;  %v5303_v45 = vrot.slane %v5301_v60, 4 }
 0x26c   : > { %17560 = vmatmul.mubr.msk.bf16.gmra.mrb[16].mxu1 %vm391_vm1, %v4736_v63  ;;  %v19669_v63 = vld [vmem:[%s20011_s9 + $0x28] sm:$0xff]  }
 0x26d   : > { %17563 = vmatprep.mubr.msk.bf16.mxu1 %vm391_vm1, %v4738_v5  ;;  %v5309_v5 = vrot.slane %v5307_v12, 3  ;;  %v5316_v35 = vshrl.u32 %v19669_v63, 16 }
 0x26f   : > { %v5313_v39 = vor.u32 %v5312_v49, %v5309_v5  ;;  %v5318_v38 = vrot.slane %v5316_v35, 3  ;;  %v19686_v5 = vld [vmem:[%s20011_s9 + $0x28] sm:$0xff]  }
 0x270   : > { %18084 = vmatmul.mubr.msk.bf16.gmra.mrb[36].mxu0 %vm391_vm1, %v19642_v19  ;;  %v5304_v19 = vor.u32 %v5303_v45, %v5300_v13  ;;  %v19685_v35 = vld [vmem:[%s20011_s9 + $0x68] sm:$0xff]  }
 0x271   : > { %18089 = vmatprep.mubr.msk.bf16.mxu0 %vm391_vm1, %v19645_v31  ;;  %v5319_v31 = vshll.u32 %v19669_v63, 16 }
 0x272   : > { %v5314_v11 = vsel %vm5279_vm8, %v5304_v19, %v5313_v39 }
 0x274   : > { %17564 = vmatmul.mubr.msk.bf16.gmra.mrb[20].mxu1 %vm391_vm1, %v4740_v57  ;;  %v19662_v57 = vld [vmem:[%s20011_s9 + $0x70] sm:$0xff]  }
 0x275   : > { %17567 = vmatprep.mubr.msk.bf16.mxu1 %vm391_vm1, %v4742_v28  ;;  %v5325_v28 = vshrl.u32 %v19672_v56, 16  ;;  %v5372_v56 = vrot.slane %v5370_v40, 3 }
 0x278   : > { %18090 = vmatmul.mubr.msk.bf16.vlgmr.msra.gmra.mrb[0].mxu0 %vm391_vm1, %v19646_v51  ;;  %v5305_v51 = vsel %vm5279_vm8, %v5295_v9, %v5304_v19  ;;  %v19684_v9 = vld [vmem:[%s20011_s9 + $0x60] sm:$0xff]  }
 0x279   : > { %18130 = vmatpush3.bf16.msra.mxu0 %v13355_v42  ;;  %18093 = vmatprep.mubr.msk.bf16.mxu0 %vm391_vm1, %v19649_v21  ;;  %v5321_v21 = vrot.slane %v5319_v31, 4  ;;  %v19673_v42 = vld [vmem:[%s20011_s9 + $0x38] sm:$0xff]   ;;  %v5379_v45 = vshrl.u32 %v19684_v9, 16  ;;  %v5382_v63 = vshll.u32 %v19684_v9, 16 }
 0x27a   : > { %19282 = vmatprep.subr.msk.bf16.mxu0 %vm452_vm0, %v21599_v61  ;;  %v5334_v0 = vshrl.u32 %v19673_v42, 16 }
 0x27c   : > { %17568 = vmatmul.mubr.msk.bf16.gmra.mrb[24].mxu1 %vm391_vm1, %v4744_v62  ;;  %v6047_v62 = vsel %vm452_vm0, %v21534_v55, 0  ;;  %v5322_v55 = vor.u32 %v5321_v21, %v5318_v38  ;;  %v5336_v17 = vrot.slane %v5334_v0, 3  ;;  %v5388_v38 = vshrl.u32 %v19685_v35, 16 }
 0x27d   : > { %17571 = vmatprep.mubr.msk.bf16.mxu1 %vm391_vm1, %v4746_v22  ;;  %v5327_v22 = vrot.slane %v5325_v28, 3  ;;  %v19689_v28 = vld [vmem:[%s20011_s9 + $0x70] sm:$0xff]   ;;  %v5391_v21 = vshll.u32 %v19685_v35, 16  ;;  %v13138_v0 = vshll.u32 %v19687_v46, 16  ;;  %v13918_v46 = vsel %vm452_vm0, %v21599_v61, 0 }
 0x27e   : > { %v5323_v34 = vsel %vm5279_vm8, %v5313_v39, %v5322_v55  ;;  %v5384_v39 = vrot.slane %v5382_v63, 4 }
 0x27f   : > { %v5331_v36 = vor.u32 %v5330_v10, %v5327_v22  ;;  %v5400_v22 = vshll.u32 %v19689_v28, 16  ;;  %v19682_v10 = vld [vmem:[%s20011_s9 + $0xb8] sm:$0xff]  }
 0x280   : > { %18094 = vmatmul.mubr.msk.bf16.gmra.mrb[4].mxu0 %vm391_vm1, %v19650_v15  ;;  %v21655_v15 = vld [vmem:[%s22340_s1 + $0x14] sm:$0x3] }
 0x281   : > { %18097 = vmatprep.mubr.msk.bf16.mxu0 %vm391_vm1, %v19653_v50  ;;  %v5337_v50 = vshll.u32 %v19673_v42, 16  ;;  %v5332_v33 = vsel %vm5279_vm8, %v5322_v55, %v5331_v36  ;;  %v19679_v42 = vld [vmem:[%s20011_s9 + $0xb0] sm:$0xff]  }
 0x283   : > { %v5339_v59 = vrot.slane %v5337_v50, 4 }
 0x284   : > { %17572 = vmatmul.mubr.msk.bf16.gmra.mrb[28].mxu1 %vm391_vm1, %v4748_v18  ;;  %v19667_v18 = vld [vmem:[%s20011_s9 + $0x80] sm:$0xff]  }
 0x285   : > { %17575 = vmatprep.mubr.msk.bf16.mxu1 %vm391_vm1, %v4750_v6  ;;  %v5346_v6 = vshll.u32 %v19676_v27, 16  ;;  %v13131_v27 = vshrl.u32 %v19686_v5, 16 }
 0x287   : > { %v5348_v2 = vrot.slane %v5346_v6, 4 }
 0x288   : > { %18098 = vmatmul.mubr.msk.bf16.gmra.mrb[8].mxu0 %vm391_vm1, %v19654_v24  ;;  %v19677_v24 = vld [vmem:[%s20011_s9 + $0x48] sm:$0xff]  }
 0x289   : > { %18101 = vmatprep.mubr.msk.bf16.mxu0 %vm391_vm1, %v19657_v4  ;;  %v5340_v4 = vor.u32 %v5339_v59, %v5336_v17  ;;  %v5349_v37 = vor.u32 %v5348_v2, %v5345_v1  ;;  %v5402_v17 = vrot.slane %v5400_v22, 4  ;;  %v19693_v59 = vld [vmem:[%s20011_s9 + $0x80] sm:$0xff]   ;;  %v21726_v22 = vld [vmem:[%s22340_s1 + $0x2e] sm:$0x3] }
 0x28a   : > { %v19691_v1 = vld [vmem:[%s20011_s9 + $0x40] sm:$0xff]  }
 0x28b   : > { %v5341_v25 = vsel %vm5279_vm8, %v5331_v36, %v5340_v4  ;;  %v5350_v60 = vsel %vm5279_vm8, %v5340_v4, %v5349_v37  ;;  %v5393_v36 = vrot.slane %v5391_v21, 4  ;;  %v5409_v4 = vshll.u32 %v19690_v14, 16 }
 0x28c   : > { %17576 = vmatmul.mubr.msk.bf16.gmra.mrb[32].mxu1 %vm391_vm1, %v4752_v23  ;;  %v5352_v23 = vshrl.u32 %v19677_v24, 16 }
 0x28d   : > { %17579 = vmatprep.mubr.msk.bf16.mxu1 %vm391_vm1, %v4754_v29  ;;  %v5355_v29 = vshll.u32 %v19677_v24, 16 }
 0x28e   : > { %v5354_v30 = vrot.slane %v5352_v23, 3  ;;  %v19683_v23 = vld [vmem:[%s20011_s9 + $0xc0] sm:$0xff]  }
 0x28f   : > { %v5357_v43 = vrot.slane %v5355_v29, 4 }
 0x290   : > { %18102 = vmatmul.mubr.msk.bf16.gmra.mrb[12].mxu0 %vm391_vm1, %v19658_v20  ;;  %v5363_v20 = vrot.slane %v5361_v32, 3  ;;  %v5418_v32 = vshll.u32 %v19693_v59, 16 }
 0x291   : > { %18105 = vmatprep.mubr.msk.bf16.mxu0 %vm391_vm1, %v19661_v41  ;;  %v5358_v12 = vor.u32 %v5357_v43, %v5354_v30  ;;  %v5373_v41 = vshll.u32 %v19681_v8, 16  ;;  %v13154_v30 = vshll.u32 %v19691_v1, 16  ;;  %v5408_v8 = vrot.slane %v5406_v58, 3 }
 0x292   : > { %v5367_v13 = vor.u32 %v5366_v16, %v5363_v20  ;;  %v19694_v20 = vld [vmem:[%s20011_s9 + $0x88] sm:$0xff]  }
 0x293   : > { %v5359_v49 = vsel %vm5279_vm8, %v5349_v37, %v5358_v12  ;;  %v5375_v19 = vrot.slane %v5373_v41, 4  ;;  %v5415_v37 = vshrl.u32 %v19693_v59, 16  ;;  %v5420_v41 = vrot.slane %v5418_v32, 4 }
 0x294   : > { %17580 = vmatmul.mubr.msk.bf16.gmra.mrb[36].mxu1 %vm391_vm1, %v4756_v52  ;;  %v19675_v52 = vld [vmem:[%s20011_s9 + $0xa0] sm:$0xff]   ;;  %v5368_v31 = vsel %vm5279_vm8, %v5358_v12, %v5367_v13  ;;  %v19692_v12 = vld [vmem:[%s20011_s9 + $0x48] sm:$0xff]   ;;  %v13156_v63 = vrot.slane %v13154_v30, 1 }
 0x295   : > { %17585 = vmatprep.mubr.msk.bf16.mxu1 %vm391_vm1, %v5296_v26  ;;  %v19678_v26 = vld [vmem:[%s20011_s9 + $0xa8] sm:$0xff]   ;;  %v5417_v40 = vrot.slane %v5415_v37, 3 }
 0x296   : > { %v19700_v30 = vld [vmem:[%s20011_s9 + $0x68] sm:$0xff]  }
 0x297   : > { %v5421_v35 = vor.u32 %v5420_v41, %v5417_v40 }
 0x298   : > { %18106 = vmatmul.mubr.msk.bf16.gmra.mrb[16].mxu0 %vm391_vm1, %v19662_v57  ;;  %v5381_v57 = vrot.slane %v5379_v45, 3 }
 0x299   : > { %18109 = vmatprep.mubr.msk.bf16.mxu0 %vm391_vm1, %v19666_v7  ;;  %v13133_v7 = vshll.u32 %v19686_v5, 16 }
 0x29b   : > { %v13135_v55 = vrot.slane %v13133_v7, 1 }
 0x29c   : > { %17586 = vmatmul.mubr.msk.bf16.vlgmr.msra.gmra.mrb[0].mxu1 %vm391_vm1, %v5305_v51  ;;  %v5376_v51 = vor.u32 %v5375_v19, %v5372_v56  ;;  %v5427_v56 = vshll.u32 %v19694_v20, 16  ;;  %v13162_v19 = vshll.u32 %v19692_v12, 16 }
 0x29d   : > { %17626 = vmatpush3.bf16.msra.mxu1 %v6047_v62  ;;  %17589 = vmatprep.mubr.msk.bf16.mxu1 %vm391_vm1, %v5314_v11  ;;  %v5385_v62 = vor.u32 %v5384_v39, %v5381_v57  ;;  %v5397_v11 = vshrl.u32 %v19689_v28, 16  ;;  %v13136_v24 = vor.u32 %v13135_v55, %v13131_v27  ;;  %v13158_v28 = vshrl.u32 %v19691_v1, 16  ;;  %v19696_v27 = vld [vmem:[%s20011_s9 + $0x58] sm:$0xff]  }
 0x29e   : > { %19269 = vmatprep.subr.msk.bf16.mxu1 %vm452_vm0, %v21655_v15  ;;  %v5377_v50 = vsel %vm5279_vm8, %v5367_v13, %v5376_v51  ;;  %v13178_v59 = vshll.u32 %v19696_v27, 16 }
 0x29f   : > { %v5386_v6 = vsel %vm5279_vm8, %v5376_v51, %v5385_v62  ;;  %v13166_v51 = vshrl.u32 %v19692_v12, 16 }
 0x2a0   : > { %18110 = vmatmul.mubr.msk.bf16.gmra.mrb[20].mxu0 %vm391_vm1, %v19667_v18  ;;  %v5390_v18 = vrot.slane %v5388_v38, 3 }
 0x2a1   : > { %18113 = vmatprep.mubr.msk.bf16.mxu0 %vm391_vm1, %v19670_v48  ;;  %v19688_v48 = vld [vmem:[%s20011_s9 + $0x38] sm:$0xff]  }
 0x2a2   : > { %v5394_v2 = vor.u32 %v5393_v36, %v5390_v18  ;;  %v13146_v29 = vshll.u32 %v19688_v48, 16  ;;  %v13160_v18 = vor.u32 %v13158_v28, %v13156_v63 }
 0x2a4   : > { %17590 = vmatmul.mubr.msk.bf16.gmra.mrb[4].mxu1 %vm391_vm1, %v5323_v34  ;;  %v5399_v34 = vrot.slane %v5397_v11, 3  ;;  %v5395_v43 = vsel %vm5279_vm8, %v5385_v62, %v5394_v2  ;;  %v13148_v16 = vrot.slane %v13146_v29, 1  ;;  %v5429_v62 = vrot.slane %v5427_v56, 4  ;;  %v19698_v11 = vld [vmem:[%s20011_s9 + $0x98] sm:$0xff]  }
 0x2a5   : > { %17593 = vmatprep.mubr.msk.bf16.mxu1 %vm391_vm1, %v5332_v33  ;;  %v13140_v33 = vrot.slane %v13138_v0, 1 }
 0x2a7   : > { %v13144_v13 = vor.u32 %v13142_v44, %v13140_v33  ;;  %v19702_v44 = vld [vmem:[%s20011_s9 + $0xa8] ss:$0 sps:$4 sm:$0xff]  }
 0x2a8   : > { %18114 = vmatmul.mubr.msk.bf16.gmra.mrb[24].mxu0 %vm391_vm1, %v19671_v54  ;;  %v5403_v54 = vor.u32 %v5402_v17, %v5399_v34  ;;  %v5442_v34 = vshrl.u32 %v19698_v11, 16  ;;  %v5445_v17 = vshll.u32 %v19698_v11, 16  ;;  %v5460_v40 = vshrl.u32 %v19702_v44, 16 }
 0x2a9   : > { %18117 = vmatprep.mubr.msk.bf16.mxu0 %vm391_vm1, %v19674_v47  ;;  %v13141_v47 = vsel %vm915_vm4, %v13136_v24, %v13140_v33  ;;  %v13149_v39 = vsel %vm915_vm4, %v13144_v13, %v13148_v16  ;;  %v5463_v41 = vshll.u32 %v19702_v44, 16  ;;  %v19715_v44 = vld [vmem:[%s20011_s9 + $0xa0] sm:$0xff]  }
 0x2aa   : > { %v5404_v9 = vsel %vm5279_vm8, %v5394_v2, %v5403_v54  ;;  %v5444_v37 = vrot.slane %v5442_v34, 3  ;;  %v5447_v32 = vrot.slane %v5445_v17, 4 }
 0x2ac   : > { %17594 = vmatmul.mubr.msk.bf16.gmra.mrb[8].mxu1 %vm391_vm1, %v5341_v25  ;;  %v13150_v25 = vshrl.u32 %v19688_v48, 16  ;;  %v5448_v12 = vor.u32 %v5447_v32, %v5444_v37 }
 0x2ad   : > { %17597 = vmatprep.mubr.msk.bf16.mxu1 %vm391_vm1, %v5350_v60  ;;  %v5411_v60 = vrot.slane %v5409_v4, 4 }
 0x2ae   : > { %v13152_v45 = vor.u32 %v13150_v25, %v13148_v16 }
 0x2af   : > { %v5412_v5 = vor.u32 %v5411_v60, %v5408_v8 }
 0x2b0   : > { %18118 = vmatmul.mubr.msk.bf16.gmra.mrb[28].mxu0 %vm391_vm1, %v19675_v52  ;;  %v19697_v52 = vld [vmem:[%s20011_s9 + $0x90] sm:$0xff]   ;;  %v13157_v7 = vsel %vm915_vm4, %v13152_v45, %v13156_v63 }
 0x2b1   : > { %18121 = vmatprep.mubr.msk.bf16.mxu0 %vm391_vm1, %v19678_v26  ;;  %v19695_v26 = vld [vmem:[%s20011_s9 + $0x50] sm:$0xff]   ;;  %v5436_v57 = vshll.u32 %v19697_v52, 16  ;;  %v5413_v21 = vsel %vm5279_vm8, %v5403_v54, %v5412_v5  ;;  %v5422_v61 = vsel %vm5279_vm8, %v5412_v5, %v5421_v35  ;;  %v13198_v5 = vshrl.u32 %v19700_v30, 16 }
 0x2b2   : > { %v13170_v38 = vshll.u32 %v19695_v26, 16  ;;  %v13174_v58 = vshrl.u32 %v19695_v26, 16 }
 0x2b3   : > { %v5438_v0 = vrot.slane %v5436_v57, 4 }
 0x2b4   : > { %17598 = vmatmul.mubr.msk.bf16.gmra.mrb[12].mxu1 %vm391_vm1, %v5359_v49  ;;  %v5424_v49 = vshrl.u32 %v19694_v20, 16  ;;  %v13172_v14 = vrot.slane %v13170_v38, 1 }
 0x2b5   : > { %17601 = vmatprep.mubr.msk.bf16.mxu1 %vm391_vm1, %v5368_v31  ;;  %v5433_v31 = vshrl.u32 %v19697_v52, 16  ;;  %v13194_v52 = vshll.u32 %v19700_v30, 16  ;;  %v19710_v30 = vld [vmem:[%s20011_s9 + $0x24] sm:$0xff]  }
 0x2b6   : > { %v13176_v60 = vor.u32 %v13174_v58, %v13172_v14  ;;  %v6565_v58 = vsel %vm452_vm0, %v21655_v15, 0 }
 0x2b7   : > { %v5435_v55 = vrot.slane %v5433_v31, 3  ;;  %v13196_v31 = vrot.slane %v13194_v52, 1  ;;  %v19719_v52 = vld [vmem:[%s20011_s9 + $0xb0] sm:$0xff]  }
 0x2b8   : > { %18122 = vmatmul.mubr.msk.bf16.gmra.mrb[32].mxu0 %vm391_vm1, %v19679_v42  ;;  %v5426_v42 = vrot.slane %v5424_v49, 3 }
 0x2b9   : > { %18125 = vmatprep.mubr.msk.bf16.mxu0 %vm391_vm1, %v19682_v10  ;;  %v13164_v10 = vrot.slane %v13162_v19, 1  ;;  %v5439_v24 = vor.u32 %v5438_v0, %v5435_v55  ;;  %v5462_v19 = vrot.slane %v5460_v40, 3  ;;  %v19705_v55 = vld [vmem:[%s20011_s9 + $0xc] sm:$0xff]  }
 0x2ba   : > { %v5430_v48 = vor.u32 %v5429_v62, %v5426_v42 }
 0x2bb   : > { %v13168_v36 = vor.u32 %v13166_v51, %v13164_v10  ;;  %v13165_v2 = vsel %vm915_vm4, %v13160_v18, %v13164_v10  ;;  %v5449_v56 = vsel %vm5279_vm8, %v5439_v24, %v5448_v12  ;;  %v19707_v51 = vld [vmem:[%s20011_s9 + $0x80] sm:$0xff]  }
 0x2bc   : > { %17602 = vmatmul.mubr.msk.bf16.gmra.mrb[16].mxu1 %vm391_vm1, %v5377_v50  ;;  %v19701_v50 = vld [vmem:[%s20011_s9 + $0xa0] sm:$0xff]   ;;  %v5431_v54 = vsel %vm5279_vm8, %v5421_v35, %v5430_v48  ;;  %v5440_v25 = vsel %vm5279_vm8, %v5430_v48, %v5439_v24  ;;  %v5465_v35 = vrot.slane %v5463_v41, 4  ;;  %v13222_v17 = vshrl.u32 %v19707_v51, 16 }
 0x2bd   : > { %17605 = vmatprep.mubr.msk.bf16.mxu1 %vm391_vm1, %v5386_v6  ;;  %v19699_v6 = vld [vmem:[%s20011_s9 + $0x60] sm:$0xff]   ;;  %v5451_v33 = vshrl.u32 %v19701_v50, 16  ;;  %v5454_v1 = vshll.u32 %v19701_v50, 16  ;;  %v13173_v4 = vsel %vm915_vm4, %v13168_v36, %v13172_v14  ;;  %v19708_v50 = vld [vmem:[%s20011_s9 + $0x88] sm:$0xff]  }
 0x2be   : > { %v13186_v29 = vshll.u32 %v19699_v6, 16  ;;  %v13190_v63 = vshrl.u32 %v19699_v6, 16  ;;  %v5466_v38 = vor.u32 %v5465_v35, %v5462_v19  ;;  %v19711_v6 = vld [vmem:[%s20011_s9 + $0x90] sm:$0xff]   ;;  %v13226_v48 = vshll.u32 %v19708_v50, 16  ;;  %v19717_v19 = vld [vmem:[%s20011_s9 + $0x3c] sm:$0xff]  }
 0x2bf   : > { %v5456_v8 = vrot.slane %v5454_v1, 4  ;;  %v13234_v1 = vshll.u32 %v19711_v6, 16 }
 0x2c0   : > { %18126 = vmatmul.mubr.msk.bf16.gmra.mrb[36].mxu0 %vm391_vm1, %v19683_v23  ;;  %v13182_v23 = vshrl.u32 %v19696_v27, 16  ;;  %v13188_v16 = vrot.slane %v13186_v29, 1 }
 0x2c1   : > { %18131 = vmatprep.mubr.msk.bf16.mxu0 %vm391_vm1, %v13141_v47  ;;  %v13180_v47 = vrot.slane %v13178_v59, 1  ;;  %v19706_v59 = vld [vmem:[%s20011_s9 + $0x14] sm:$0xff]   ;;  %v13236_v32 = vrot.slane %v13234_v1, 1 }
 0x2c2   : > { %v13192_v28 = vor.u32 %v13190_v63, %v13188_v16  ;;  %v13254_v63 = vshrl.u32 %v19715_v44, 16 }
 0x2c3   : > { %v13184_v20 = vor.u32 %v13182_v23, %v13180_v47  ;;  %v13181_v45 = vsel %vm915_vm4, %v13176_v60, %v13180_v47  ;;  %v19712_v23 = vld [vmem:[%s20011_s9 + $0x98] sm:$0xff]   ;;  %v13250_v60 = vshll.u32 %v19715_v44, 16 }
 0x2c4   : > { %17606 = vmatmul.mubr.msk.bf16.gmra.mrb[20].mxu1 %vm391_vm1, %v5395_v43  ;;  %v5453_v43 = vrot.slane %v5451_v33, 3  ;;  %v13197_v42 = vsel %vm915_vm4, %v13192_v28, %v13196_v31  ;;  %v13230_v33 = vshrl.u32 %v19708_v50, 16  ;;  %v13242_v15 = vshll.u32 %v19712_v23, 16 }
 0x2c5   : > { %17609 = vmatprep.mubr.msk.bf16.mxu1 %vm391_vm1, %v5404_v9  ;;  %v19703_v9 = vld [vmem:[%s20011_s9 + $0x70] sm:$0xff]   ;;  %v13189_v26 = vsel %vm915_vm4, %v13184_v20, %v13188_v16  ;;  %v13252_v41 = vrot.slane %v13250_v60, 1 }
 0x2c6   : > { %v5457_v13 = vor.u32 %v5456_v8, %v5453_v43  ;;  %v13202_v49 = vshll.u32 %v19703_v9, 16  ;;  %v13206_v62 = vshrl.u32 %v19703_v9, 16  ;;  %v13246_v8 = vshrl.u32 %v19712_v23, 16  ;;  %v19713_v20 = vld [vmem:[%s20011_s9 + $0x2c] sm:$0xff]   ;;  %v19726_v23 = vld [vmem:[%s20011_s9 + $0x64] sm:$0xff]  }
 0x2c7   : > { %v13244_v16 = vrot.slane %v13242_v15, 1  ;;  %v19716_v9 = vld [vmem:[%s20011_s9 + $0xa8] sm:$0xff]   ;;  %v19736_v60 = vld [vmem:[%s20011_s9 + $0x50] sm:$0xff]  }
 0x2c8   : > { %18132 = vmatmul.mubr.msk.bf16.vlgmr.msra.gmra.mrb[0].mxu0 %vm391_vm1, %v13149_v39  ;;  %v5458_v57 = vsel %vm5279_vm8, %v5448_v12, %v5457_v13  ;;  %v19704_v39 = vld [vmem:[%s20011_s9 + $0x78] sm:$0xff]   ;;  %v5467_v27 = vsel %vm5279_vm8, %v5457_v13, %v5466_v38  ;;  %v13258_v13 = vshll.u32 %v19716_v9, 16  ;;  %v13270_v38 = vshrl.u32 %v19719_v52, 16 }
 0x2c9   : > { %18172 = vmatpush3.bf16.msra.mxu0 %v13918_v46  ;;  %18135 = vmatprep.mubr.msk.bf16.mxu0 %vm391_vm1, %v13157_v7  ;;  %v13200_v46 = vor.u32 %v13198_v5, %v13196_v31  ;;  %v13204_v7 = vrot.slane %v13202_v49, 1  ;;  %v13214_v10 = vshrl.u32 %v19704_v39, 16  ;;  %v13248_v40 = vor.u32 %v13246_v8, %v13244_v16  ;;  %v19720_v31 = vld [vmem:[%s20011_s9 + $0xb8] sm:$0xff]  }
 0x2ca   : > { %19283 = vmatprep.subr.msk.bf16.mxu0 %vm452_vm0, %v21726_v22  ;;  %v13262_v49 = vshrl.u32 %v19716_v9, 16  ;;  %v13260_v35 = vrot.slane %v13258_v13, 1  ;;  %v19740_v13 = vld [vmem:[%s20011_s9 + $0x60] sm:$0xff]  }
 0x2cb   : > { %v13205_v11 = vsel %vm915_vm4, %v13200_v46, %v13204_v7  ;;  %v13208_v18 = vor.u32 %v13206_v62, %v13204_v7  ;;  %v13253_v5 = vsel %vm915_vm4, %v13248_v40, %v13252_v41  ;;  %v19723_v46 = vld [vmem:[%s20011_s9 + $0xc0] sm:$0xff]   ;;  %v13274_v7 = vshll.u32 %v19720_v31, 16  ;;  %v19737_v40 = vld [vmem:[%s20011_s9 + $0x58] sm:$0xff]  }
 0x2cc   : > { %17610 = vmatmul.mubr.msk.bf16.gmra.mrb[24].mxu1 %vm391_vm1, %v5413_v21  ;;  %v13210_v21 = vshll.u32 %v19704_v39, 16  ;;  %v13264_v39 = vor.u32 %v13262_v49, %v13260_v35  ;;  %v13278_v62 = vshrl.u32 %v19720_v31, 16  ;;  %v19741_v49 = vld [vmem:[%s20011_s9 + $0x68] sm:$0xff]   ;;  %v19742_v31 = vld [vmem:[%s20011_s9 + $0x9c] sm:$0xff]  }
 0x2cd   : > { %17613 = vmatprep.mubr.msk.bf16.mxu1 %vm391_vm1, %v5422_v61  ;;  %v13218_v61 = vshll.u32 %v19707_v51, 16 }
 0x2ce   : > { %v13212_v0 = vrot.slane %v13210_v21, 1  ;;  %v19718_v21 = vld [vmem:[%s20011_s9 + $0x44] sm:$0xff]  }
 0x2cf   : > { %v13220_v14 = vrot.slane %v13218_v61, 1  ;;  %v13276_v61 = vrot.slane %v13274_v7, 1  ;;  %v19743_v7 = vld [vmem:[%s20011_s9 + $0xa4] sm:$0xff]  }
 0x2d0   : > { %18136 = vmatmul.mubr.msk.bf16.gmra.mrb[4].mxu0 %vm391_vm1, %v13165_v2  ;;  %v13216_v36 = vor.u32 %v13214_v10, %v13212_v0  ;;  %v13213_v34 = vsel %vm915_vm4, %v13208_v18, %v13212_v0  ;;  %v19709_v2 = vld [vmem:[%s20011_s9 + $0x1c] sm:$0xff]   ;;  %v19721_v10 = vld [vmem:[%s20011_s9 + $0x4c] sm:$0xff]  }
 0x2d1   : > { %18139 = vmatprep.mubr.msk.bf16.mxu0 %vm391_vm1, %v13173_v4  ;;  %v13228_v4 = vrot.slane %v13226_v48, 1  ;;  %v13224_v29 = vor.u32 %v13222_v17, %v13220_v14  ;;  %v13280_v0 = vor.u32 %v13278_v62, %v13276_v61  ;;  %v19728_v17 = vld [vmem:[%s20011_s9 + $0x30] sm:$0xff]  }
 0x2d2   : > { %v13221_v24 = vsel %vm915_vm4, %v13216_v36, %v13220_v14  ;;  %v13286_v36 = vshrl.u32 %v19723_v46, 16 }
 0x2d3   : > { %v13232_v37 = vor.u32 %v13230_v33, %v13228_v4  ;;  %v13229_v47 = vsel %vm915_vm4, %v13224_v29, %v13228_v4  ;;  %v19729_v4 = vld [vmem:[%s20011_s9 + $0x38] sm:$0xff]  }
 0x2d4   : > { %17614 = vmatmul.mubr.msk.bf16.gmra.mrb[28].mxu1 %vm391_vm1, %v5431_v54  ;;  %v21781_v54 = vld [vmem:[%s22340_s1 + $0x16] sm:$0x3]  ;;  %v13819_v44 = vrot.slane %v19729_v4, 1 }
 0x2d5   : > { %17617 = vmatprep.mubr.msk.bf16.mxu1 %vm391_vm1, %v5440_v25  ;;  %v13238_v25 = vshrl.u32 %v19711_v6, 16  ;;  %v13237_v43 = vsel %vm915_vm4, %v13232_v37, %v13236_v32  ;;  %v19722_v6 = vld [vmem:[%s20011_s9 + $0x54] sm:$0xff]   ;;  %v19732_v37 = vld [vmem:[%s20011_s9 + $0x40] sm:$0xff]  }
 0x2d6   : > { %v13821_v15 = vrot.slane %v19732_v37, 1 }
 0x2d7   : > { %v13240_v12 = vor.u32 %v13238_v25, %v13236_v32  ;;  %v19730_v32 = vld [vmem:[%s20011_s9 + $0x6c] sm:$0xff]  }
 0x2d8   : > { %18140 = vmatmul.mubr.msk.bf16.gmra.mrb[8].mxu0 %vm391_vm1, %v13181_v45  ;;  %v19733_v25 = vld [vmem:[%s20011_s9 + $0x48] sm:$0xff]   ;;  %v13822_v8 = vsel %vm1602_vm2, %v13819_v44, %v13821_v15 }
 0x2d9   : > { %18143 = vmatprep.mubr.msk.bf16.mxu0 %vm391_vm1, %v13189_v26  ;;  %v13245_v45 = vsel %vm915_vm4, %v13240_v12, %v13244_v16  ;;  %v19714_v26 = vld [vmem:[%s20011_s9 + $0x34] sm:$0xff]   ;;  %v21848_v16 = vld [vmem:[%s22340_s1 + $0x30] sm:$0x3]  ;;  %v13823_v9 = vrot.slane %v19733_v25, 1 }
 0x2da   : > { %v19759_v25 = vld [vmem:[%s20011_s9 + $0x4c] sm:$0xff]  }
 0x2db   : > { %v13824_v12 = vsel %vm1602_vm2, %v13821_v15, %v13823_v9  ;;  %v19761_v15 = vld [vmem:[%s20011_s9 + $0xb8] sm:$0xff]  }
 0x2dc   : > { %17618 = vmatmul.mubr.msk.bf16.gmra.mrb[32].mxu1 %vm391_vm1, %v5449_v56  ;;  %v13266_v56 = vshll.u32 %v19719_v52, 16 }
 0x2dd   : > { %17621 = vmatprep.mubr.msk.bf16.mxu1 %vm391_vm1, %v5458_v57  ;;  %v13256_v57 = vor.u32 %v13254_v63, %v13252_v41  ;;  %v19735_v41 = vld [vmem:[%s20011_s9 + $0x84] sm:$0xff]   ;;  %v13827_v63 = vrot.slane %v19737_v40, 1 }
 0x2de   : > { %v13268_v28 = vrot.slane %v13266_v56, 1  ;;  %v19739_v56 = vld [vmem:[%s20011_s9 + $0x94] sm:$0xff]  }
 0x2df   : > { %v13261_v51 = vsel %vm915_vm4, %v13256_v57, %v13260_v35  ;;  %v19744_v35 = vld [vmem:[%s20011_s9 + $0x70] sm:$0xff]   ;;  %v13831_v57 = vrot.slane %v19741_v49, 1 }
 0x2e0   : > { %18144 = vmatmul.mubr.msk.bf16.gmra.mrb[12].mxu0 %vm391_vm1, %v13197_v42  ;;  %v13269_v42 = vsel %vm915_vm4, %v13264_v39, %v13268_v28  ;;  %v13833_v39 = vrot.slane %v19744_v35, 1  ;;  %v19773_v35 = vld [vmem:[%s20011_s9 + $0x40] sm:$0xff]  }
 0x2e1   : > { %18147 = vmatprep.mubr.msk.bf16.mxu0 %vm391_vm1, %v13205_v11  ;;  %v13282_v11 = vshll.u32 %v19723_v46, 16  ;;  %v19745_v46 = vld [vmem:[%s20011_s9 + $0x78] sm:$0xff]  }
 0x2e3   : > { %v13284_v50 = vrot.slane %v13282_v11, 1 }
 0x2e4   : > { %17622 = vmatmul.mubr.msk.bf16.gmra.mrb[36].mxu1 %vm391_vm1, %v5467_v27  ;;  %v13272_v27 = vor.u32 %v13270_v38, %v13268_v28  ;;  %v19748_v38 = vld [vmem:[%s20011_s9 + $0x80] sm:$0xff]  }
 0x2e5   : > { %17627 = vmatprep.mubr.msk.bf16.mxu1 %vm391_vm1, %v19705_v55  ;;  %v19724_v55 = vld [vmem:[%s20011_s9 + $0xc8] ss:$0 sps:$4 sm:$0x11]   ;;  %v13285_v48 = vsel %vm915_vm4, %v13280_v0, %v13284_v50  ;;  %v13837_v62 = vrot.slane %v19748_v38, 1  ;;  %v14409_v38 = vshll.u32 %v19773_v35, 16 }
 0x2e6   : > { %v13277_v18 = vsel %vm915_vm4, %v13272_v27, %v13276_v61  ;;  %v13290_v14 = vshll.u32 %v19724_v55, 16  ;;  %v19747_v61 = vld [vmem:[%s20011_s9 + $0x1c] sm:$0xff]   ;;  %v19752_v55 = vld [vmem:[%s20011_s9 + $0x90] sm:$0xff]   ;;  %v19750_v0 = vld [vmem:[%s20011_s9 + $0x24] sm:$0xff]  }
 0x2e8   : > { %18148 = vmatmul.mubr.msk.bf16.gmra.mrb[16].mxu0 %vm391_vm1, %v13213_v34  ;;  %v19727_v34 = vld [vmem:[%s20011_s9 + $0x28] sm:$0xfe]   ;;  %v13292_v33 = vrot.slane %v13290_v14, 1  ;;  %v19849_v14 = vld [vmem:[%s22340_s1 + $0x18] sm:$0x3] }
 0x2e9   : > { %18151 = vmatprep.mubr.msk.bf16.mxu0 %vm391_vm1, %v13221_v24  ;;  %v13288_v24 = vor.u32 %v13286_v36, %v13284_v50  ;;  %v13816_v1 = vrot.slane %v19727_v34, 1  ;;  %v7251_v50 = vsel %vm452_vm0, %v21781_v54, 0  ;;  %v13841_v36 = vrot.slane %v19752_v55, 1 }
 0x2ea   : > { %v14411_v55 = vrot.slane %v14409_v38, 2  ;;  %v19783_v38 = vld [vmem:[%s20011_s9 + $0xa4] sm:$0xff]  }
 0x2ec   : > { %17628 = vmatmul.mubr.msk.bf16.vlgmr.msra.gmra.mrb[0].mxu1 %vm391_vm1, %v19706_v59  ;;  %v19725_v59 = vld [vmem:[%s20011_s9 + $0x5c] sm:$0xff]  }
 0x2ed   : > { %17668 = vmatpush3.bf16.msra.mxu1 %v6565_v58  ;;  %17631 = vmatprep.mubr.msk.bf16.mxu1 %vm391_vm1, %v19709_v2  ;;  %v13817_v2 = vrot.slane %v19728_v17, 1  ;;  %v13293_v58 = vsel %vm915_vm4, %v13288_v24, %v13292_v33  ;;  %v19756_v17 = vld [vmem:[%s20011_s9 + $0xa0] sm:$0xff]  }
 0x2ee   : > { %19270 = vmatprep.subr.msk.bf16.mxu1 %vm452_vm0, %v21781_v54  ;;  %v19753_v54 = vld [vmem:[%s20011_s9 + $0x98] sm:$0xff]   ;;  %v13845_v33 = vrot.slane %v19756_v17, 1 }
 0x2ef   : > { %v13818_v29 = vsel %vm1602_vm2, %v13816_v1, %v13817_v2  ;;  %v13843_v24 = vrot.slane %v19753_v54, 1 }
 0x2f0   : > { %18152 = vmatmul.mubr.msk.bf16.gmra.mrb[20].mxu0 %vm391_vm1, %v13229_v47  ;;  %v13820_v47 = vsel %vm1602_vm2, %v13817_v2, %v13819_v44  ;;  %v19757_v2 = vld [vmem:[%s20011_s9 + $0xa8] sm:$0xff]  }
 0x2f1   : > { %18155 = vmatprep.mubr.msk.bf16.mxu0 %vm391_vm1, %v13237_v43  ;;  %v19731_v43 = vld [vmem:[%s20011_s9 + $0x74] sm:$0xff]   ;;  %v13844_v1 = vsel %vm1602_vm2, %v13841_v36, %v13843_v24  ;;  %v13846_v4 = vsel %vm1602_vm2, %v13843_v24, %v13845_v33  ;;  %v13847_v37 = vrot.slane %v19757_v2, 1 }
 0x2f2   : > { %v19778_v24 = vld [vmem:[%s20011_s9 + $0x58] sm:$0xff]  }
 0x2f3   : > { %v13848_v44 = vsel %vm1602_vm2, %v13845_v33, %v13847_v37  ;;  %v15191_v33 = vsel %vm452_vm0, %v21848_v16, 0 }
 0x2f4   : > { %17632 = vmatmul.mubr.msk.bf16.gmra.mrb[4].mxu1 %vm391_vm1, %v19710_v30  ;;  %v14628_v30 = vsel %vm452_vm0, %v21726_v22, 0  ;;  %v13825_v22 = vrot.slane %v19736_v60, 1  ;;  %v19762_v60 = vld [vmem:[%s20011_s9 + $0x54] sm:$0xff]  }
 0x2f5   : > { %17635 = vmatprep.mubr.msk.bf16.mxu1 %vm391_vm1, %v19713_v20  ;;  %v19734_v20 = vld [vmem:[%s20011_s9 + $0x7c] sm:$0xff]  }
 0x2f6   : > { %v13826_v52 = vsel %vm1602_vm2, %v13823_v9, %v13825_v22 }
 0x2f8   : > { %18156 = vmatmul.mubr.msk.bf16.gmra.mrb[24].mxu0 %vm391_vm1, %v13245_v45  ;;  %v19738_v45 = vld [vmem:[%s20011_s9 + $0x8c] sm:$0xff]  }
 0x2f9   : > { %18159 = vmatprep.mubr.msk.bf16.mxu0 %vm391_vm1, %v13253_v5  ;;  %v13828_v5 = vsel %vm1602_vm2, %v13825_v22, %v13827_v63 }
 0x2fc   : > { %17636 = vmatmul.mubr.msk.bf16.gmra.mrb[8].mxu1 %vm391_vm1, %v19714_v26  ;;  %v13829_v26 = vrot.slane %v19740_v13, 1 }
 0x2fd   : > { %17639 = vmatprep.mubr.msk.bf16.mxu1 %vm391_vm1, %v19717_v19 }
 0x2fe   : > { %v13830_v19 = vsel %vm1602_vm2, %v13827_v63, %v13829_v26  ;;  %v13832_v28 = vsel %vm1602_vm2, %v13829_v26, %v13831_v57  ;;  %v19770_v63 = vld [vmem:[%s20011_s9 + $0x38] sm:$0xff]  }
 0x2ff   : > { %v19763_v26 = vld [vmem:[%s20011_s9 + $0x5c] sm:$0xff]  }
 0x300   : > { %18160 = vmatmul.mubr.msk.bf16.gmra.mrb[28].mxu0 %vm391_vm1, %v13261_v51  ;;  %v13834_v51 = vsel %vm1602_vm2, %v13831_v57, %v13833_v39 }
 0x301   : > { %18163 = vmatprep.mubr.msk.bf16.mxu0 %vm391_vm1, %v13269_v42  ;;  %v13835_v42 = vrot.slane %v19745_v46, 1 }
 0x303   : > { %v13836_v11 = vsel %vm1602_vm2, %v13833_v39, %v13835_v42  ;;  %v13838_v27 = vsel %vm1602_vm2, %v13835_v42, %v13837_v62  ;;  %v14397_v39 = vshrl.u32 %v19770_v63, 16 }
 0x304   : > { %17640 = vmatmul.mubr.msk.bf16.gmra.mrb[12].mxu1 %vm391_vm1, %v19718_v21  ;;  %v19746_v21 = vld [vmem:[%s20011_s9 + $0x14] sm:$0xff]  }
 0x305   : > { %17643 = vmatprep.mubr.msk.bf16.mxu1 %vm391_vm1, %v19721_v10  ;;  %v19749_v10 = vld [vmem:[%s20011_s9 + $0x88] sm:$0xff]   ;;  %v14399_v42 = vrot.slane %v14397_v39, 1  ;;  %v19780_v39 = vld [vmem:[%s20011_s9 + $0x9c] sm:$0xff]  }
 0x308   : > { %18164 = vmatmul.mubr.msk.bf16.gmra.mrb[32].mxu0 %vm391_vm1, %v13277_v18  ;;  %v13839_v18 = vrot.slane %v19749_v10, 1  ;;  %v19767_v10 = vld [vmem:[%s20011_s9 + $0x6c] sm:$0xff]  }
 0x309   : > { %18167 = vmatprep.mubr.msk.bf16.mxu0 %vm391_vm1, %v13285_v48  ;;  %v19751_v48 = vld [vmem:[%s20011_s9 + $0x2c] sm:$0xff]  }
 0x30a   : > { %v13842_v34 = vsel %vm1602_vm2, %v13839_v18, %v13841_v36 }
 0x30c   : > { %17644 = vmatmul.mubr.msk.bf16.gmra.mrb[16].mxu1 %vm391_vm1, %v19722_v6  ;;  %v13840_v6 = vsel %vm1602_vm2, %v13837_v62, %v13839_v18 }
 0x30d   : > { %17647 = vmatprep.mubr.msk.bf16.mxu1 %vm391_vm1, %v19725_v59  ;;  %v19754_v59 = vld [vmem:[%s20011_s9 + $0x34] sm:$0xff]  }
 0x310   : > { %18168 = vmatmul.mubr.msk.bf16.gmra.mrb[36].mxu0 %vm391_vm1, %v13293_v58  ;;  %v19755_v58 = vld [vmem:[%s20011_s9 + $0x3c] sm:$0xff]  }
 0x311   : > { %18173 = vmatprep.mubr.msk.bf16.mxu0 %vm391_vm1, %v13818_v29  ;;  %v19758_v29 = vld [vmem:[%s20011_s9 + $0x44] sm:$0xff]  }
 0x314   : > { %17648 = vmatmul.mubr.msk.bf16.gmra.mrb[20].mxu1 %vm391_vm1, %v19726_v23  ;;  %v19760_v23 = vld [vmem:[%s20011_s9 + $0xb0] sm:$0xff]  }
 0x315   : > { %17651 = vmatprep.mubr.msk.bf16.mxu1 %vm391_vm1, %v19730_v32  ;;  %v13849_v32 = vrot.slane %v19760_v23, 1  ;;  %v19781_v23 = vld [vmem:[%s20011_s9 + $0x60] sm:$0xff]  }
 0x318   : > { %18174 = vmatmul.mubr.msk.bf16.vlgmr.msra.gmra.mrb[0].mxu0 %vm391_vm1, %v13820_v47  ;;  %v19764_v47 = vld [vmem:[%s20011_s9 + $0xc0] sm:$0xff]  }
 0x319   : > { %18214 = vmatpush3.bf16.msra.mxu0 %v14628_v30  ;;  %18177 = vmatprep.mubr.msk.bf16.mxu0 %vm391_vm1, %v13822_v8  ;;  %v13850_v30 = vsel %vm1602_vm2, %v13847_v37, %v13849_v32  ;;  %v19769_v8 = vld [vmem:[%s20011_s9 + $0x30] sm:$0xff]   ;;  %v13853_v9 = vrot.slane %v19764_v47, 1  ;;  %v14445_v47 = vshll.u32 %v19781_v23, 16 }
 0x31a   : > { %19284 = vmatprep.subr.msk.bf16.mxu0 %vm452_vm0, %v21848_v16  ;;  %v14388_v40 = vshrl.u32 %v19769_v8, 16 }
 0x31c   : > { %17652 = vmatmul.mubr.msk.bf16.gmra.mrb[24].mxu1 %vm391_vm1, %v19731_v43  ;;  %v19768_v43 = vld [vmem:[%s20011_s9 + $0x28] sm:$0xfe]  }
 0x31d   : > { %17655 = vmatprep.mubr.msk.bf16.mxu1 %vm391_vm1, %v19734_v20  ;;  %v13851_v20 = vrot.slane %v19761_v15, 1  ;;  %v14380_v22 = vshrl.u32 %v19768_v43, 16  ;;  %v14442_v15 = vshrl.u32 %v19781_v23, 16 }
 0x31f   : > { %v13854_v13 = vsel %vm1602_vm2, %v13851_v20, %v13853_v9 }
 0x320   : > { %18178 = vmatmul.mubr.msk.bf16.gmra.mrb[4].mxu0 %vm391_vm1, %v13824_v12  ;;  %v14383_v12 = vshll.u32 %v19768_v43, 16 }
 0x321   : > { %18181 = vmatprep.mubr.msk.bf16.mxu0 %vm391_vm1, %v13826_v52  ;;  %v13852_v52 = vsel %vm1602_vm2, %v13849_v32, %v13851_v20  ;;  %v14433_v32 = vshrl.u32 %v19778_v24, 16 }
 0x322   : > { %v14385_v49 = vrot.slane %v14383_v12, 2  ;;  %v19785_v12 = vld [vmem:[%s20011_s9 + $0x70] sm:$0xff]  }
 0x324   : > { %17656 = vmatmul.mubr.msk.bf16.gmra.mrb[28].mxu1 %vm391_vm1, %v19735_v41  ;;  %v14391_v41 = vshll.u32 %v19769_v8, 16  ;;  %v19782_v8 = vld [vmem:[%s20011_s9 + $0x68] sm:$0xff]  }
 0x325   : > { %17659 = vmatprep.mubr.msk.bf16.mxu1 %vm391_vm1, %v19738_v45  ;;  %v19765_v45 = vld [vmem:[%s20011_s9 + $0xc8] ss:$0 sps:$4 sm:$0x11]  }
 0x326   : > { %v13855_v57 = vrot.slane %v19765_v45, 1  ;;  %v14454_v45 = vshll.u32 %v19782_v8, 16 }
 0x328   : > { %18182 = vmatmul.mubr.msk.bf16.gmra.mrb[8].mxu0 %vm391_vm1, %v13828_v5  ;;  %v14382_v5 = vrot.slane %v14380_v22, 1  ;;  %v14447_v22 = vrot.slane %v14445_v47, 2  ;;  %v19793_v47 = vld [vmem:[%s20011_s9 + $0x34] sm:$0xff]  }
 0x329   : > { %18185 = vmatprep.mubr.msk.bf16.mxu0 %vm391_vm1, %v13830_v19  ;;  %v14393_v19 = vrot.slane %v14391_v41, 2  ;;  %v19787_v41 = vld [vmem:[%s20011_s9 + $0x14] sm:$0xff]  }
 0x32a   : > { %v14386_v46 = vor.u32 %v14385_v49, %v14382_v5  ;;  %v14463_v5 = vshll.u32 %v19785_v12, 16  ;;  %v19788_v49 = vld [vmem:[%s20011_s9 + $0x1c] sm:$0xff]  }
 0x32c   : > { %17660 = vmatmul.mubr.msk.bf16.gmra.mrb[32].mxu1 %vm391_vm1, %v19739_v56  ;;  %v14390_v56 = vrot.slane %v14388_v40, 1  ;;  %v19779_v40 = vld [vmem:[%s20011_s9 + $0x94] sm:$0xff]  }
 0x32d   : > { %17663 = vmatprep.mubr.msk.bf16.mxu1 %vm391_vm1, %v19742_v31  ;;  %v19766_v31 = vld [vmem:[%s20011_s9 + $0x64] sm:$0xff]  }
 0x330   : > { %18186 = vmatmul.mubr.msk.bf16.gmra.mrb[12].mxu0 %vm391_vm1, %v13832_v28  ;;  %v14400_v28 = vshll.u32 %v19770_v63, 16 }
 0x331   : > { %18189 = vmatprep.mubr.msk.bf16.mxu0 %vm391_vm1, %v13834_v51  ;;  %v14406_v51 = vshrl.u32 %v19773_v35, 16 }
 0x332   : > { %v14402_v62 = vrot.slane %v14400_v28, 2 }
 0x334   : > { %17664 = vmatmul.mubr.msk.bf16.gmra.mrb[36].mxu1 %vm391_vm1, %v19743_v7  ;;  %v14394_v7 = vor.u32 %v14393_v19, %v14390_v56  ;;  %v14403_v18 = vor.u32 %v14402_v62, %v14399_v42  ;;  %v7029_v56 = vshll.u32 %v19787_v41, 16  ;;  %v7034_v62 = vshll.u32 %v19788_v49, 16 }
 0x335   : > { %17669 = vmatprep.mubr.msk.bf16.mxu1 %vm391_vm1, %v19746_v21  ;;  %v13856_v21 = vsel %vm1602_vm2, %v13853_v9, %v13855_v57  ;;  %v14444_v9 = vrot.slane %v14442_v15, 1  ;;  %v19786_v57 = vld [vmem:[%s20011_s9 + $0x78] sm:$0xff]  }
 0x336   : > { %v7031_v42 = vrot.slane %v7029_v56, 1  ;;  %v7062_v56 = vshrl.u32 %v19793_v47, 16 }
 0x337   : > { %v14448_v63 = vor.u32 %v14447_v22, %v14444_v9 }
 0x338   : > { %18190 = vmatmul.mubr.msk.bf16.gmra.mrb[16].mxu0 %vm391_vm1, %v13836_v11  ;;  %v19774_v11 = vld [vmem:[%s20011_s9 + $0x48] sm:$0xff]  }
 0x339   : > { %18193 = vmatprep.mubr.msk.bf16.mxu0 %vm391_vm1, %v13838_v27  ;;  %v14408_v27 = vrot.slane %v14406_v51, 1  ;;  %v14415_v36 = vshrl.u32 %v19774_v11, 16  ;;  %v19790_v51 = vld [vmem:[%s20011_s9 + $0x80] sm:$0xff]  }
 0x33b   : > { %v14417_v17 = vrot.slane %v14415_v36, 1  ;;  %v7036_v36 = vrot.slane %v7034_v62, 1  ;;  %v19800_v62 = vld [vmem:[%s20011_s9 + $0x4c] sm:$0xff]  }
 0x33c   : > { %17670 = vmatmul.mubr.msk.bf16.vlgmr.msra.gmra.mrb[0].mxu1 %vm391_vm1, %v19747_v61  ;;  %v14395_v61 = vsel %vm2166_vm3, %v14386_v46, %v14394_v7 }
 0x33d   : > { %17710 = vmatpush3.bf16.msra.mxu1 %v7251_v50  ;;  %17673 = vmatprep.mubr.msk.bf16.mxu1 %vm391_vm1, %v19750_v0  ;;  %v19777_v0 = vld [vmem:[%s20011_s9 + $0x50] sm:$0xff]  }
 0x33e   : > { %19272 = vmatprep.subr.msk.bf16.mxu1 %vm452_vm0, %v19849_v14  ;;  %v19771_v50 = vld [vmem:[%s20011_s9 + $0x74] sm:$0xff]   ;;  %v14418_v14 = vshll.u32 %v19774_v11, 16  ;;  %v14424_v54 = vshrl.u32 %v19777_v0, 16 }
 0x340   : > { %18194 = vmatmul.mubr.msk.bf16.gmra.mrb[20].mxu0 %vm391_vm1, %v13840_v6  ;;  %v14412_v6 = vor.u32 %v14411_v55, %v14408_v27  ;;  %v19789_v55 = vld [vmem:[%s20011_s9 + $0x24] sm:$0xff]  }
 0x341   : > { %18197 = vmatprep.mubr.msk.bf16.mxu0 %vm391_vm1, %v13842_v34  ;;  %v14404_v34 = vsel %vm2166_vm3, %v14394_v7, %v14403_v18  ;;  %v14465_v7 = vrot.slane %v14463_v5, 2  ;;  %v7046_v23 = vshrl.u32 %v19789_v55, 16 }
 0x342   : > { %v14413_v2 = vsel %vm2166_vm3, %v14403_v18, %v14412_v6 }
 0x344   : > { %17674 = vmatmul.mubr.msk.bf16.gmra.mrb[4].mxu1 %vm391_vm1, %v19751_v48  ;;  %v14427_v48 = vshll.u32 %v19777_v0, 16  ;;  %v14478_v0 = vshrl.u32 %v19790_v51, 16 }
 0x345   : > { %17677 = vmatprep.mubr.msk.bf16.mxu1 %vm391_vm1, %v19754_v59  ;;  %v14420_v59 = vrot.slane %v14418_v14, 2  ;;  %v19792_v14 = vld [vmem:[%s20011_s9 + $0x2c] sm:$0xff]  }
 0x346   : > { %v7054_v5 = vshrl.u32 %v19792_v14, 16 }
 0x347   : > { %v14421_v37 = vor.u32 %v14420_v59, %v14417_v17  ;;  %v19784_v17 = vld [vmem:[%s20011_s9 + $0xac] sm:$0xff]  }
 0x348   : > { %18198 = vmatmul.mubr.msk.bf16.gmra.mrb[24].mxu0 %vm391_vm1, %v13844_v1  ;;  %v19772_v1 = vld [vmem:[%s20011_s9 + $0x7c] sm:$0xff]  }
 0x349   : > { %18201 = vmatprep.mubr.msk.bf16.mxu0 %vm391_vm1, %v13846_v4  ;;  %v14429_v4 = vrot.slane %v14427_v48, 2 }
 0x34c   : > { %17678 = vmatmul.mubr.msk.bf16.gmra.mrb[8].mxu1 %vm391_vm1, %v19755_v58  ;;  %v14426_v58 = vrot.slane %v14424_v54, 1 }
 0x34d   : > { %17681 = vmatprep.mubr.msk.bf16.mxu1 %vm391_vm1, %v19758_v29  ;;  %v19775_v29 = vld [vmem:[%s20011_s9 + $0x84] sm:$0xff]  }
 0x34e   : > { %v14430_v16 = vor.u32 %v14429_v4, %v14426_v58  ;;  %v7038_v58 = vshrl.u32 %v19788_v49, 16 }
 0x350   : > { %18202 = vmatmul.mubr.msk.bf16.gmra.mrb[28].mxu0 %vm391_vm1, %v13848_v44  ;;  %v14436_v44 = vshll.u32 %v19778_v24, 16  ;;  %v14431_v20 = vsel %vm2166_vm3, %v14421_v37, %v14430_v16  ;;  %v7042_v24 = vshll.u32 %v19789_v55, 16 }
 0x351   : > { %18205 = vmatprep.mubr.msk.bf16.mxu0 %vm391_vm1, %v13850_v30  ;;  %v14435_v30 = vrot.slane %v14433_v32, 1 }
 0x352   : > { %v14438_v43 = vrot.slane %v14436_v44, 2 }
 0x354   : > { %17682 = vmatmul.mubr.msk.bf16.gmra.mrb[12].mxu1 %vm391_vm1, %v19759_v25  ;;  %v14422_v25 = vsel %vm2166_vm3, %v14412_v6, %v14421_v37 }
 0x355   : > { %17685 = vmatprep.mubr.msk.bf16.mxu1 %vm391_vm1, %v19762_v60  ;;  %v19776_v60 = vld [vmem:[%s20011_s9 + $0x8c] sm:$0xff]  }
 0x358   : > { %18206 = vmatmul.mubr.msk.bf16.gmra.mrb[32].mxu0 %vm391_vm1, %v13852_v52  ;;  %v14439_v52 = vor.u32 %v14438_v43, %v14435_v30  ;;  %v7040_v43 = vor.u32 %v7038_v58, %v7036_v36 }
 0x359   : > { %18209 = vmatprep.mubr.msk.bf16.mxu0 %vm391_vm1, %v13854_v13  ;;  %v14451_v13 = vshrl.u32 %v19782_v8, 16 }
 0x35a   : > { %v14440_v19 = vsel %vm2166_vm3, %v14430_v16, %v14439_v52  ;;  %v14449_v28 = vsel %vm2166_vm3, %v14439_v52, %v14448_v63  ;;  %v7044_v16 = vrot.slane %v7042_v24, 1  ;;  %v7058_v52 = vshll.u32 %v19793_v47, 16 }
 0x35b   : > { %v14453_v35 = vrot.slane %v14451_v13, 1 }
 0x35c   : > { %17686 = vmatmul.mubr.msk.bf16.gmra.mrb[16].mxu1 %vm391_vm1, %v19763_v26  ;;  %v14460_v26 = vshrl.u32 %v19785_v12, 16  ;;  %v7048_v8 = vor.u32 %v7046_v23, %v7044_v16 }
 0x35d   : > { %17689 = vmatprep.mubr.msk.bf16.mxu1 %vm391_vm1, %v19766_v31  ;;  %v14456_v31 = vrot.slane %v14454_v45, 2 }
 0x35e   : > { %v14462_v46 = vrot.slane %v14460_v26, 1  ;;  %v7045_v26 = vsel %vm915_vm4, %v7040_v43, %v7044_v16 }
 0x35f   : > { %v14457_v11 = vor.u32 %v14456_v31, %v14453_v35 }
 0x360   : > { %18210 = vmatmul.mubr.msk.bf16.gmra.mrb[36].mxu0 %vm391_vm1, %v13856_v21  ;;  %v7027_v21 = vshrl.u32 %v19787_v41, 16  ;;  %v14466_v27 = vor.u32 %v14465_v7, %v14462_v46  ;;  %v19797_v46 = vld [vmem:[%s20011_s9 + $0x44] sm:$0xff]  }
 0x361   : > { %18215 = vmatprep.mubr.msk.bf16.mxu0 %vm391_vm1, %v14395_v61  ;;  %v14472_v61 = vshll.u32 %v19786_v57, 16  ;;  %v14458_v6 = vsel %vm2166_vm3, %v14448_v63, %v14457_v11  ;;  %v19798_v63 = vld [vmem:[%s20011_s9 + $0xa0] sm:$0xff]  }
 0x362   : > { %v7032_v18 = vor.u32 %v7031_v42, %v7027_v21  ;;  %v14467_v59 = vsel %vm2166_vm3, %v14457_v11, %v14466_v27  ;;  %v14514_v7 = vshrl.u32 %v19798_v63, 16 }
 0x363   : > { %v14474_v48 = vrot.slane %v14472_v61, 2 }
 0x364   : > { %17690 = vmatmul.mubr.msk.bf16.gmra.mrb[20].mxu1 %vm391_vm1, %v19767_v10  ;;  %v14469_v10 = vshrl.u32 %v19786_v57, 16  ;;  %v7037_v4 = vsel %vm915_vm4, %v7032_v18, %v7036_v36  ;;  %v19802_v36 = vld [vmem:[%s20011_s9 + $0xb0] sm:$0xff]  }
 0x365   : > { %17693 = vmatprep.mubr.msk.bf16.mxu1 %vm391_vm1, %v19771_v50  ;;  %v14481_v50 = vshll.u32 %v19790_v51, 16  ;;  %v14517_v51 = vshll.u32 %v19798_v63, 16  ;;  %v14535_v58 = vshll.u32 %v19802_v36, 16  ;;  %v19805_v63 = vld [vmem:[%s20011_s9 + $0x64] sm:$0xff]  }
 0x366   : > { %v14471_v54 = vrot.slane %v14469_v10, 1 }
 0x367   : > { %v14519_v18 = vrot.slane %v14517_v51, 2  ;;  %v14537_v43 = vrot.slane %v14535_v58, 2 }
 0x368   : > { %18216 = vmatmul.mubr.msk.bf16.vlgmr.msra.gmra.mrb[0].mxu0 %vm391_vm1, %v14404_v34  ;;  %v19791_v34 = vld [vmem:[%s20011_s9 + $0x88] sm:$0xff]   ;;  %v14475_v37 = vor.u32 %v14474_v48, %v14471_v54  ;;  %v7078_v54 = vshrl.u32 %v19797_v46, 16  ;;  %v7082_v48 = vshll.u32 %v19800_v62, 16 }
 0x369   : > { %18256 = vmatpush3.bf16.msra.mxu0 %v15191_v33  ;;  %18219 = vmatprep.mubr.msk.bf16.mxu0 %vm391_vm1, %v14413_v2  ;;  %v14480_v33 = vrot.slane %v14478_v0, 1  ;;  %v19794_v2 = vld [vmem:[%s20011_s9 + $0x90] sm:$0xff]   ;;  %v14487_v32 = vshrl.u32 %v19791_v34, 16  ;;  %v14490_v44 = vshll.u32 %v19791_v34, 16  ;;  %v7074_v0 = vshll.u32 %v19797_v46, 16 }
 0x36a   : > { %v14499_v30 = vshll.u32 %v19794_v2, 16  ;;  %v14476_v9 = vsel %vm2166_vm3, %v14466_v27, %v14475_v37  ;;  %v19799_v27 = vld [vmem:[%s20011_s9 + $0xa8] sm:$0xff]  }
 0x36b   : > { %v14489_v22 = vrot.slane %v14487_v32, 1  ;;  %v14492_v12 = vrot.slane %v14490_v44, 2  ;;  %v7076_v24 = vrot.slane %v7074_v0, 1 }
 0x36c   : > { %17694 = vmatmul.mubr.msk.bf16.gmra.mrb[24].mxu1 %vm391_vm1, %v19772_v1  ;;  %v14483_v1 = vrot.slane %v14481_v50, 2  ;;  %v14501_v45 = vrot.slane %v14499_v30, 2  ;;  %v14516_v50 = vrot.slane %v14514_v7, 1  ;;  %v7106_v7 = vshll.u32 %v19805_v63, 16 }
 0x36d   : > { %17697 = vmatprep.mubr.msk.bf16.mxu1 %vm391_vm1, %v19775_v29  ;;  %v7050_v29 = vshll.u32 %v19792_v14, 16  ;;  %v14493_v35 = vor.u32 %v14492_v12, %v14489_v22  ;;  %v7080_v23 = vor.u32 %v7078_v54, %v7076_v24 }
 0x36e   : > { %v14484_v15 = vor.u32 %v14483_v1, %v14480_v33  ;;  %v14520_v33 = vor.u32 %v14519_v18, %v14516_v50  ;;  %v19801_v1 = vld [vmem:[%s20011_s9 + $0x54] sm:$0xff]   ;;  %v7108_v0 = vrot.slane %v7106_v7, 1 }
 0x36f   : > { %v7094_v22 = vshrl.u32 %v19801_v1, 16  ;;  %v19809_v18 = vld [vmem:[%s20011_s9 + $0x74] sm:$0xff]  }
 0x370   : > { %18220 = vmatmul.mubr.msk.bf16.gmra.mrb[4].mxu0 %vm391_vm1, %v14422_v25  ;;  %v14496_v25 = vshrl.u32 %v19794_v2, 16  ;;  %v14485_v41 = vsel %vm2166_vm3, %v14475_v37, %v14484_v15  ;;  %v14494_v11 = vsel %vm2166_vm3, %v14484_v15, %v14493_v35  ;;  %v14532_v2 = vshrl.u32 %v19802_v36, 16  ;;  %v19804_v37 = vld [vmem:[%s20011_s9 + $0x5c] sm:$0xff]  }
 0x371   : > { %18223 = vmatprep.mubr.msk.bf16.mxu0 %vm391_vm1, %v14431_v20  ;;  %v19796_v20 = vld [vmem:[%s20011_s9 + $0x3c] sm:$0xff]   ;;  %v7098_v12 = vshll.u32 %v19804_v37, 16 }
 0x372   : > { %v14498_v13 = vrot.slane %v14496_v25, 1  ;;  %v7070_v14 = vshrl.u32 %v19796_v20, 16  ;;  %v19803_v15 = vld [vmem:[%s20011_s9 + $0xb8] sm:$0xff]   ;;  %v7090_v25 = vshll.u32 %v19801_v1, 16  ;;  %v14534_v30 = vrot.slane %v14532_v2, 1 }
 0x374   : > { %17698 = vmatmul.mubr.msk.bf16.gmra.mrb[28].mxu1 %vm391_vm1, %v19776_v60  ;;  %v7052_v60 = vrot.slane %v7050_v29, 1  ;;  %v7084_v29 = vrot.slane %v7082_v48, 1 }
 0x375   : > { %17701 = vmatprep.mubr.msk.bf16.mxu1 %vm391_vm1, %v19779_v40  ;;  %v19795_v40 = vld [vmem:[%s20011_s9 + $0x98] sm:$0xff]  }
 0x376   : > { %v7053_v49 = vsel %vm915_vm4, %v7048_v8, %v7052_v60  ;;  %v14505_v31 = vshrl.u32 %v19795_v40, 16  ;;  %v14508_v57 = vshll.u32 %v19795_v40, 16  ;;  %v19806_v8 = vld [vmem:[%s20011_s9 + $0xc0] sm:$0xff]  }
 0x378   : > { %18224 = vmatmul.mubr.msk.bf16.gmra.mrb[8].mxu0 %vm391_vm1, %v14440_v19  ;;  %v7066_v19 = vshll.u32 %v19796_v20, 16  ;;  %v14507_v10 = vrot.slane %v14505_v31, 1  ;;  %v14510_v61 = vrot.slane %v14508_v57, 2  ;;  %v7086_v20 = vshrl.u32 %v19800_v62, 16 }
 0x379   : > { %18227 = vmatprep.mubr.msk.bf16.mxu0 %vm391_vm1, %v14449_v28  ;;  %v14502_v28 = vor.u32 %v14501_v45, %v14498_v13  ;;  %v7092_v13 = vrot.slane %v7090_v25, 1  ;;  %v14538_v45 = vor.u32 %v14537_v43, %v14534_v30  ;;  %v19817_v30 = vld [vmem:[%s20011_s9 + $0x8c] sm:$0xff]  }
 0x37a   : > { %v7068_v42 = vrot.slane %v7066_v19, 1  ;;  %v14511_v34 = vor.u32 %v14510_v61, %v14507_v10  ;;  %v7100_v19 = vrot.slane %v7098_v12, 1  ;;  %v7150_v7 = vshrl.u32 %v19817_v30, 16 }
 0x37b   : > { %v14503_v55 = vsel %vm2166_vm3, %v14493_v35, %v14502_v28  ;;  %v19808_v35 = vld [vmem:[%s20011_s9 + $0x6c] sm:$0xff]  }
 0x37c   : > { %17702 = vmatmul.mubr.msk.bf16.gmra.mrb[32].mxu1 %vm391_vm1, %v19780_v39  ;;  %v7060_v39 = vrot.slane %v7058_v52, 1  ;;  %v14512_v32 = vsel %vm2166_vm3, %v14502_v28, %v14511_v34  ;;  %v14521_v47 = vsel %vm2166_vm3, %v14511_v34, %v14520_v33  ;;  %v14544_v52 = vshll.u32 %v19803_v15, 16  ;;  %v19807_v28 = vld [vmem:[%s20011_s9 + $0xc8] ss:$0 sps:$4 sm:$0x33]  }
 0x37d   : > { %17705 = vmatprep.mubr.msk.bf16.mxu1 %vm391_vm1, %v19783_v38  ;;  %v7056_v38 = vor.u32 %v7054_v5, %v7052_v60  ;;  %v14553_v5 = vshll.u32 %v19806_v8, 16  ;;  %v7114_v10 = vshll.u32 %v19808_v35, 16  ;;  %v7118_v2 = vshrl.u32 %v19808_v35, 16 }
 0x37e   : > { %v7064_v21 = vor.u32 %v7062_v56, %v7060_v39  ;;  %v7096_v56 = vor.u32 %v7094_v22, %v7092_v13 }
 0x380   : > { %18228 = vmatmul.mubr.msk.bf16.gmra.mrb[12].mxu0 %vm391_vm1, %v14458_v6  ;;  %v7069_v6 = vsel %vm915_vm4, %v7064_v21, %v7068_v42  ;;  %v7101_v62 = vsel %vm915_vm4, %v7096_v56, %v7100_v19 }
 0x381   : > { %18231 = vmatprep.mubr.msk.bf16.mxu0 %vm391_vm1, %v14467_v59  ;;  %v14526_v59 = vshll.u32 %v19799_v27, 16 }
 0x383   : > { %v14528_v16 = vrot.slane %v14526_v59, 2  ;;  %v7122_v59 = vshll.u32 %v19809_v18, 16 }
 0x384   : > { %17706 = vmatmul.mubr.msk.bf16.gmra.mrb[36].mxu1 %vm391_vm1, %v19784_v17  ;;  %v14523_v17 = vshrl.u32 %v19799_v27, 16  ;;  %v14559_v27 = vshrl.u32 %v19807_v28, 16 }
 0x385   : > { %17711 = vmatprep.mubr.msk.bf16.mxu1 %vm391_vm1, %v7037_v4  ;;  %v7072_v4 = vor.u32 %v7070_v14, %v7068_v42  ;;  %v7102_v42 = vshrl.u32 %v19804_v37, 16  ;;  %v7116_v14 = vrot.slane %v7114_v10, 1  ;;  %v7124_v37 = vrot.slane %v7122_v59, 1  ;;  %v19822_v10 = vld [vmem:[%s20011_s9 + $0xa4] sm:$0xff]  }
 0x386   : > { %v14525_v44 = vrot.slane %v14523_v17, 1  ;;  %v14561_v48 = vrot.slane %v14559_v27, 1 }
 0x387   : > { %v7077_v60 = vsel %vm915_vm4, %v7072_v4, %v7076_v24  ;;  %v7104_v36 = vor.u32 %v7102_v42, %v7100_v19  ;;  %v19810_v24 = vld [vmem:[%s20011_s9 + $0x28] sm:$0xfc]   ;;  %v7126_v4 = vshrl.u32 %v19809_v18, 16  ;;  %v19821_v19 = vld [vmem:[%s20011_s9 + $0x9c] sm:$0xff]  }
 0x388   : > { %18232 = vmatmul.mubr.msk.bf16.gmra.mrb[16].mxu0 %vm391_vm1, %v14476_v9  ;;  %v7085_v9 = vsel %vm915_vm4, %v7080_v23, %v7084_v29  ;;  %v14529_v40 = vor.u32 %v14528_v16, %v14525_v44  ;;  %v19814_v16 = vld [vmem:[%s20011_s9 + $0x84] sm:$0xff]   ;;  %v19820_v18 = vld [vmem:[%s20011_s9 + $0x58] sm:$0xff]  }
 0x389   : > { %18235 = vmatprep.mubr.msk.bf16.mxu0 %vm391_vm1, %v14485_v41  ;;  %v14541_v41 = vshrl.u32 %v19803_v15, 16  ;;  %v7109_v1 = vsel %vm915_vm4, %v7104_v36, %v7108_v0  ;;  %v7120_v15 = vor.u32 %v7118_v2, %v7116_v14  ;;  %v15100_v59 = vrot.slane %v19820_v18, 2  ;;  %v19826_v2 = vld [vmem:[%s20011_s9 + $0xb4] ss:$0 sps:$4 sm:$0x11]  }
 0x38a   : > { %v14530_v31 = vsel %vm2166_vm3, %v14520_v33, %v14529_v40  ;;  %v14539_v46 = vsel %vm2166_vm3, %v14529_v40, %v14538_v45  ;;  %v19811_v33 = vld [vmem:[%s20011_s9 + $0x30] sm:$0xff]  }
 0x38b   : > { %v14543_v57 = vrot.slane %v14541_v41, 1  ;;  %v15090_v44 = vrot.slane %v19811_v33, 2  ;;  %v7125_v22 = vsel %vm915_vm4, %v7120_v15, %v7124_v37  ;;  %v7142_v41 = vshrl.u32 %v19814_v16, 16 }
 0x38c   : > { %17712 = vmatmul.mubr.msk.bf16.vlgmr.msra.gmra.mrb[0].mxu1 %vm391_vm1, %v7045_v26  ;;  %v14550_v26 = vshrl.u32 %v19806_v8, 16  ;;  %v19812_v8 = vld [vmem:[%s20011_s9 + $0x38] sm:$0xff]   ;;  %v7186_v15 = vshll.u32 %v19826_v2, 16 }
 0x38d   : > { %18298 = vmatpush3.bf16.msra.mxu1 %v19996_v3  ;;  %17715 = vmatprep.mubr.msk.bf16.mxu1 %vm391_vm1, %v7053_v49  ;;  %v7061_v3 = vsel %vm915_vm4, %v7056_v38, %v7060_v39  ;;  %v7088_v49 = vor.u32 %v7086_v20, %v7084_v29  ;;  %v14546_v39 = vrot.slane %v14544_v52, 2  ;;  %v14555_v38 = vrot.slane %v14553_v5, 2 }
 0x38e   : > { %v14552_v51 = vrot.slane %v14550_v26, 1  ;;  %v7138_v20 = vshll.u32 %v19814_v16, 16  ;;  %v7146_v52 = vshll.u32 %v19817_v30, 16  ;;  %v19818_v26 = vld [vmem:[%s20011_s9 + $0x94] sm:$0xff]  }
 0x38f   : > { %v7093_v21 = vsel %vm915_vm4, %v7088_v49, %v7092_v13  ;;  %v14547_v61 = vor.u32 %v14546_v39, %v14543_v57  ;;  %v15092_v13 = vrot.slane %v19812_v8, 2  ;;  %v7154_v39 = vshll.u32 %v19818_v26, 16 }
 0x390   : > { %18236 = vmatmul.mubr.msk.bf16.gmra.mrb[20].mxu0 %vm391_vm1, %v14494_v11  ;;  %v7110_v11 = vshrl.u32 %v19805_v63, 16  ;;  %v14556_v50 = vor.u32 %v14555_v38, %v14552_v51  ;;  %v7148_v56 = vrot.slane %v7146_v52, 1  ;;  %v7158_v38 = vshrl.u32 %v19818_v26, 16  ;;  %v19830_v52 = vld [vmem:[%s20011_s9 + $0x74] sm:$0xff]  }
 0x391   : > { %18239 = vmatprep.mubr.msk.bf16.mxu0 %vm391_vm1, %v14503_v55  ;;  %v14562_v55 = vshll.u32 %v19807_v28, 16  ;;  %v14548_v54 = vsel %vm2166_vm3, %v14538_v45, %v14547_v61  ;;  %v7140_v45 = vrot.slane %v7138_v20, 1  ;;  %v15093_v35 = vsel %vm2877_vm5, %v15090_v44, %v15092_v13  ;;  %v19819_v28 = vld [vmem:[%s20011_s9 + $0x50] sm:$0xff]  }
 0x392   : > { %v14557_v17 = vsel %vm2166_vm3, %v14547_v61, %v14556_v50  ;;  %v7152_v61 = vor.u32 %v7150_v7, %v7148_v56 }
 0x393   : > { %v14564_v34 = vrot.slane %v14562_v55, 2  ;;  %v7144_v49 = vor.u32 %v7142_v41, %v7140_v45 }
 0x394   : > { %17716 = vmatmul.mubr.msk.bf16.gmra.mrb[4].mxu1 %vm391_vm1, %v7061_v3  ;;  %v7112_v3 = vor.u32 %v7110_v11, %v7108_v0  ;;  %v15098_v11 = vrot.slane %v19819_v28, 2  ;;  %v19825_v0 = vld [vmem:[%s20011_s9 + $0xac] sm:$0xff]  }
 0x395   : > { %17719 = vmatprep.mubr.msk.bf16.mxu1 %vm391_vm1, %v7069_v6  ;;  %v19813_v6 = vld [vmem:[%s20011_s9 + $0x7c] sm:$0xff]   ;;  %v14565_v29 = vor.u32 %v14564_v34, %v14561_v48  ;;  %v7149_v51 = vsel %vm915_vm4, %v7144_v49, %v7148_v56  ;;  %v7174_v34 = vshrl.u32 %v19822_v10, 16  ;;  %v7182_v16 = vshrl.u32 %v19825_v0, 16 }
 0x396   : > { %v7117_v58 = vsel %vm915_vm4, %v7112_v3, %v7116_v14  ;;  %v7130_v23 = vshll.u32 %v19813_v6, 16  ;;  %v7134_v12 = vshrl.u32 %v19813_v6, 16  ;;  %v7170_v3 = vshll.u32 %v19822_v10, 16  ;;  %v19823_v14 = vld [vmem:[%s20011_s9 + $0x60] sm:$0xff]  }
 0x397   : > { %v14566_v43 = vsel %vm2166_vm3, %v14556_v50, %v14565_v29  ;;  %v15102_v33 = vrot.slane %v19823_v14, 2  ;;  %v19824_v29 = vld [vmem:[%s20011_s9 + $0x68] sm:$0xff]   ;;  %v7735_v49 = vrot.slane %v19830_v52, 1  ;;  %v19839_v10 = vld [vmem:[%s20011_s9 + $0xa0] sm:$0xff]  }
 0x398   : > { %18240 = vmatmul.mubr.msk.bf16.gmra.mrb[24].mxu0 %vm391_vm1, %v14512_v32  ;;  %v15089_v32 = vrot.slane %v19810_v24, 2  ;;  %v7132_v25 = vrot.slane %v7130_v23, 1  ;;  %v7172_v24 = vrot.slane %v7170_v3, 1  ;;  %v15101_v23 = vsel %vm2877_vm5, %v15098_v11, %v15100_v59 }
 0x399   : > { %18243 = vmatprep.mubr.msk.bf16.mxu0 %vm391_vm1, %v14521_v47  ;;  %v7128_v47 = vor.u32 %v7126_v4, %v7124_v37  ;;  %v15103_v37 = vsel %vm2877_vm5, %v15100_v59, %v15102_v33  ;;  %v15104_v30 = vrot.slane %v19824_v29, 2  ;;  %v15118_v18 = vrot.slane %v19839_v10, 2 }
 0x39a   : > { %v7136_v5 = vor.u32 %v7134_v12, %v7132_v25 }
 0x39b   : > { %v7133_v40 = vsel %vm915_vm4, %v7128_v47, %v7132_v25  ;;  %v19829_v25 = vld [vmem:[%s20011_s9 + $0x6c] sm:$0xff]  }
 0x39c   : > { %17720 = vmatmul.mubr.msk.bf16.gmra.mrb[8].mxu1 %vm391_vm1, %v7077_v60  ;;  %v15091_v60 = vsel %vm2877_vm5, %v15089_v32, %v15090_v44  ;;  %v19827_v32 = vld [vmem:[%s20011_s9 + $0x70] sm:$0xff]   ;;  %v7733_v20 = vrot.slane %v19829_v25, 1 }
 0x39d   : > { %17723 = vmatprep.mubr.msk.bf16.mxu1 %vm391_vm1, %v7085_v9  ;;  %v19815_v9 = vld [vmem:[%s20011_s9 + $0x40] sm:$0xff]  }
 0x39e   : > { %v15094_v63 = vrot.slane %v19815_v9, 2  ;;  %v15105_v9 = vsel %vm2877_vm5, %v15102_v33, %v15104_v30 }
 0x3a0   : > { %18244 = vmatmul.mubr.msk.bf16.gmra.mrb[28].mxu0 %vm391_vm1, %v14530_v31  ;;  %v19816_v31 = vld [vmem:[%s20011_s9 + $0x48] sm:$0xff]   ;;  %v15095_v57 = vsel %vm2877_vm5, %v15092_v13, %v15094_v63  ;;  %v22355_v13 = vrot.slane %v20075_v53, 1 }
 0x3a1   : > { %18247 = vmatprep.mubr.msk.bf16.mxu0 %vm391_vm1, %v14539_v46  ;;  %v7141_v46 = vsel %vm915_vm4, %v7136_v5, %v7140_v45  ;;  %v15096_v42 = vrot.slane %v19816_v31, 2  ;;  %v19835_v31 = vld [vmem:[%s20011_s9 + $0x90] sm:$0xff]  }
 0x3a2   : > { %v7734_v45 = vsel %vm1602_vm2, %v22355_v13, %v7733_v20 }
 0x3a3   : > { %v15097_v50 = vsel %vm2877_vm5, %v15094_v63, %v15096_v42  ;;  %v15099_v36 = vsel %vm2877_vm5, %v15096_v42, %v15098_v11  ;;  %v19833_v63 = vld [vmem:[%s20011_s9 + $0x7c] sm:$0xff]  }
 0x3a4   : > { %17724 = vmatmul.mubr.msk.bf16.gmra.mrb[12].mxu1 %vm391_vm1, %v7093_v21  ;;  %v7162_v21 = vshll.u32 %v19821_v19, 16  ;;  %v7737_v56 = vrot.slane %v19833_v63, 1 }
 0x3a5   : > { %17727 = vmatprep.mubr.msk.bf16.mxu1 %vm391_vm1, %v7101_v62  ;;  %v7156_v62 = vrot.slane %v7154_v39, 1  ;;  %v19834_v39 = vld [vmem:[%s20011_s9 + $0x84] sm:$0xff]  }
 0x3a6   : > { %v7164_v55 = vrot.slane %v7162_v21, 1  ;;  %v7738_v28 = vsel %vm1602_vm2, %v7735_v49, %v7737_v56 }
 0x3a7   : > { %v7160_v27 = vor.u32 %v7158_v38, %v7156_v62  ;;  %v7157_v6 = vsel %vm915_vm4, %v7152_v61, %v7156_v62  ;;  %v7739_v38 = vrot.slane %v19834_v39, 1  ;;  %v19836_v62 = vld [vmem:[%s20011_s9 + $0x98] sm:$0xff]  }
 0x3a8   : > { %18248 = vmatmul.mubr.msk.bf16.gmra.mrb[32].mxu0 %vm391_vm1, %v14548_v54  ;;  %v7166_v54 = vshrl.u32 %v19821_v19, 16 }
 0x3a9   : > { %18251 = vmatprep.mubr.msk.bf16.mxu0 %vm391_vm1, %v14557_v17  ;;  %v7165_v48 = vsel %vm915_vm4, %v7160_v27, %v7164_v55  ;;  %v7178_v17 = vshll.u32 %v19825_v0, 16  ;;  %v7740_v61 = vsel %vm1602_vm2, %v7737_v56, %v7739_v38  ;;  %v19838_v27 = vld [vmem:[%s20011_s9 + $0x94] sm:$0xff]   ;;  %v19841_v0 = vld [vmem:[%s20011_s9 + $0x9c] sm:$0xff]  }
 0x3aa   : > { %v7745_v3 = vrot.slane %v19841_v0, 1 }
 0x3ab   : > { %v7180_v4 = vrot.slane %v7178_v17, 1  ;;  %v19842_v17 = vld [vmem:[%s20011_s9 + $0xa4] sm:$0xff]  }
 0x3ac   : > { %17728 = vmatmul.mubr.msk.bf16.gmra.mrb[16].mxu1 %vm391_vm1, %v7109_v1  ;;  %v7168_v1 = vor.u32 %v7166_v54, %v7164_v55  ;;  %v7747_v2 = vrot.slane %v19842_v17, 1 }
 0x3ad   : > { %17731 = vmatprep.mubr.msk.bf16.mxu1 %vm391_vm1, %v7117_v58  ;;  %v7176_v58 = vor.u32 %v7174_v34, %v7172_v24  ;;  %v7184_v8 = vor.u32 %v7182_v16, %v7180_v4 }
 0x3ae   : > { %v7173_v44 = vsel %vm915_vm4, %v7168_v1, %v7172_v24  ;;  %v19845_v24 = vld [vmem:[%s20011_s9 + $0xac] sm:$0xff]  }
 0x3af   : > { %v7181_v47 = vsel %vm915_vm4, %v7176_v58, %v7180_v4  ;;  %v7749_v58 = vrot.slane %v19845_v24, 1 }
 0x3b0   : > { %18252 = vmatmul.mubr.msk.bf16.gmra.mrb[36].mxu0 %vm391_vm1, %v14566_v43  ;;  %v15106_v43 = vrot.slane %v19827_v32, 2  ;;  %v7748_v32 = vsel %vm1602_vm2, %v7745_v3, %v7747_v2 }
 0x3b1   : > { %18257 = vmatprep.mubr.msk.bf16.mxu0 %vm391_vm1, %v15091_v60  ;;  %v7188_v60 = vrot.slane %v7186_v15, 1  ;;  %v7750_v16 = vsel %vm1602_vm2, %v7747_v2, %v7749_v58 }
 0x3b2   : > { %v15107_v12 = vsel %vm2877_vm5, %v15104_v30, %v15106_v43 }
 0x3b3   : > { %v7189_v41 = vsel %vm915_vm4, %v7184_v8, %v7188_v60 }
 0x3b4   : > { %17732 = vmatmul.mubr.msk.bf16.gmra.mrb[20].mxu1 %vm391_vm1, %v7125_v22  ;;  %v19828_v22 = vld [vmem:[%s20011_s9 + $0x78] sm:$0xff]  }
 0x3b5   : > { %17735 = vmatprep.mubr.msk.bf16.mxu1 %vm391_vm1, %v7133_v40  ;;  %v19831_v40 = vld [vmem:[%s20011_s9 + $0x80] sm:$0xff]   ;;  %v15108_v26 = vrot.slane %v19828_v22, 2 }
 0x3b6   : > { %v15110_v5 = vrot.slane %v19831_v40, 2 }
 0x3b7   : > { %v15109_v19 = vsel %vm2877_vm5, %v15106_v43, %v15108_v26  ;;  %v19848_v43 = vld [vmem:[%s20011_s9 + $0xc8] ss:$0 sps:$4 sm:$0x33]  }
 0x3b8   : > { %18258 = vmatmul.mubr.msk.bf16.vlgmr.msra.gmra.mrb[0].mxu0 %vm391_vm1, %v15093_v35  ;;  %v19832_v35 = vld [vmem:[%s20011_s9 + $0x88] sm:$0xff]   ;;  %v15111_v53 = vsel %vm2877_vm5, %v15108_v26, %v15110_v5 }
 0x3b9   : > { %18261 = vmatprep.mubr.msk.bf16.mxu0 %vm391_vm1, %v15095_v57  ;;  %v7736_v57 = vsel %vm1602_vm2, %v7733_v20, %v7735_v49  ;;  %v15112_v7 = vrot.slane %v19832_v35, 2  ;;  %v15128_v20 = vrot.slane %v19848_v43, 2 }
 0x3bb   : > { %v15113_v42 = vsel %vm2877_vm5, %v15110_v5, %v15112_v7 }
 0x3bc   : > { %17736 = vmatmul.mubr.msk.bf16.gmra.mrb[24].mxu1 %vm391_vm1, %v7141_v46  ;;  %v19837_v46 = vld [vmem:[%s20011_s9 + $0x8c] sm:$0xff]  }
 0x3bd   : > { %17739 = vmatprep.mubr.msk.bf16.mxu1 %vm391_vm1, %v7149_v51  ;;  %v15114_v51 = vrot.slane %v19835_v31, 2  ;;  %v7741_v21 = vrot.slane %v19837_v46, 1 }
 0x3bf   : > { %v15115_v11 = vsel %vm2877_vm5, %v15112_v7, %v15114_v51  ;;  %v7742_v55 = vsel %vm1602_vm2, %v7739_v38, %v7741_v21 }
 0x3c0   : > { %18262 = vmatmul.mubr.msk.bf16.gmra.mrb[4].mxu0 %vm391_vm1, %v15097_v50  ;;  %v15116_v50 = vrot.slane %v19836_v62, 2 }
 0x3c1   : > { %18265 = vmatprep.mubr.msk.bf16.mxu0 %vm391_vm1, %v15099_v36  ;;  %v7743_v36 = vrot.slane %v19838_v27, 1 }
 0x3c2   : > { %v15117_v14 = vsel %vm2877_vm5, %v15114_v51, %v15116_v50  ;;  %v15119_v54 = vsel %vm2877_vm5, %v15116_v50, %v15118_v18  ;;  %v22197_v51 = vld [vmem:[%s22341_s2] ss:$0 sm:$0xff] }
 0x3c3   : > { %v7744_v34 = vsel %vm1602_vm2, %v7741_v21, %v7743_v36  ;;  %v7746_v59 = vsel %vm1602_vm2, %v7743_v36, %v7745_v3 }
 0x3c4   : > { %17740 = vmatmul.mubr.msk.bf16.gmra.mrb[28].mxu1 %vm391_vm1, %v7157_v6  ;;  %v19840_v6 = vld [vmem:[%s20011_s9 + $0xa8] sm:$0xff]  }
 0x3c5   : > { %17743 = vmatprep.mubr.msk.bf16.mxu1 %vm391_vm1, %v7165_v48  ;;  %v19843_v48 = vld [vmem:[%s20011_s9 + $0xb0] sm:$0xff]   ;;  %v15120_v33 = vrot.slane %v19840_v6, 2 }
 0x3c6   : > { %v15122_v1 = vrot.slane %v19843_v48, 2 }
 0x3c7   : > { %v15121_v4 = vsel %vm2877_vm5, %v15118_v18, %v15120_v33 }
 0x3c8   : > { %18266 = vmatmul.mubr.msk.bf16.gmra.mrb[8].mxu0 %vm391_vm1, %v15101_v23  ;;  %v19844_v23 = vld [vmem:[%s20011_s9 + $0xb8] sm:$0xff]   ;;  %v15123_v29 = vsel %vm2877_vm5, %v15120_v33, %v15122_v1 }
 0x3c9   : > { %18269 = vmatprep.mubr.msk.bf16.mxu0 %vm391_vm1, %v15103_v37  ;;  %v19847_v37 = vld [vmem:[%s20011_s9 + $0xc0] sm:$0xff]   ;;  %v15124_v15 = vrot.slane %v19844_v23, 2 }
 0x3cb   : > { %v15125_v30 = vsel %vm2877_vm5, %v15122_v1, %v15124_v15 }
 0x3cc   : > { %17744 = vmatmul.mubr.msk.bf16.gmra.mrb[32].mxu1 %vm391_vm1, %v7173_v44  ;;  %v19846_v44 = vld [vmem:[%s20011_s9 + $0xb4] ss:$0 sps:$4 sm:$0x11]   ;;  %s161_s9 = sand.u32 1, %s19904_s13  }
 0x3cd   : > { %17747 = vmatprep.mubr.msk.bf16.mxu1 %vm391_vm1, %v7181_v47  ;;  %v15126_v47 = vrot.slane %v19847_v37, 2  ;;  %v7751_v25 = vrot.slane %v19846_v44, 1  ;;  %s19285_s29 = smul.u32 320, %s161_s9  ;;  %s22298_s11 = scalar_lea.sflag [#allocation4], %s161_s9 }
 0x3cf   : > { %v15127_v8 = vsel %vm2877_vm5, %v15124_v15, %v15126_v47  ;;  %v7752_v60 = vsel %vm1602_vm2, %v7749_v58, %v7751_v25  ;;  %s22201_s5 = scalar_lea.vmem [#allocation3], %s19285_s29 }
 0x3d0   : > { %18270 = vmatmul.mubr.msk.bf16.gmra.mrb[12].mxu0 %vm391_vm1, %v15105_v9  ;;  %v15129_v9 = vsel %vm2877_vm5, %v15126_v47, %v15128_v20  ;;  %s15607_s7 = sshll.u32 %s22201_s5, 4  ;;  %s22290_s7 = int_to_ptr.vmem [resolvable:$true] %s15607_s7 }
 0x3d1   : > { %18273 = vmatprep.mubr.msk.bf16.mxu0 %vm391_vm1, %v15107_v12  ;;  %s19850_s17 = scalar_lea.vmem %s22290_s7, 5120  ;;  %p19857_p0 = scmp.lt.s32.totalorder %s22290_s7, %s19855_s20 }
 0x3d2   : > { %p19851_p11 = scmp.ne.s32.totalorder %s22290_s7, %s19850_s17  ;;  %p19858_p1 = scmp.lt.s32.totalorder %s19856_s24, %s19850_s17 }
 0x3d4   : > { %17748 = vmatmul.mubr.msk.bf16.gmra.mrb[36].mxu1 %vm391_vm1, %v7189_v41  ;;  %p19852_p12 = pnand %p19851_p11, %p19975_p5  ;;  %p19859_p2 = por %p19858_p1, %p19857_p0 }
 0x3d5   : > { %17773 = vmatprep.mubr.msk.bf16.mxu1 %vm391_vm1, %v7734_v45 }
 0x3d6   : > { %p19853_p13 = pneg %p19852_p12 }
 0x3d8   : > { %18274 = vmatmul.mubr.msk.bf16.gmra.mrb[16].mxu0 %vm391_vm1, %v15109_v19  ;;  %p19860_p3 = pnand %p19859_p2, %p19853_p13 }
 0x3d9   : > { %18277 = vmatprep.mubr.msk.bf16.mxu0 %vm391_vm1, %v15111_v53 }
 0x3dc   : > { %17774 = vmatmul.mubr.msk.bf16.vlgmr.msra.gmra.mrb[20].mxu1 %vm391_vm1, %v7736_v57 }
 0x3dd   : > { %17777 = vmatprep.mubr.msk.bf16.mxu1 %vm391_vm1, %v7738_v28 }
 0x3e0   : > { %18278 = vmatmul.mubr.msk.bf16.gmra.mrb[20].mxu0 %vm391_vm1, %v15113_v42 }
 0x3e1   : > { %18281 = vmatprep.mubr.msk.bf16.mxu0 %vm391_vm1, %v15115_v11 }
 0x3e4   : > { %17778 = vmatmul.mubr.msk.bf16.gmra.mrb[24].mxu1 %vm391_vm1, %v7740_v61 }
 0x3e5   : > { %17781 = vmatprep.mubr.msk.bf16.mxu1 %vm391_vm1, %v7742_v55 }
 0x3e8   : > { %18282 = vmatmul.mubr.msk.bf16.gmra.mrb[24].mxu0 %vm391_vm1, %v15117_v14 }
 0x3e9   : > { %18285 = vmatprep.mubr.msk.bf16.mxu0 %vm391_vm1, %v15119_v54 }
 0x3ec   : > { %17782 = vmatmul.mubr.msk.bf16.gmra.mrb[28].mxu1 %vm391_vm1, %v7744_v34 }
 0x3ed   : > { %17785 = vmatprep.mubr.msk.bf16.mxu1 %vm391_vm1, %v7746_v59 }
 0x3f0   : > { %18286 = vmatmul.mubr.msk.bf16.gmra.mrb[28].mxu0 %vm391_vm1, %v15121_v4 }
 0x3f1   : > { %18289 = vmatprep.mubr.msk.bf16.mxu0 %vm391_vm1, %v15123_v29 }
 0x3f4   : > { %17786 = vmatmul.mubr.msk.bf16.gmra.mrb[32].mxu1 %vm391_vm1, %v7748_v32 }
 0x3f5   : > { %17789 = vmatprep.mubr.msk.bf16.mxu1 %vm391_vm1, %v7750_v16 }
 0x3f8   : > { %18290 = vmatmul.mubr.msk.bf16.gmra.mrb[32].mxu0 %vm391_vm1, %v15125_v30 }
 0x3f9   : > { %18293 = vmatprep.mubr.msk.bf16.mxu0 %vm391_vm1, %v15127_v8 }
 0x3fc   : > { %17790 = vmatmul.mubr.msk.bf16.gmra.mrb[36].mxu1 %vm391_vm1, %v7752_v60 }
 0x400   : > { %18294 = vmatmul.mubr.msk.bf16.gmra.mrb[36].mxu0 %vm391_vm1, %v15129_v9 }
 0x45f   : > { %v17713_v22 = vpop.f32.mrb[0].mxu1 }
 0x460   : > { %v7287_v12 = vpop.f32.mrb[1].mxu1 }
 0x461   : > { %v17714_v40 = vpop.f32.mrb[2].mxu1 }
 0x462   : > { %v7290_v41 = vpop.f32.mrb[3].mxu1 }
 0x467   : > { %v17717_v52 = vpop.f32.mrb[4].mxu1 }
 0x468   : > { %v7303_v13 = vpop.f32.mrb[5].mxu1 }
 0x469   : > { %v17718_v45 = vpop.f32.mrb[6].mxu1 }
 0x46a   : > { %v7306_v63 = vpop.f32.mrb[7].mxu1 }
 0x46f   : > { %v17721_v26 = vpop.f32.mrb[8].mxu1 }
 0x470   : > { %v7319_v5 = vpop.f32.mrb[9].mxu1 }
 0x471   : > { %v17722_v49 = vpop.f32.mrb[10].mxu1 }
 0x472   : > { %v7322_v56 = vpop.f32.mrb[11].mxu1 }
 0x477   : > { %v17725_v19 = vpop.f32.mrb[12].mxu1 }
 0x478   : > { %v7335_v35 = vpop.f32.mrb[13].mxu1 }
 0x479   : > { %v22179_v53 = vpop.f32.mrb[14].mxu1 }
 0x47a   : > { %v22181_v31 = vpop.f32.mrb[15].mxu1 }
 0x47f   : > { %v22183_v57 = vpop.f32.mrb[16].mxu1 }
 0x480   : > { %v22185_v39 = vpop.f32.mrb[17].mxu1 }
 0x481   : > { %v22187_v28 = vpop.f32.mrb[18].mxu1 }
 0x482   : > { %v22189_v46 = vpop.f32.mrb[19].mxu1 }
 0x48b   : > { %v18259_v7 = vpop.f32.mrb[0].mxu0 }
 0x48c   : > { %v18299_v38 = vadd.f32 %v18259_v7, %v17713_v22  ;;  %v15227_v21 = vpop.f32.mrb[1].mxu0 }
 0x48d   : > { %v18300_v42 = vadd.f32 %v15227_v21, %v7287_v12  ;;  %v18260_v62 = vpop.f32.mrb[2].mxu0 }
 0x48e   : > { %v15515_v11 = vadd.f32 %v18299_v38, %v22197_v51  ;;  %v18301_v10 = vadd.f32 %v18260_v62, %v17714_v40  ;;  %v15230_v61 = vpop.f32.mrb[3].mxu0 }
 0x48f   : > { %v15513_v27 = vadd.f32 %v18300_v42, %v22197_v51  ;;  %v18302_v55 = vadd.f32 %v15230_v61, %v7290_v41 }
 0x490   : > { %15555 = vst [vmem:[%s22201_s5 + $0x10] sm:$0xff] %v15515_v11  ;;  %v15516_v0 = vadd.f32 %v18301_v10, %v22197_v51 }
 0x491   : > { %15553 = vst [vmem:[%s22201_s5] sm:$0xff] %v15513_v27  ;;  %v15514_v50 = vadd.f32 %v18302_v55, %v22197_v51 }
 0x492   : > { %15556 = vst [vmem:[%s22201_s5 + $0x18] sm:$0xff] %v15516_v0 }
 0x493   : > { %15554 = vst [vmem:[%s22201_s5 + $0x8] sm:$0xff] %v15514_v50  ;;  %v18263_v18 = vpop.f32.mrb[4].mxu0 }
 0x494   : > { %v18303_v36 = vadd.f32 %v18263_v18, %v17717_v52  ;;  %v15243_v3 = vpop.f32.mrb[5].mxu0 }
 0x495   : > { %v18304_v14 = vadd.f32 %v15243_v3, %v7303_v13  ;;  %v18264_v6 = vpop.f32.mrb[6].mxu0 }
 0x496   : > { %v15519_v54 = vadd.f32 %v18303_v36, %v22197_v51  ;;  %v18305_v48 = vadd.f32 %v18264_v6, %v17718_v45  ;;  %v15246_v34 = vpop.f32.mrb[7].mxu0 }
 0x497   : > { %v15517_v17 = vadd.f32 %v18304_v14, %v22197_v51  ;;  %v18306_v59 = vadd.f32 %v15246_v34, %v7306_v63 }
 0x498   : > { %15559 = vst [vmem:[%s22201_s5 + $0x30] sm:$0xff] %v15519_v54  ;;  %v15520_v24 = vadd.f32 %v18305_v48, %v22197_v51 }
 0x499   : > { %15557 = vst [vmem:[%s22201_s5 + $0x20] sm:$0xff] %v15517_v17  ;;  %v15518_v33 = vadd.f32 %v18306_v59, %v22197_v51 }
 0x49a   : > { %15560 = vst [vmem:[%s22201_s5 + $0x38] sm:$0xff] %v15520_v24 }
 0x49b   : > { %15558 = vst [vmem:[%s22201_s5 + $0x28] sm:$0xff] %v15518_v33  ;;  %v18267_v1 = vpop.f32.mrb[8].mxu0 }
 0x49c   : > { %v18307_v2 = vadd.f32 %v18267_v1, %v17721_v26  ;;  %v15259_v58 = vpop.f32.mrb[9].mxu0 }
 0x49d   : > { %v18308_v4 = vadd.f32 %v15259_v58, %v7319_v5  ;;  %v18268_v23 = vpop.f32.mrb[10].mxu0 }
 0x49e   : > { %v15523_v29 = vadd.f32 %v18307_v2, %v22197_v51  ;;  %v18309_v37 = vadd.f32 %v18268_v23, %v17722_v49  ;;  %v15262_v32 = vpop.f32.mrb[11].mxu0 }
 0x49f   : > { %v15521_v44 = vadd.f32 %v18308_v4, %v22197_v51  ;;  %v18310_v16 = vadd.f32 %v15262_v32, %v7322_v56 }
 0x4a0   : > { %15563 = vst [vmem:[%s22201_s5 + $0x50] sm:$0xff] %v15523_v29  ;;  %v15524_v15 = vadd.f32 %v18309_v37, %v22197_v51 }
 0x4a1   : > { %15561 = vst [vmem:[%s22201_s5 + $0x40] sm:$0xff] %v15521_v44  ;;  %v15522_v47 = vadd.f32 %v18310_v16, %v22197_v51 }
 0x4a2   : > { %15564 = vst [vmem:[%s22201_s5 + $0x58] sm:$0xff] %v15524_v15 }
 0x4a3   : > { %15562 = vst [vmem:[%s22201_s5 + $0x48] sm:$0xff] %v15522_v47  ;;  %v18271_v25 = vpop.f32.mrb[12].mxu0 }
 0x4a4   : > { %v18311_v30 = vadd.f32 %v18271_v25, %v17725_v19  ;;  %v15275_v43 = vpop.f32.mrb[13].mxu0 }
 0x4a5   : > { %v18312_v8 = vadd.f32 %v15275_v43, %v7335_v35  ;;  %v18272_v60 = vpop.f32.mrb[14].mxu0 }
 0x4a6   : > { %v15527_v20 = vadd.f32 %v18311_v30, %v22197_v51  ;;  %v18313_v9 = vadd.f32 %v18272_v60, %v22179_v53  ;;  %v15278_v22 = vpop.f32.mrb[15].mxu0 }
 0x4a7   : > { %v15525_v12 = vadd.f32 %v18312_v8, %v22197_v51  ;;  %v18314_v40 = vadd.f32 %v15278_v22, %v22181_v31 }
 0x4a8   : > { %15567 = vst [vmem:[%s22201_s5 + $0x70] sm:$0xff] %v15527_v20  ;;  %v15528_v41 = vadd.f32 %v18313_v9, %v22197_v51 }
 0x4a9   : > { %15565 = vst [vmem:[%s22201_s5 + $0x60] sm:$0xff] %v15525_v12  ;;  %v15526_v52 = vadd.f32 %v18314_v40, %v22197_v51 }
 0x4aa   : > { %15568 = vst [vmem:[%s22201_s5 + $0x78] sm:$0xff] %v15528_v41 }
 0x4ab   : > { %15566 = vst [vmem:[%s22201_s5 + $0x68] sm:$0xff] %v15526_v52  ;;  %v18275_v13 = vpop.f32.mrb[16].mxu0 }
 0x4ac   : > { %v18315_v45 = vadd.f32 %v18275_v13, %v22183_v57  ;;  %v15291_v63 = vpop.f32.mrb[17].mxu0 }
 0x4ad   : > { %v18316_v26 = vadd.f32 %v15291_v63, %v22185_v39  ;;  %v18276_v5 = vpop.f32.mrb[18].mxu0 }
 0x4ae   : > { %v15531_v56 = vadd.f32 %v18315_v45, %v22197_v51  ;;  %v18317_v19 = vadd.f32 %v18276_v5, %v22187_v28  ;;  %v15294_v35 = vpop.f32.mrb[19].mxu0 }
 0x4af   : > { %v17775_v49 = vpop.f32.mrb[20].mxu1  ;;  %v15529_v31 = vadd.f32 %v18316_v26, %v22197_v51  ;;  %v18318_v7 = vadd.f32 %v15294_v35, %v22189_v46 }
 0x4b0   : > { %v7930_v53 = vpop.f32.mrb[21].mxu1  ;;  %15571 = vst [vmem:[%s22201_s5 + $0x90] sm:$0xff] %v15531_v56  ;;  %v15532_v57 = vadd.f32 %v18317_v19, %v22197_v51 }
 0x4b1   : > { %v17776_v38 = vpop.f32.mrb[22].mxu1  ;;  %15569 = vst [vmem:[%s22201_s5 + $0x80] sm:$0xff] %v15529_v31  ;;  %v15530_v39 = vadd.f32 %v18318_v7, %v22197_v51 }
 0x4b2   : > { %v7933_v21 = vpop.f32.mrb[23].mxu1  ;;  %15572 = vst [vmem:[%s22201_s5 + $0x98] sm:$0xff] %v15532_v57 }
 0x4b3   : > { %15570 = vst [vmem:[%s22201_s5 + $0x88] sm:$0xff] %v15530_v39  ;;  %v18279_v42 = vpop.f32.mrb[20].mxu0 }
 0x4b4   : > { %v18319_v28 = vadd.f32 %v18279_v42, %v17775_v49  ;;  %v15307_v62 = vpop.f32.mrb[21].mxu0 }
 0x4b5   : > { %v18320_v11 = vadd.f32 %v15307_v62, %v7930_v53  ;;  %v18280_v10 = vpop.f32.mrb[22].mxu0 }
 0x4b6   : > { %v15535_v61 = vadd.f32 %v18319_v28, %v22197_v51  ;;  %v18321_v27 = vadd.f32 %v18280_v10, %v17776_v38  ;;  %v15310_v55 = vpop.f32.mrb[23].mxu0 }
 0x4b7   : > { %v17779_v46 = vpop.f32.mrb[24].mxu1  ;;  %v15533_v50 = vadd.f32 %v18320_v11, %v22197_v51  ;;  %v18322_v18 = vadd.f32 %v15310_v55, %v7933_v21 }
 0x4b8   : > { %v7946_v0 = vpop.f32.mrb[25].mxu1  ;;  %15575 = vst [vmem:[%s22201_s5 + $0xb0] sm:$0xff] %v15535_v61  ;;  %v15536_v3 = vadd.f32 %v18321_v27, %v22197_v51 }
 0x4b9   : > { %v17780_v36 = vpop.f32.mrb[26].mxu1  ;;  %15573 = vst [vmem:[%s22201_s5 + $0xa0] sm:$0xff] %v15533_v50  ;;  %v15534_v6 = vadd.f32 %v18322_v18, %v22197_v51 }
 0x4ba   : > { %v7949_v14 = vpop.f32.mrb[27].mxu1  ;;  %15576 = vst [vmem:[%s22201_s5 + $0xb8] sm:$0xff] %v15536_v3 }
 0x4bb   : > { %15574 = vst [vmem:[%s22201_s5 + $0xa8] sm:$0xff] %v15534_v6  ;;  %v18283_v54 = vpop.f32.mrb[24].mxu0 }
 0x4bc   : > { %v18323_v48 = vadd.f32 %v18283_v54, %v17779_v46  ;;  %v15323_v34 = vpop.f32.mrb[25].mxu0 }
 0x4bd   : > { %v18324_v17 = vadd.f32 %v15323_v34, %v7946_v0  ;;  %v18284_v59 = vpop.f32.mrb[26].mxu0 }
 0x4be   : > { %v15539_v33 = vadd.f32 %v18323_v48, %v22197_v51  ;;  %v18325_v1 = vadd.f32 %v18284_v59, %v17780_v36  ;;  %v15326_v2 = vpop.f32.mrb[27].mxu0 }
 0x4bf   : > { %v17783_v24 = vpop.f32.mrb[28].mxu1  ;;  %v15537_v4 = vadd.f32 %v18324_v17, %v22197_v51  ;;  %v18326_v23 = vadd.f32 %v15326_v2, %v7949_v14 }
 0x4c0   : > { %v7962_v58 = vpop.f32.mrb[29].mxu1  ;;  %15579 = vst [vmem:[%s22201_s5 + $0xd0] sm:$0xff] %v15539_v33  ;;  %v15540_v37 = vadd.f32 %v18325_v1, %v22197_v51 }
 0x4c1   : > { %v17784_v29 = vpop.f32.mrb[30].mxu1  ;;  %15577 = vst [vmem:[%s22201_s5 + $0xc0] sm:$0xff] %v15537_v4  ;;  %v15538_v44 = vadd.f32 %v18326_v23, %v22197_v51 }
 0x4c2   : > { %v7965_v32 = vpop.f32.mrb[31].mxu1  ;;  %15580 = vst [vmem:[%s22201_s5 + $0xd8] sm:$0xff] %v15540_v37 }
 0x4c3   : > { %15578 = vst [vmem:[%s22201_s5 + $0xc8] sm:$0xff] %v15538_v44  ;;  %v18287_v16 = vpop.f32.mrb[28].mxu0 }
 0x4c4   : > { %v18327_v15 = vadd.f32 %v18287_v16, %v17783_v24  ;;  %v15339_v47 = vpop.f32.mrb[29].mxu0 }
 0x4c5   : > { %v18328_v25 = vadd.f32 %v15339_v47, %v7962_v58  ;;  %v18288_v30 = vpop.f32.mrb[30].mxu0 }
 0x4c6   : > { %v15543_v8 = vadd.f32 %v18327_v15, %v22197_v51  ;;  %v18329_v60 = vadd.f32 %v18288_v30, %v17784_v29  ;;  %v15342_v20 = vpop.f32.mrb[31].mxu0 }
 0x4c7   : > { %v17787_v43 = vpop.f32.mrb[32].mxu1  ;;  %v15541_v22 = vadd.f32 %v18328_v25, %v22197_v51  ;;  %v18330_v12 = vadd.f32 %v15342_v20, %v7965_v32 }
 0x4c8   : > { %v7978_v9 = vpop.f32.mrb[33].mxu1  ;;  %15583 = vst [vmem:[%s22201_s5 + $0xf0] sm:$0xff] %v15543_v8  ;;  %v15544_v41 = vadd.f32 %v18329_v60, %v22197_v51 }
 0x4c9   : > { %v17788_v40 = vpop.f32.mrb[34].mxu1  ;;  %15581 = vst [vmem:[%s22201_s5 + $0xe0] sm:$0xff] %v15541_v22  ;;  %v15542_v13 = vadd.f32 %v18330_v12, %v22197_v51 }
 0x4ca   : > { %v7981_v52 = vpop.f32.mrb[35].mxu1  ;;  %15584 = vst [vmem:[%s22201_s5 + $0xf8] sm:$0xff] %v15544_v41 }
 0x4cb   : > { %15582 = vst [vmem:[%s22201_s5 + $0xe8] sm:$0xff] %v15542_v13  ;;  %v18291_v45 = vpop.f32.mrb[32].mxu0 }
 0x4cc   : > { %v18331_v63 = vadd.f32 %v18291_v45, %v17787_v43  ;;  %v15355_v26 = vpop.f32.mrb[33].mxu0 }
 0x4cd   : > { %v18332_v5 = vadd.f32 %v15355_v26, %v7978_v9  ;;  %v18292_v49 = vpop.f32.mrb[34].mxu0 }
 0x4ce   : > { %v15547_v19 = vadd.f32 %v18331_v63, %v22197_v51  ;;  %v18333_v35 = vadd.f32 %v18292_v49, %v17788_v40  ;;  %v15358_v53 = vpop.f32.mrb[35].mxu0 }
 0x4cf   : > { %v17791_v56 = vpop.f32.mrb[36].mxu1  ;;  %v15545_v7 = vadd.f32 %v18332_v5, %v22197_v51  ;;  %v18334_v38 = vadd.f32 %v15358_v53, %v7981_v52 }
 0x4d0   : > { %v7994_v31 = vpop.f32.mrb[37].mxu1  ;;  %15587 = vst [vmem:[%s22201_s5 + $0x110] sm:$0xff] %v15547_v19  ;;  %v15548_v21 = vadd.f32 %v18333_v35, %v22197_v51 }
 0x4d1   : > { %v17792_v57 = vpop.f32.mrb[38].mxu1  ;;  %15585 = vst [vmem:[%s22201_s5 + $0x100] sm:$0xff] %v15545_v7  ;;  %v15546_v42 = vadd.f32 %v18334_v38, %v22197_v51 }
 0x4d2   : > { %v7997_v39 = vpop.f32.mrb[39].mxu1  ;;  %15588 = vst [vmem:[%s22201_s5 + $0x118] sm:$0xff] %v15548_v21 }
 0x4d3   : > { %15586 = vst [vmem:[%s22201_s5 + $0x108] sm:$0xff] %v15546_v42  ;;  %v18295_v28 = vpop.f32.mrb[36].mxu0 }
 0x4d4   : > { %v18335_v62 = vadd.f32 %v18295_v28, %v17791_v56  ;;  %v15371_v11 = vpop.f32.mrb[37].mxu0 }
 0x4d5   : > { %v18336_v10 = vadd.f32 %v15371_v11, %v7994_v31  ;;  %v18296_v46 = vpop.f32.mrb[38].mxu0 }
 0x4d6   : > { %v15551_v61 = vadd.f32 %v18335_v62, %v22197_v51  ;;  %v18337_v27 = vadd.f32 %v18296_v46, %v17792_v57  ;;  %v15374_v55 = vpop.f32.mrb[39].mxu0 }
 0x4d7   : > { %v15549_v0 = vadd.f32 %v18336_v10, %v22197_v51  ;;  %v18338_v50 = vadd.f32 %v15374_v55, %v7997_v39 }
 0x4d8   : > { %15591 = vst [vmem:[%s22201_s5 + $0x130] sm:$0xff] %v15551_v61  ;;  %v15552_v18 = vadd.f32 %v18337_v27, %v22197_v51 }
 0x4d9   : > { %15589 = vst [vmem:[%s22201_s5 + $0x120] sm:$0xff] %v15549_v0  ;;  %v15550_v36 = vadd.f32 %v18338_v50, %v22197_v51 }
 0x4da   : > { %15592 = vst [vmem:[%s22201_s5 + $0x138] sm:$0xff] %v15552_v18 }
 0x4db   : > { %15590 = vst [vmem:[%s22201_s5 + $0x128] sm:$0xff] %v15550_v36 }
 0x4dc   : > { %19863 = shalt.err (!%p19860_p3)
}
 0x4dd   : > { %s19864_s25 = scalar_lea.hbm %s22288_s16, 5120  ;;  %s19868_s28 = scalar_lea.hbm %s22342_s3, 10240 }
 0x4de   : > { %p19865_p4 = scmp.ne.s32.totalorder %s22288_s16, %s19864_s25  ;;  %p19869_p9 = scmp.lt.u32.totalorder %s22288_s16, %s22342_s3 }
 0x4df   : > { %p19870_p10 = scmp.lt.u32.totalorder %s19868_s28, %s19864_s25  ;;  %p19872_p12 = scmp.lt.u32.totalorder %s19864_s25, %s22288_s16 }
 0x4e0   : > { %p19866_p7 = pnand %p19865_p4, %p19975_p5 }
 0x4e1   : > { %p19871_p11 = por %p19870_p10, %p19869_p9 }
 0x4e2   : > { %p19867_p8 = pneg %p19866_p7 }
 0x4e3   : > { %p19873_p13 = por %p19872_p12, %p19871_p11 }
 0x4e5   : > { %p19874_p0 = pnand %p19873_p13, %p19867_p8 }
 0x4e7   : > { %19877 = shalt.err (!%p19874_p0)
}
 0x4e8   : > { %s19915_s30 = smov 128   ;;  %s19916_s4 = smov 8  }
 0x4e9   : > { %19288 = dma.vmem_to_hbm [thread:$0]  (%p19975_p5), %s22290_s7, 5120, %s22288_s16, %s22298_s11, %s19915_s30, %s19915_s30, %s19916_s4  }
 0x4ea PF: > { %p19294_p1 = scmp.ge.s32.totalorder %s19912_s15, 2  ;;  %s15622_s5 = sand.u32 1, %s19900_s12  }
 0x4eb   : > { %s15623_s6 = scalar_lea.sflag [#allocation4], %s15622_s5 }
 0x4ec   : > { %p19291_p2 = pnand %p19294_p1, %p19979_p6 }
 0x4ee   : > { %19895 = dma.done.wait (!%p19291_p2), %s15623_s6, 5120  }
 0x4ef   : > { %19897 = vsyncadd (!%p19291_p2), %s15623_s6, 4294962176  ;;  %p13_p3 = scmp.ge.s32.totalorder %s19962_s18, 4   ;;  %s22356_s12 = smov %s19904_s13 }
 0x4f0   : > { %s22357_s13 = smov %s19908_s14  ;;  %s22358_s14 = smov %s19973_s21 }
 0x4f1   : > { %s22359_s15 = smov %s19962_s18  ;;  %15 = sbr.rel (!%p13_p3) target bundleno = 3 (0x3), region = 91 }
 0x4f8   :  { %15628 = vsyncpa [#allocation4], 1 }
 0x4f9   :  { %15630 = vsyncpa [#allocation4 + $0x1], 1 }

</bundles_post_ra>
